<compile_context>
chip_gen: v7x
topology: tpu7x:2x2x1
jax: 0.10.0
libtpu: 0.0.40
codegen_flags: <defaults>
</compile_context>

<pallas_src>
import jax
import jax.numpy as jnp
from jax.experimental import pallas as pl
from jax.experimental.pallas import tpu as pltpu

N_BATCH = 2          # batch (small, consistent with the module)
H_IN = W_IN = 28     # valid 5x5 conv -> 24x24, matching fc = 16*24*24
KH = KW = 5
C_OUT = 16
H_OUT = W_OUT = 24
HW = H_OUT * W_OUT                      # 576
TOTAL_P = N_BATCH * HW                  # 1152 = 9 * 128  (lane-dense)
NUM_CLASSES = 10
BN_EPS = 1e-5


def net_kernel(p_ref, wc_ref, gb_ref, w4_ref, bt_ref, fcb_ref, o_ref):
    """Fused: conv matmul -> batch stats -> BN rescale -> ReLU -> fc."""
    # ---- conv as MXU matmul, transposed / lane-dense: (16,25) @ (25,P) ----
    y = jnp.dot(wc_ref[...], p_ref[...],
                preferred_element_type=jnp.float32)            # (16, P)

    # ---- per-channel batch stats: two-pass, unbiased (ddof=1) ----
    mean = jnp.sum(y, axis=1, keepdims=True) * (1.0 / TOTAL_P)  # (16, 1)
    d = y - mean
    var = jnp.sum(d * d, axis=1, keepdims=True) * (1.0 / (TOTAL_P - 1))

    # ---- folded BN (conv bias cancels inside (y - mean)) + ReLU ----
    gb = gb_ref[...]                                            # (16, 2)
    gamma = gb[:, 0:1]
    beta = gb[:, 1:2]
    scale = gamma * jax.lax.rsqrt(var + BN_EPS)                 # EUP rsqrt
    act = jnp.maximum(scale * d + beta, 0.0)                    # (16, P)

    # ---- fused fc: per-batch masked contraction on the MXU ----
    # logits[n, k] = sum_{c, hw} act[c, n*HW + hw] * fc_w[k, c*HW + hw] + b[k]
    bt = bt_ref[...]                                            # (NB, P) batch mask
    w4 = w4_ref[...]                                            # (16, 10, P)
    rows = []
    for n in range(N_BATCH):                                    # static, NB = 2
        act_n = act * bt[n:n + 1, :]                            # (16, P) masked
        part = jnp.einsum('cqp,ckp->cqk', act_n[:, None, :], w4,
                          preferred_element_type=jnp.float32)   # (16, 1, 10)
        rows.append(jnp.sum(part, axis=0))                      # (1, 10)
    o_ref[...] = jnp.concatenate(rows, axis=0) + fcb_ref[...]   # (NB, 10)


def _vmem():
    return pl.BlockSpec(memory_space=pltpu.MemorySpace.VMEM)


def prepare_params(conv_w, bn_gamma, bn_beta, fc_w, fc_b, batch=N_BATCH):
    """One-time parameter re-layouts (hoisted out of the forward).

    conv bias is intentionally unused: it cancels exactly in scale*(y - mean)
    and does not affect the variance.
    """
    wc2 = conv_w.reshape(C_OUT, KH * KW).astype(jnp.float32)          # (16, 25)
    gb = jnp.stack([bn_gamma, bn_beta], axis=1).astype(jnp.float32)   # (16, 2)
    # fc_w is (10, 9216) with column index c*576 + hw (PyTorch NCHW flatten).
    w3 = fc_w.reshape(NUM_CLASSES, C_OUT, HW).transpose(1, 0, 2)      # (16, 10, 576)
    w4 = jnp.tile(w3, (1, 1, batch)).astype(jnp.float32)              # (16, 10, batch*576)
    p_batch = jnp.arange(batch * HW) // HW
    bt = (p_batch[None, :] == jnp.arange(batch)[:, None]).astype(jnp.float32)  # (batch, P)
    fcb = fc_b.reshape(1, NUM_CLASSES).astype(jnp.float32)
    return wc2, gb, w4, bt, fcb


@jax.jit
def net_forward(x, wc2, gb, w4, bt, fcb):
    """x: (N, 1, 28, 28) float32; remaining args from prepare_params()."""
    n = x.shape[0]
    # ---- glue: im2col in the TRANSPOSED layout (25, N*576), p = n*576+h*24+w
    xs = x[:, 0, :, :]                                                # (N, 28, 28)
    patches = jnp.stack(
        [xs[:, kh:kh + H_OUT, kw:kw + W_OUT]
         for kh in range(KH) for kw in range(KW)],
        axis=0,
    ).reshape(KH * KW, n * HW)                                        # (25, P)

    logits = pl.pallas_call(
        net_kernel,
        out_shape=jax.ShapeDtypeStruct((n, NUM_CLASSES), jnp.float32),
        in_specs=[_vmem()] * 6,
        out_specs=_vmem(),
    )(patches, wc2, gb, w4, bt, fcb)
    return logits


def _reference(x, conv_w, conv_b, bn_gamma, bn_beta, fc_w, fc_b):
    """Pure-JAX reference mirroring the PyTorch forward exactly (incl. bias)."""
    n = x.shape[0]
    xs = x[:, 0, :, :]
    patches = jnp.stack(
        [xs[:, kh:kh + H_OUT, kw:kw + W_OUT]
         for kh in range(KH) for kw in range(KW)],
        axis=-1,
    ).reshape(n * HW, KH * KW)                                        # (P, 25)
    wc = conv_w.reshape(C_OUT, KH * KW).T
    y = patches @ wc + conv_b[None, :]
    mean = y.mean(0)
    var = y.var(0, ddof=1)                                            # torch.var default
    std = jnp.sqrt(var + BN_EPS)
    tmp = bn_gamma / std
    y2 = patches @ (wc * tmp[None, :]) + (tmp * conv_b - tmp * mean + bn_beta)[None, :]
    y2 = jnp.maximum(y2, 0.0)
    # NHWC-flat -> NCHW flatten (as PyTorch's x.view(-1, 16*24*24))
    y2 = y2.reshape(n, HW, C_OUT).transpose(0, 2, 1).reshape(n, -1)
    return y2 @ fc_w.T + fc_b[None, :]


if __name__ == "__main__":
    key = jax.random.PRNGKey(0)
    k = jax.random.split(key, 7)

    x = jax.random.normal(k[0], (N_BATCH, 1, H_IN, W_IN), dtype=jnp.float32)

    # Deterministic parameter init (shapes from Net.__init__)
    conv_w = jax.random.normal(k[1], (C_OUT, 1, KH, KW), jnp.float32) * 0.1
    conv_b = jax.random.normal(k[2], (C_OUT,), jnp.float32) * 0.1
    bn_gamma = 1.0 + 0.1 * jax.random.normal(k[3], (C_OUT,), jnp.float32)
    bn_beta = 0.1 * jax.random.normal(k[4], (C_OUT,), jnp.float32)
    fc_w = jax.random.normal(k[5], (NUM_CLASSES, C_OUT * HW), jnp.float32) * 0.01
    fc_b = jax.random.normal(k[6], (NUM_CLASSES,), jnp.float32) * 0.1

    # One-time parameter preparation (not part of the per-forward cost).
    params = jax.block_until_ready(
        prepare_params(conv_w, bn_gamma, bn_beta, fc_w, fc_b))

    out = jax.block_until_ready(net_forward(x, *params))

    ref = _reference(x, conv_w, conv_b, bn_gamma, bn_beta, fc_w, fc_b)
    assert out.shape == (N_BATCH, NUM_CLASSES)
    assert jnp.allclose(out, ref, atol=1e-3, rtol=1e-3), "mismatch vs reference"

    print("KERNEL_OK")
</pallas_src>

<mosaic_0001>
module attributes {stable_mosaic.version = 11 : i64} {
  func.func @net_kernel(%arg0: memref<25x1152xf32, #tpu.memory_space<vmem>>, %arg1: memref<16x25xf32, #tpu.memory_space<vmem>>, %arg2: memref<16x2xf32, #tpu.memory_space<vmem>>, %arg3: memref<16x10x1152xf32, #tpu.memory_space<vmem>>, %arg4: memref<2x1152xf32, #tpu.memory_space<vmem>>, %arg5: memref<1x10xf32, #tpu.memory_space<vmem>>, %arg6: memref<2x10xf32, #tpu.memory_space<vmem>>) attributes {dimension_semantics = [], scalar_prefetch = 0 : i64, scratch_operands = 0 : i64, tpu.core_type = #tpu.core_type<tc>} {
    %c0 = arith.constant 0 : index
    %c0_0 = arith.constant 0 : index
    %0 = vector.load %arg1[%c0, %c0_0] : memref<16x25xf32, #tpu.memory_space<vmem>>, vector<16x25xf32>
    %c0_1 = arith.constant 0 : index
    %c0_2 = arith.constant 0 : index
    %1 = vector.load %arg0[%c0_1, %c0_2] : memref<25x1152xf32, #tpu.memory_space<vmem>>, vector<25x1152xf32>
    %cst = arith.constant dense<0.000000e+00> : vector<16x1152xf32>
    %2 = tpu.matmul %0, %1, %cst {dimension_numbers = #tpu.dot_dimension_numbers<[1], [0], [0], [1], [0, 0, 1, 1], [], []>} : vector<16x25xf32>, vector<25x1152xf32>, vector<16x1152xf32> -> vector<16x1152xf32>
    %cst_3 = arith.constant dense<0.000000e+00> : vector<16xf32>
    %3 = vector.multi_reduction <add>, %2, %cst_3 [1] : vector<16x1152xf32> to vector<16xf32>
    %4 = vector.shape_cast %3 : vector<16xf32> to vector<16x1xf32>
    %cst_4 = arith.constant 8.68055562E-4 : f32
    %5 = vector.broadcast %cst_4 : f32 to vector<16x1xf32>
    %6 = arith.mulf %4, %5 : vector<16x1xf32>
    %7 = vector.broadcast %6 : vector<16x1xf32> to vector<16x1152xf32>
    %8 = arith.subf %2, %7 : vector<16x1152xf32>
    %9 = arith.mulf %8, %8 : vector<16x1152xf32>
    %cst_5 = arith.constant dense<0.000000e+00> : vector<16xf32>
    %10 = vector.multi_reduction <add>, %9, %cst_5 [1] : vector<16x1152xf32> to vector<16xf32>
    %11 = vector.shape_cast %10 : vector<16xf32> to vector<16x1xf32>
    %cst_6 = arith.constant 8.68809758E-4 : f32
    %12 = vector.broadcast %cst_6 : f32 to vector<16x1xf32>
    %13 = arith.mulf %11, %12 : vector<16x1xf32>
    %c0_7 = arith.constant 0 : index
    %c0_8 = arith.constant 0 : index
    %14 = vector.load %arg2[%c0_7, %c0_8] : memref<16x2xf32, #tpu.memory_space<vmem>>, vector<16x2xf32>
    %15 = vector.extract_strided_slice %14 {offsets = [0, 0], sizes = [16, 1], strides = [1, 1]} : vector<16x2xf32> to vector<16x1xf32>
    %16 = vector.extract_strided_slice %14 {offsets = [0, 1], sizes = [16, 1], strides = [1, 1]} : vector<16x2xf32> to vector<16x1xf32>
    %cst_9 = arith.constant 9.99999974E-6 : f32
    %17 = vector.broadcast %cst_9 : f32 to vector<16x1xf32>
    %18 = arith.addf %13, %17 : vector<16x1xf32>
    %19 = math.rsqrt %18 : vector<16x1xf32>
    %20 = arith.mulf %15, %19 : vector<16x1xf32>
    %21 = vector.broadcast %20 : vector<16x1xf32> to vector<16x1152xf32>
    %22 = arith.mulf %21, %8 : vector<16x1152xf32>
    %23 = vector.broadcast %16 : vector<16x1xf32> to vector<16x1152xf32>
    %24 = arith.addf %22, %23 : vector<16x1152xf32>
    %cst_10 = arith.constant 0.000000e+00 : f32
    %25 = vector.broadcast %cst_10 : f32 to vector<16x1152xf32>
    %26 = arith.maximumf %24, %25 : vector<16x1152xf32>
    %c0_11 = arith.constant 0 : index
    %c0_12 = arith.constant 0 : index
    %27 = vector.load %arg4[%c0_11, %c0_12] : memref<2x1152xf32, #tpu.memory_space<vmem>>, vector<2x1152xf32>
    %c0_13 = arith.constant 0 : index
    %c0_14 = arith.constant 0 : index
    %c0_15 = arith.constant 0 : index
    %28 = vector.load %arg3[%c0_13, %c0_14, %c0_15] : memref<16x10x1152xf32, #tpu.memory_space<vmem>>, vector<16x10x1152xf32>
    %29 = vector.extract_strided_slice %27 {offsets = [0, 0], sizes = [1, 1152], strides = [1, 1]} : vector<2x1152xf32> to vector<1x1152xf32>
    %30 = vector.broadcast %29 : vector<1x1152xf32> to vector<16x1152xf32>
    %31 = arith.mulf %26, %30 : vector<16x1152xf32>
    %32 = vector.shape_cast %31 : vector<16x1152xf32> to vector<16x1x1152xf32>
    "tpu.trace_start"() <{level = 10 : i32, message = "cqp,ckp->cqk"}> : () -> ()
    %cst_16 = arith.constant dense<0.000000e+00> : vector<16x1x10xf32>
    %33 = tpu.matmul %32, %28, %cst_16 {dimension_numbers = #tpu.dot_dimension_numbers<[2], [2], [1], [1], [0, 0, 0, 1, 1, 1], [0], [0]>} : vector<16x1x1152xf32>, vector<16x10x1152xf32>, vector<16x1x10xf32> -> vector<16x1x10xf32>
    "tpu.trace_stop"() : () -> ()
    %cst_17 = arith.constant dense<0.000000e+00> : vector<1x10xf32>
    %34 = vector.multi_reduction <add>, %33, %cst_17 [0] : vector<16x1x10xf32> to vector<1x10xf32>
    %35 = vector.extract_strided_slice %27 {offsets = [1, 0], sizes = [1, 1152], strides = [1, 1]} : vector<2x1152xf32> to vector<1x1152xf32>
    %36 = vector.broadcast %35 : vector<1x1152xf32> to vector<16x1152xf32>
    %37 = arith.mulf %26, %36 : vector<16x1152xf32>
    %38 = vector.shape_cast %37 : vector<16x1152xf32> to vector<16x1x1152xf32>
    "tpu.trace_start"() <{level = 10 : i32, message = "cqp,ckp->cqk"}> : () -> ()
    %cst_18 = arith.constant dense<0.000000e+00> : vector<16x1x10xf32>
    %39 = tpu.matmul %38, %28, %cst_18 {dimension_numbers = #tpu.dot_dimension_numbers<[2], [2], [1], [1], [0, 0, 0, 1, 1, 1], [0], [0]>} : vector<16x1x1152xf32>, vector<16x10x1152xf32>, vector<16x1x10xf32> -> vector<16x1x10xf32>
    "tpu.trace_stop"() : () -> ()
    %cst_19 = arith.constant dense<0.000000e+00> : vector<1x10xf32>
    %40 = vector.multi_reduction <add>, %39, %cst_19 [0] : vector<16x1x10xf32> to vector<1x10xf32>
    %41 = tpu.concatenate %34, %40 in 0 : vector<1x10xf32>, vector<1x10xf32> -> vector<2x10xf32>
    %c0_20 = arith.constant 0 : index
    %c0_21 = arith.constant 0 : index
    %42 = vector.load %arg5[%c0_20, %c0_21] : memref<1x10xf32, #tpu.memory_space<vmem>>, vector<1x10xf32>
    %43 = vector.broadcast %42 : vector<1x10xf32> to vector<2x10xf32>
    %44 = arith.addf %41, %43 : vector<2x10xf32>
    %c0_22 = arith.constant 0 : index
    %c0_23 = arith.constant 0 : index
    %45 = vector.load %arg6[%c0_22, %c0_23] : memref<2x10xf32, #tpu.memory_space<vmem>>, vector<2x10xf32>
    tpu.vector_store %arg6[%c0_22, %c0_23], %44 {strides = array<i32>} : memref<2x10xf32, #tpu.memory_space<vmem>>, vector<2x10xf32>,
    return
  }
}

</mosaic_0001>

<bundles_post_ra>
// kernel: net_forward.1
= control target key start
LH: loop header
LB: loop body
LE: loop exit
PB: predicated region body
PF: predicated region fallthrough
CT: control target
= control target key end

     0   :  { %vm69_vm0 = vcmask 1040384   ;;  %v19069_v7 = vmov 0.0   ;;  %vm15955_vm1 = vmmov 1   ;;  %vm62_vm3 = vcmask 203776   ;;  %s19055_s0 = inlined_call_operand.vmem [shape: f32[25,1152], index: 0, kind: input, shape index: {}]   ;;  %s19056_s1 = inlined_call_operand.vmem [shape: f32[16,25], index: 1, kind: input, shape index: {}]   ;;  %s19057_s2 = inlined_call_operand.vmem [shape: f32[16,2], index: 2, kind: input, shape index: {}]   ;;  %s19058_s3 = inlined_call_operand.vmem [shape: f32[16,10,1152], index: 3, kind: input, shape index: {}]   ;;  %s19059_s4 = inlined_call_operand.vmem [shape: f32[2,1152], index: 4, kind: input, shape index: {}]   ;;  %s19060_s5 = inlined_call_operand.vmem [shape: f32[1,10], index: 5, kind: input, shape index: {}]   ;;  %s19061_s6 = inlined_call_operand.hbm [shape: f32[2,10], index: 6, kind: output, shape index: {}]  }
   0x1   :  { %v27_v0 = vld [vmem:[%s19055_s0 + $0x8] sm:$0xff]  ;;  %v36_v1 = vld [vmem:[%s19055_s0 + $0x50] sm:$0xff]  ;;  %v26_v2 = vld [vmem:[%s19055_s0] sm:$0xff]  ;;  %161 = vmatprep.mubr.f32.mxu0 %v19069_v7  ;;  %238 = vmatprep.mubr.f32.mxu1 %v19069_v7 }
   0x2   :  { %v14998_v3 = vpack.c.bf16 %v36_v1, %v27_v0  ;;  %v35_v4 = vld [vmem:[%s19055_s0 + $0x48] sm:$0xff]  ;;  %v29_v5 = vld [vmem:[%s19055_s0 + $0x18] sm:$0xff]  ;;  %v38_v6 = vld [vmem:[%s19055_s0 + $0x60] sm:$0xff] }
   0x3   :  { %v15000_v8 = vpack.c.bf16 %v35_v4, %v26_v2  ;;  %v15008_v9 = vpack.c.bf16 %v38_v6, %v29_v5  ;;  %v45_v10 = vld [vmem:[%s19055_s0 + $0x98] sm:$0xff]  ;;  %v54_v11 = vld [vmem:[%s19055_s0 + $0xe0] sm:$0x1]  ;;  %vm16024_vm2 = vmpackc.low %vm69_vm0, %vm15955_vm1 }
   0x4   :  { %14999 = vmatprep.subr.bf16.mxu0 %v14998_v3  ;;  %v15002_v13 = vpack.c.bf16 %v54_v11, %v45_v10  ;;  %v28_v14 = vld [vmem:[%s19055_s0 + $0x10] sm:$0xff]  ;;  %v37_v15 = vld [vmem:[%s19055_s0 + $0x58] sm:$0xff]  ;;  %v47_v19 = vld [vmem:[%s19055_s0 + $0xa8] sm:$0xff] }
   0x5   :  { %v44_v16 = vld [vmem:[%s19055_s0 + $0x90] sm:$0xff]  ;;  %15001 = vmatpush1.bf16.msra.mxu0 %v15000_v8  ;;  %15009 = vmatprep.subr.bf16.mxu1 %v15008_v9  ;;  %v15010_v17 = vpack.c.bf16 %v37_v15, %v28_v14  ;;  %v53_v18 = vld [vmem:[%s19055_s0 + $0xd8] sm:$0x1]  ;;  %v46_v23 = vld [vmem:[%s19055_s0 + $0xa0] sm:$0xff] }
   0x6   :  { %v56_v20 = vld [vmem:[%s19055_s0 + $0xf0] sm:$0x1]  ;;  %15004 = vmatprep.subr.msk.bf16.mxu0 %vm16024_vm2, %v15002_v13  ;;  %v15005_v21 = vpack.c.bf16 %v53_v18, %v44_v16  ;;  %v55_v24 = vld [vmem:[%s19055_s0 + $0xe8] sm:$0x1]  ;;  %v30_v28 = vld [vmem:[%s19055_s0 + $0x20] sm:$0xff] }
   0x7   :  { %v15012_v22 = vpack.c.bf16 %v56_v20, %v47_v19  ;;  %15011 = vmatpush1.bf16.msra.mxu1 %v15010_v17  ;;  %v15015_v25 = vpack.c.bf16 %v55_v24, %v46_v23  ;;  %v31_v26 = vld [vmem:[%s19055_s0 + $0x28] sm:$0xff]  ;;  %v40_v27 = vld [vmem:[%s19055_s0 + $0x70] sm:$0xff]  ;;  %v24_v29 = vld [vmem:[%s19056_s1] sm:$0xff] }
   0x8   :  { %v15018_v30 = vpack.c.bf16 %v40_v27, %v31_v26  ;;  %v39_v31 = vld [vmem:[%s19055_s0 + $0x68] sm:$0xff]  ;;  %v49_v32 = vld [vmem:[%s19055_s0 + $0xb8] sm:$0xff]  ;;  %v58_v34 = vld [vmem:[%s19055_s0 + $0x100] sm:$0x1] }
   0x9   :  { %15014 = vmatprep.subr.msk.bf16.mxu1 %vm16024_vm2, %v15012_v22  ;;  %15007 = vmatpush1.bf16.msk.msra.mxu0 %vm16024_vm2, %v15005_v21  ;;  %v15020_v33 = vpack.c.bf16 %v39_v31, %v30_v28  ;;  %v33_v35 = vld [vmem:[%s19055_s0 + $0x38] sm:$0xff]  ;;  %v42_v36 = vld [vmem:[%s19055_s0 + $0x80] sm:$0xff]  ;;  %v15022_v37 = vpack.c.bf16 %v58_v34, %v49_v32  ;;  %v48_v39 = vld [vmem:[%s19055_s0 + $0xb0] sm:$0xff] }
   0xa   :  { %15019 = vmatprep.subr.bf16.mxu0 %v15018_v30  ;;  %v15028_v38 = vpack.c.bf16 %v42_v36, %v33_v35  ;;  %v57_v40 = vld [vmem:[%s19055_s0 + $0xf8] sm:$0x1]  ;;  %v32_v41 = vld [vmem:[%s19055_s0 + $0x30] sm:$0xff]  ;;  %v51_v43 = vld [vmem:[%s19055_s0 + $0xc8] sm:$0xff] }
   0xb   :  { %15017 = vmatpush1.bf16.msk.msra.mxu1 %vm16024_vm2, %v15015_v25  ;;  %v41_v42 = vld [vmem:[%s19055_s0 + $0x78] sm:$0xff]  ;;  %v60_v44 = vld [vmem:[%s19055_s0 + $0x110] sm:$0x1]  ;;  %v34_v47 = vld [vmem:[%s19055_s0 + $0x40] sm:$0xff]  ;;  %v15025_v51 = vpack.c.bf16 %v57_v40, %v48_v39 }
   0xc   :  { %14643 = vmatmul.mubr.msk.f32.vlgmr.msra.gmra.mrb[0].mxu0 %vm62_vm3, %v24_v29  ;;  %15029 = vmatprep.subr.bf16.mxu1 %v15028_v38  ;;  %v15030_v45 = vpack.c.bf16 %v41_v42, %v32_v41  ;;  %v15032_v46 = vpack.c.bf16 %v60_v44, %v51_v43  ;;  %v43_v48 = vld [vmem:[%s19055_s0 + $0x88] sm:$0xff]  ;;  %v50_v49 = vld [vmem:[%s19055_s0 + $0xc0] sm:$0xff] }
   0xd   :  { %15021 = vmatpush1.bf16.msra.mxu0 %v15020_v33  ;;  %167 = vmatprep.mubr.f32.mxu0 %v19069_v7  ;;  %v25_v50 = vld [vmem:[%s19056_s1 + $0x8] sm:$0xff]  ;;  %v15038_v53 = vpack.c.bf16 %v43_v48, %v34_v47 }
   0xe   :  { %v59_v52 = vld [vmem:[%s19055_s0 + $0x108] sm:$0x1]  ;;  %14647 = vmatmul.mubr.msk.f32.vlgmr.msra.gmra.mrb[0].mxu1 %vm62_vm3, %v24_v29  ;;  %15024 = vmatprep.subr.msk.bf16.mxu0 %vm16024_vm2, %v15022_v37 }
   0xf   :  { %11 = vsyncpa [#allocation3], 0  ;;  %15031 = vmatpush1.bf16.msra.mxu1 %v15030_v45  ;;  %244 = vmatprep.mubr.f32.mxu1 %v19069_v7  ;;  %v15035_v54 = vpack.c.bf16 %v59_v52, %v50_v49  ;;  %v52_v55 = vld [vmem:[%s19055_s0 + $0xd0] sm:$0xff]  ;;  %v61_v56 = vld [vmem:[%s19055_s0 + $0x118] sm:$0x1]  ;;  %vm15960_vm4 = vmmov 0  }
  0x10   :  { %14644 = vmatmul.mubr.msk.f32.gmra.mrb[2].mxu0 %vm62_vm3, %v25_v50  ;;  %15034 = vmatprep.subr.msk.bf16.mxu1 %vm16024_vm2, %v15032_v46  ;;  %v15042_v57 = vpack.c.bf16 %v61_v56, %v52_v55  ;;  %vm7743_vm5 = vcmask 73728   ;;  %s15961_s20 = smov [#allocation2]   ;;  %vm14625_vm6 = vcmask 74752  }
  0x11   :  { %15027 = vmatpush1.bf16.msk.msra.mxu0 %vm16024_vm2, %v15025_v51  ;;  %315 = vmatprep.mubr.f32.mxu0 %v19069_v7  ;;  %s14633_s21 = sshll.u32 %s15961_s20, 4  ;;  %s14634_s21 = int_to_ptr.vmem [resolvable:$true] %s14633_s21 }
  0x12   :  { %14648 = vmatmul.mubr.msk.f32.gmra.mrb[2].mxu1 %vm62_vm3, %v25_v50  ;;  %15039 = vmatprep.subr.bf16.mxu0 %v15038_v53  ;;  %s15930_s22 = scalar_lea.vmem %s14634_s21, 32  ;;  %p15935_p1 = scmp.lt.s32.totalorder %s14634_s21, %s14634_s21 }
  0x13   :  { %15037 = vmatpush1.bf16.msk.msra.mxu1 %vm16024_vm2, %v15035_v54  ;;  %392 = vmatprep.mubr.f32.mxu1 %v19069_v7  ;;  %p15931_p0 = scmp.ne.s32.totalorder %s14634_s21, %s15930_s22  ;;  %p15936_p2 = scmp.lt.s32.totalorder %s15930_s22, %s15930_s22 }
  0x14   :  { %14651 = vmatmul.mubr.msk.f32.vlgmr.msra.gmra.mrb[4].mxu0 %vm62_vm3, %v24_v29 }
  0x15   :  { %15041 = vmatpush3.bf16.msra.mxu0 %v15038_v53  ;;  %321 = vmatprep.mubr.f32.mxu0 %v19069_v7  ;;  %p15937_p3 = por %p15936_p2, %p15935_p1 }
  0x16   :  { %14655 = vmatmul.mubr.msk.f32.vlgmr.msra.gmra.mrb[4].mxu1 %vm62_vm3, %v24_v29  ;;  %15044 = vmatprep.subr.msk.bf16.mxu0 %vm16024_vm2, %v15042_v57 }
  0x17   :  { %398 = vmatprep.mubr.f32.mxu1 %v19069_v7  ;;  %p15938_p4 = pnand %p15937_p3, %p15931_p0 }
  0x18   :  { %14652 = vmatmul.mubr.msk.f32.gmra.mrb[6].mxu0 %vm62_vm3, %v25_v50 }
  0x19   :  { %15047 = vmatpush3.bf16.msk.msra.mxu0 %vm16024_vm2, %v15042_v57  ;;  %14771 = vmatprep.mubr.msk.f32.mxu0 %vm62_vm3, %v24_v29  ;;  %v15956_v57 = vmov 0  }
  0x1a   :  { %14656 = vmatmul.mubr.msk.f32.gmra.mrb[6].mxu1 %vm62_vm3, %v25_v50  ;;  %15920 = vset.pattern.permute.xlu1 %v15956_v57 }
  0x1c   :  { %14772 = vmatmul.mubr.msk.f32.vlgmr.msra.gmra.mrb[8].mxu0 %vm62_vm3, %v25_v50 }
  0xdf   :  { %v163_v58 = vpop.f32.mrb[0].mxu0 }
  0xe0   :  { %v165_v59 = vpop.f32.mrb[1].mxu0 }
  0xe1   :  { %v480_v60 = vadd.f32 %v165_v59, %v163_v58  ;;  %v240_v61 = vpop.f32.mrb[0].mxu1 }
  0xe2   :  { %v242_v62 = vpop.f32.mrb[1].mxu1 }
  0xe3   :  { %v481_v63 = vadd.f32 %v480_v60, %v240_v61  ;;  %v16154_v0 = vpop.f32.mrb[2].mxu0 }
  0xe4   :  { %v16156_v1 = vpop.f32.mrb[3].mxu0 }
  0xe5   :  { %v490_v2 = vadd.f32 %v16156_v1, %v16154_v0  ;;  %v482_v3 = vadd.f32 %v481_v63, %v242_v62  ;;  %v16160_v4 = vpop.f32.mrb[2].mxu1 }
  0xe6   :  { %v16162_v5 = vpop.f32.mrb[3].mxu1 }
  0xe7   :  { %v491_v6 = vadd.f32 %v490_v2, %v16160_v4  ;;  %v317_v8 = vpop.f32.mrb[4].mxu0 }
  0xe8   :  { %v483_v9 = vadd.f32 %v482_v3, %v317_v8  ;;  %v319_v10 = vpop.f32.mrb[5].mxu0 }
  0xe9   :  { %v492_v11 = vadd.f32 %v491_v6, %v16162_v5  ;;  %v394_v12 = vpop.f32.mrb[4].mxu1 }
  0xea   :  { %v484_v13 = vadd.f32 %v483_v9, %v319_v10  ;;  %v396_v14 = vpop.f32.mrb[5].mxu1 }
  0xeb   :  { %v16166_v15 = vpop.f32.mrb[6].mxu0 }
  0xec   :  { %v493_v16 = vadd.f32 %v492_v11, %v16166_v15  ;;  %v485_v17 = vadd.f32 %v484_v13, %v394_v12  ;;  %v16169_v18 = vpop.f32.mrb[7].mxu0 }
  0xed   :  { %v16171_v19 = vpop.f32.mrb[6].mxu1 }
  0xee   :  { %v494_v20 = vadd.f32 %v493_v16, %v16169_v18  ;;  %v486_v21 = vadd.f32 %v485_v17, %v396_v14  ;;  %v16174_v22 = vpop.f32.mrb[7].mxu1 }
  0xef   :  { %v16176_v23 = vpop.f32.mrb[8].mxu0 }
  0xf0   :  { %v495_v24 = vadd.f32 %v494_v20, %v16171_v19  ;;  %v471_v25 = vpop.f32.mrb[9].mxu0  ;;  %v655_v20 = vld [vmem:[%s19058_s3 + $0x50] sm:$0x3] }
  0xf1   :  { %v487_v26 = vadd.f32 %v486_v21, %v471_v25 }
  0xf2   :  { %v496_v27 = vadd.f32 %v495_v24, %v16174_v22 }
  0xf3   :  { %488 = vadd.xlane.f32.xlu0 %v487_v26  ;;  %v654_v26 = vld [vmem:[%s19058_s3 + $0x48] sm:$0x3] }
  0xf4   :  { %v497_v28 = vadd.f32 %v16176_v23, %v496_v27 }
  0xf6   :  { %498 = vadd.xlane.f32.xlu1 %v497_v28 }
 0x180   :  { %v489_v29 = vpop.xlane.xlu0 %488 }
 0x181   :  { %v500_v30 = vmul.f32 0.00086805556, %v489_v29  ;;  %v663_v29 = vld [vmem:[%s19058_s3 + $0x90] sm:$0xff] }
 0x183   :  { %v16181_v31 = vsub.f32 %v163_v58, %v500_v30  ;;  %v16183_v32 = vsub.f32 %v165_v59, %v500_v30  ;;  %v16185_v33 = vsub.f32 %v240_v61, %v500_v30  ;;  %v16187_v34 = vsub.f32 %v242_v62, %v500_v30  ;;  %v560_v58 = vld [vmem:[%s19057_s2] sm:$0xff]  ;;  %v499_v63 = vpop.xlane.xlu1 %498 }
 0x184   :  { %v16193_v37 = vsub.f32 %v317_v8, %v500_v30  ;;  %v16197_v40 = vsub.f32 %v319_v10, %v500_v30  ;;  %v16201_v43 = vsub.f32 %v394_v12, %v500_v30  ;;  %v16205_v46 = vsub.f32 %v396_v14, %v500_v30 }
 0x185   :  { %v520_v35 = vmul.f32 %v16181_v31, %v16181_v31  ;;  %v521_v36 = vmul.f32 %v16183_v32, %v16183_v32  ;;  %v522_v38 = vmul.f32 %v16185_v33, %v16185_v33  ;;  %v523_v41 = vmul.f32 %v16187_v34, %v16187_v34 }
 0x186   :  { %v524_v44 = vmul.f32 %v16193_v37, %v16193_v37  ;;  %v525_v47 = vmul.f32 %v16197_v40, %v16197_v40  ;;  %v16209_v49 = vsub.f32 %v471_v25, %v500_v30  ;;  %v526_v50 = vmul.f32 %v16201_v43, %v16201_v43  ;;  %v645_v25 = vld [vmem:[%s19058_s3] sm:$0xff]  ;;  %v672_v30 = vld [vmem:[%s19058_s3 + $0xd8] sm:$0x3] }
 0x187   :  { %v538_v39 = vadd.f32 %v521_v36, %v520_v35  ;;  %v527_v52 = vmul.f32 %v16205_v46, %v16205_v46  ;;  %v19062_v59 = vmov 1   ;;  %v501_v2 = vmul.f32 0.00086805556, %v499_v63 }
 0x188   :  { %v528_v54 = vmul.f32 %v16209_v49, %v16209_v49  ;;  %15921 = vset.pattern.permute.xlu0 %v19062_v59  ;;  %v16267_v28 = vpack.c.bf16 %v654_v26, %v645_v25 }
 0x189   :  { %v539_v42 = vadd.f32 %v538_v39, %v522_v38  ;;  %v16222_v8 = vsub.f32 %v16154_v0, %v501_v2  ;;  %v16225_v9 = vsub.f32 %v16156_v1, %v501_v2  ;;  %v16232_v12 = vsub.f32 %v16160_v4, %v501_v2  ;;  %v646_v4 = vld [vmem:[%s19058_s3 + $0x8] sm:$0xff] }
 0x18a   :  { %v16236_v14 = vsub.f32 %v16162_v5, %v501_v2  ;;  %v16241_v16 = vsub.f32 %v16166_v15, %v501_v2  ;;  %v664_v5 = vld [vmem:[%s19058_s3 + $0x98] sm:$0xff]  ;;  %v16254_v24 = vpack.c.bf16 %v655_v20, %v646_v4  ;;  %v673_v15 = vld [vmem:[%s19058_s3 + $0xe0] sm:$0x3]  ;;  %19218 = vst [vmem:[#allocation7_spill] sm:$0xff] %v16267_v28  ;;  %v16276_v35 = vsub.f32 %v16169_v18, %v501_v2 }
 0x18b   :  { %v540_v45 = vadd.f32 %v539_v42, %v523_v41  ;;  %v529_v10 = vmul.f32 %v16222_v8, %v16222_v8  ;;  %v530_v11 = vmul.f32 %v16225_v9, %v16225_v9  ;;  %v531_v0 = vmul.f32 %v16232_v12, %v16232_v12  ;;  %v648_v42 = vld [vmem:[%s19058_s3 + $0x18] sm:$0xff] }
 0x18c   :  { %v532_v17 = vmul.f32 %v16236_v14, %v16236_v14  ;;  %19216 = vst [vmem:[#allocation5_spill] sm:$0xff] %v16254_v24  ;;  %v16265_v27 = vpack.c.bf16 %v673_v15, %v664_v5  ;;  %v533_v36 = vmul.f32 %v16241_v16, %v16241_v16  ;;  %15049 = vmatprep.subr.bf16.mxu1 %v16254_v24 }
 0x18d   :  { %v541_v48 = vadd.f32 %v540_v45, %v524_v44  ;;  %v548_v13 = vadd.f32 %v530_v11, %v529_v10  ;;  %v16281_v38 = vpack.c.bf16 %v672_v30, %v663_v29  ;;  %15051 = vmatpush1.bf16.xpose.msra.mxu1 %v16267_v28  ;;  %v16287_v41 = vsub.f32 %v16171_v19, %v501_v2  ;;  %v657_v44 = vld [vmem:[%s19058_s3 + $0x60] sm:$0x3]  ;;  %v666_v45 = vld [vmem:[%s19058_s3 + $0xa8] sm:$0xff]  ;;  %v675_v19 = vld [vmem:[%s19058_s3 + $0xf0] sm:$0x3] }
 0x18e   :  { %19217 = vst [vmem:[#allocation6_spill] sm:$0xff] %v16265_v27  ;;  %15068 = vmatprep.subr.bf16.mxu0 %v16265_v27  ;;  %v534_v18 = vmul.f32 %v16276_v35, %v16276_v35  ;;  %v15958_v10 = vmov 1966171168  }
 0x18f   :  { %v542_v51 = vadd.f32 %v541_v48, %v525_v47  ;;  %v549_v1 = vadd.f32 %v548_v13, %v531_v0  ;;  %19219 = vst [vmem:[#allocation8_spill] sm:$0xff] %v16281_v38  ;;  %15070 = vmatpush1.bf16.xpose.msra.mxu0 %v16281_v38  ;;  %19220 = vst [vmem:[#allocation9_spill] sm:$0xff] %v16287_v41  ;;  %v16300_v48 = vpack.c.bf16 %v657_v44, %v648_v42 }
 0x190   :  { %v1062_v11 = vunpack.c.l.s4 %v15958_v10 }
 0x191   :  { %v543_v53 = vadd.f32 %v542_v51, %v526_v50  ;;  %v550_v21 = vadd.f32 %v549_v1, %v532_v17  ;;  %19221 = vst [vmem:[#allocation10_spill] sm:$0xff] %v16300_v48  ;;  %v16305_v50 = vpack.c.bf16 %v675_v19, %v666_v45  ;;  %v16308_v51 = vsub.f32 %v16174_v22, %v501_v2 }
 0x192   :  { %15053 = vmatprep.subr.bf16.mxu1 %v16300_v48  ;;  %v1063_v15 = vunpack.c.0.s8 %v1062_v11 }
 0x193   :  { %v544_v55 = vadd.f32 %v543_v53, %v527_v52  ;;  %v551_v39 = vadd.f32 %v550_v21, %v533_v36  ;;  %19222 = vst [vmem:[#allocation11_spill] sm:$0xff] %v16305_v50  ;;  %19223 = vst [vmem:[#allocation12_spill] sm:$0xff] %v16308_v51  ;;  %v535_v52 = vmul.f32 %v16287_v41, %v16287_v41  ;;  %15072 = vmatprep.subr.bf16.mxu0 %v16305_v50 }
 0x195   :  { %v545_v56 = vadd.f32 %v544_v55, %v528_v54  ;;  %v552_v47 = vadd.f32 %v551_v39, %v534_v18  ;;  %v16315_v54 = vsub.f32 %v16176_v23, %v501_v2  ;;  %v536_v55 = vmul.f32 %v16308_v51, %v16308_v51 }
 0x197   :  { %546 = vadd.xlane.f32.xlu0 %v545_v56  ;;  %v553_v53 = vadd.f32 %v552_v47, %v535_v52  ;;  %19224 = vst [vmem:[#allocation13_spill] sm:$0xff] %v16315_v54 }
 0x199   :  { %v554_v56 = vadd.f32 %v553_v53, %v536_v55 }
 0x1ad   :  { %598 = vperm.xlu0 %15921, %v560_v58  }
 0x1b1   :  { %15922 = vset.pattern.permute.xlu0 %v15956_v57  ;;  %v537_v57 = vmul.f32 %v16315_v54, %v16315_v54 }
 0x1b3   :  { %v555_v22 = vadd.f32 %v554_v56, %v537_v57 }
 0x224   :  { %v547_v60 = vpop.xlane.xlu0 %546 }
 0x225   :  { %v558_v61 = vmul.f32 0.00086880976, %v547_v60  ;;  %v936_v60 = vlaneseq }
 0x227   :  { %v562_v62 = vadd.f32 1e-05, %v558_v61  ;;  %v16327_v61 = vshrl.u32 %v936_v60, 7 }
 0x229   :  { %15925 = vrsqrt.f32 %v562_v62  ;;  %v16330_v23 = vsub.s32 0, %v16327_v61  ;;  %v16335_v62 = vld [vmem:[%s19059_s4] sm:$0xff]  ;;  %v16338_v63 = vsub.s32 2, %v16327_v61  ;;  %v16341_v2 = vsub.s32 4, %v16327_v61 }
 0x22a   :  { %v16394_v45 = vsub.s32 %v1063_v15, %v16327_v61  ;;  %v16558_v38 = vsub.s32 3, %v16327_v61 }
 0x22b   :  { %v939_v13 = vrot.slane %v16335_v62, %v16330_v23  ;;  %v943_v0 = vrot.slane %v16335_v62, %v16338_v63  ;;  %v947_v1 = vrot.slane %v16335_v62, %v16341_v2 }
 0x22c   :  { %v16396_v47 = vpop.permute.xlu0 %598 }
 0x22d   :  { %v16368_v25 = vrot.slane %v939_v13, %v16330_v23  ;;  %v16371_v26 = vrot.slane %v943_v0, %v16330_v23  ;;  %v16374_v29 = vrot.slane %v947_v1, %v16330_v23 }
 0x22f   :  { %19225 = vst [vmem:[#allocation14_spill] sm:$0xff] %v16368_v25  ;;  %19226 = vst [vmem:[#allocation15_spill] sm:$0xff] %v16371_v26 }
 0x230   :  { %19227 = vst [vmem:[#allocation16_spill] sm:$0xff] %v16374_v29 }
 0x233   :  { %v15926_v3 = vpop.eup %15925 }
 0x234   :  { %v566_v6 = vmul.f32 %v15926_v3, %v560_v58  ;;  %v16324_v58 = vld [vmem:[%s19057_s2 + $0x8] sm:$0xff]  ;;  %v16344_v3 = vsub.s32 6, %v16327_v61 }
 0x236   :  { %570 = vperm.xlu1 %15920, %v566_v6   ;;  %v16349_v6 = vld [vmem:[%s19059_s4 + $0x8] sm:$0xff]  ;;  %v951_v17 = vrot.slane %v16335_v62, %v16344_v3 }
 0x237   :  { %v955_v4 = vrot.slane %v16349_v6, %v16330_v23  ;;  %v959_v20 = vrot.slane %v16349_v6, %v16338_v63  ;;  %v963_v5 = vrot.slane %v16349_v6, %v16341_v2  ;;  %v967_v21 = vrot.slane %v16349_v6, %v16344_v3 }
 0x238   :  { %v16377_v30 = vrot.slane %v951_v17, %v16330_v23 }
 0x239   :  { %v16380_v36 = vrot.slane %v955_v4, %v16330_v23  ;;  %v16385_v18 = vrot.slane %v959_v20, %v16330_v23  ;;  %v16388_v42 = vrot.slane %v963_v5, %v16330_v23  ;;  %v16391_v44 = vrot.slane %v967_v21, %v16330_v23 }
 0x23a   :  { %15923 = vset.pattern.permute.xlu1 %v19062_v59  ;;  %19228 = vst [vmem:[#allocation17_spill] sm:$0xff] %v16377_v30 }
 0x23b   :  { %19229 = vst [vmem:[#allocation18_spill] sm:$0xff] %v16380_v36  ;;  %19230 = vst [vmem:[#allocation19_spill] sm:$0xff] %v16385_v18 }
 0x23c   :  { %19231 = vst [vmem:[#allocation20_spill] sm:$0xff] %v16388_v42  ;;  %19232 = vst [vmem:[#allocation21_spill] sm:$0xff] %v16391_v44 }
 0x25a   :  { %556 = vadd.xlane.f32.xlu1 %v555_v22 }
 0x26b   :  { %603 = vperm.xlu1 %15923, %v16324_v58  }
 0x2b5   :  { %v16382_v39 = vpop.permute.xlu1 %570 }
 0x2b6   :  { %v578_v19 = vmul.f32 %v16382_v39, %v16181_v31  ;;  %v579_v52 = vmul.f32 %v16382_v39, %v16183_v32  ;;  %v580_v53 = vmul.f32 %v16382_v39, %v16185_v33  ;;  %v581_v55 = vmul.f32 %v16382_v39, %v16187_v34 }
 0x2b7   :  { %v582_v56 = vmul.f32 %v16382_v39, %v16193_v37  ;;  %v583_v57 = vmul.f32 %v16382_v39, %v16197_v40  ;;  %v584_v22 = vmul.f32 %v16382_v39, %v16201_v43  ;;  %v585_v31 = vmul.f32 %v16382_v39, %v16205_v46 }
 0x2b8   :  { %v16415_v32 = vadd.f32 %v16396_v47, %v578_v19  ;;  %v16418_v33 = vadd.f32 %v16396_v47, %v579_v52  ;;  %v16421_v34 = vadd.f32 %v16396_v47, %v580_v53  ;;  %v16424_v37 = vadd.f32 %v16396_v47, %v581_v55 }
 0x2b9   :  { %v16427_v40 = vadd.f32 %v16396_v47, %v582_v56  ;;  %v16430_v43 = vadd.f32 %v16396_v47, %v583_v57  ;;  %v16433_v46 = vadd.f32 %v16396_v47, %v584_v22  ;;  %v16436_v60 = vadd.f32 %v16396_v47, %v585_v31 }
 0x2ba   :  { %v19067_v10 = vmax.f32 %v16415_v32, 0.0  ;;  %v19065_v11 = vmax.f32 %v16418_v33, 0.0  ;;  %v19064_v13 = vmax.f32 %v16421_v34, 0.0  ;;  %v19063_v0 = vmax.f32 %v16424_v37, 0.0 }
 0x2bb   :  { %v19066_v1 = vmax.f32 %v16427_v40, 0.0  ;;  %v19068_v17 = vmax.f32 %v16430_v43, 0.0  ;;  %v19071_v4 = vmax.f32 %v16433_v46, 0.0  ;;  %v19073_v20 = vmax.f32 %v16436_v60, 0.0 }
 0x2bc   :  { %v1017_v5 = vmul.f32 %v16368_v25, %v19067_v10  ;;  %v1018_v21 = vmul.f32 %v16371_v26, %v19065_v11  ;;  %v1019_v15 = vmul.f32 %v16374_v29, %v19064_v13  ;;  %v1020_v19 = vmul.f32 %v16377_v30, %v19063_v0  ;;  %v699_v26 = vld [vmem:[%s19058_s3 + $0x1b0] sm:$0xff]  ;;  %v708_v25 = vld [vmem:[%s19058_s3 + $0x1f8] sm:$0x3] }
 0x2bd   :  { %v1021_v52 = vmul.f32 %v16380_v36, %v19066_v1  ;;  %v1022_v53 = vmul.f32 %v16385_v18, %v19068_v17  ;;  %v1023_v55 = vmul.f32 %v16388_v42, %v19071_v4  ;;  %v1024_v56 = vmul.f32 %v16391_v44, %v19073_v20 }
 0x2be   :  { %v1053_v57 = vcombine.low %v1017_v5, %v1018_v21  ;;  %v1054_v22 = vcombine.high %v1017_v5, %v1018_v21  ;;  %v1055_v31 = vcombine.low %v1019_v15, %v1020_v19  ;;  %v1056_v59 = vcombine.high %v1019_v15, %v1020_v19 }
 0x2bf   :  { %v1057_v0 = vcombine.low %v1021_v52, %v1022_v53  ;;  %v1058_v13 = vcombine.high %v1021_v52, %v1022_v53  ;;  %v1059_v11 = vcombine.low %v1023_v55, %v1024_v56  ;;  %v1060_v1 = vcombine.high %v1023_v55, %v1024_v56 }
 0x2c0   :  { %v1067_v10 = vrot.slane %v1053_v57, %v16394_v45  ;;  %v1074_v17 = vrot.slane %v1054_v22, %v16394_v45  ;;  %v1081_v7 = vrot.slane %v1055_v31, %v16394_v45  ;;  %v1088_v4 = vrot.slane %v1056_v59, %v16394_v45 }
 0x2c1   :  { %v1095_v50 = vrot.slane %v1057_v0, %v16394_v45  ;;  %v1102_v20 = vrot.slane %v1058_v13, %v16394_v45  ;;  %v1109_v5 = vrot.slane %v1059_v11, %v16394_v45  ;;  %v1116_v21 = vrot.slane %v1060_v1, %v16394_v45 }
 0x2c2   :  { %v1117_v15 = vcombine.low %v1067_v10, %v1081_v7  ;;  %v1118_v19 = vcombine.high %v1067_v10, %v1081_v7  ;;  %v1119_v52 = vcombine.low %v1074_v17, %v1088_v4  ;;  %v1120_v53 = vcombine.high %v1074_v17, %v1088_v4  ;;  %v647_v7 = vld [vmem:[%s19058_s3 + $0x10] sm:$0xff]  ;;  %v656_v17 = vld [vmem:[%s19058_s3 + $0x58] sm:$0x3]  ;;  %v665_v4 = vld [vmem:[%s19058_s3 + $0xa0] sm:$0xff] }
 0x2c3   :  { %v1121_v55 = vcombine.low %v1095_v50, %v1109_v5  ;;  %v1122_v56 = vcombine.high %v1095_v50, %v1109_v5  ;;  %v1123_v57 = vcombine.low %v1102_v20, %v1116_v21  ;;  %v1124_v22 = vcombine.high %v1102_v20, %v1116_v21  ;;  %v674_v20 = vld [vmem:[%s19058_s3 + $0xe8] sm:$0x3] }
 0x2c4   :  { %v16479_v31 = vrot.slane %v1117_v15, %v16394_v45  ;;  %v16482_v59 = vrot.slane %v1119_v52, %v16394_v45  ;;  %v16485_v13 = vrot.slane %v1118_v19, %v16394_v45  ;;  %v16488_v11 = vrot.slane %v1120_v53, %v16394_v45  ;;  %v650_v19 = vld [vmem:[%s19058_s3 + $0x28] sm:$0xff] }
 0x2c5   :  { %v16494_v50 = vrot.slane %v1121_v55, %v16394_v45  ;;  %v16497_v10 = vrot.slane %v1123_v57, %v16394_v45  ;;  %v16500_v0 = vrot.slane %v1122_v56, %v16394_v45  ;;  %v16503_v1 = vrot.slane %v1124_v22, %v16394_v45  ;;  %v659_v55 = vld [vmem:[%s19058_s3 + $0x70] sm:$0x3]  ;;  %v668_v56 = vld [vmem:[%s19058_s3 + $0xb8] sm:$0xff]  ;;  %v677_v57 = vld [vmem:[%s19058_s3 + $0x100] sm:$0x3] }
 0x2c6   :  { %v16519_v21 = vsub.s32 1, %v16327_v61  ;;  %v16528_v52 = vpack.c.bf16 %v656_v17, %v647_v7  ;;  %v16530_v53 = vpack.c.bf16 %v674_v20, %v665_v4  ;;  %v16560_v28 = vpack.c.bf16 %v659_v55, %v650_v19  ;;  %v649_v19 = vld [vmem:[%s19058_s3 + $0x20] sm:$0xff]  ;;  %v658_v55 = vld [vmem:[%s19058_s3 + $0x68] sm:$0x3] }
 0x2c7   :  { %v16516_v5 = vcombine.low %v16479_v31, %v16494_v50  ;;  %v16523_v15 = vcombine.low %v16485_v13, %v16500_v0  ;;  %v16543_v22 = vcombine.low %v16482_v59, %v16497_v10  ;;  %v16547_v7 = vcombine.low %v16488_v11, %v16503_v1 }
 0x2c8   :  { %19233 = vst [vmem:[#allocation22_spill] sm:$0xff] %v16528_v52  ;;  %19234 = vst [vmem:[#allocation23_spill] sm:$0xff] %v16530_v53  ;;  %v16562_v27 = vpack.c.bf16 %v677_v57, %v668_v56  ;;  %v586_v44 = vmul.f32 %v16382_v39, %v16209_v49  ;;  %v667_v49 = vld [vmem:[%s19058_s3 + $0xb0] sm:$0xff]  ;;  %v676_v39 = vld [vmem:[%s19058_s3 + $0xf8] sm:$0x3]  ;;  %v16794_v41 = vpack.c.bf16 %v708_v25, %v699_v26  ;;  %v19252_v26 = vmax.f32 %v16415_v32, 0.0 }
 0x2c9   :  { %v1430_v17 = vrot.slane %v16516_v5, %v16519_v21  ;;  %v1825_v4 = vrot.slane %v16523_v15, %v16519_v21  ;;  %v1426_v20 = vrot.slane %v16516_v5, %v16330_v23  ;;  %v1821_v48 = vrot.slane %v16523_v15, %v16330_v23  ;;  %19235 = vst [vmem:[#allocation24_spill] sm:$0xff] %v16560_v28  ;;  %v670_v56 = vld [vmem:[%s19058_s3 + $0xc8] sm:$0xff]  ;;  %v679_v57 = vld [vmem:[%s19058_s3 + $0x110] sm:$0x3] }
 0x2ca   :  { %19236 = vst [vmem:[#allocation25_spill] sm:$0xff] %v16562_v27  ;;  %v1438_v24 = vrot.slane %v16516_v5, %v16558_v38  ;;  %v1833_v54 = vrot.slane %v16523_v15, %v16558_v38  ;;  %v16618_v18 = vpack.c.bf16 %v679_v57, %v670_v56  ;;  %v7778_v57 = vrot.slane %v16335_v62, %v16519_v21 }
 0x2cb   :  { %1532 = vmatprep.mubr.f32.mxu1 %v1430_v17  ;;  %1927 = vmatprep.mubr.f32.mxu0 %v1825_v4  ;;  %v16602_v17 = vadd.f32 %v16396_v47, %v586_v44  ;;  %v19255_v32 = vmax.f32 %v16424_v37, 0.0  ;;  %v19259_v37 = vmax.f32 %v16436_v60, 0.0 }
 0x2cc   :  { %1533 = vmatmul.mubr.f32.vlgmr.msra.gmra.mrb[8].mxu1 %v1426_v20  ;;  %1928 = vmatmul.mubr.f32.vlgmr.msra.gmra.mrb[10].mxu0 %v1821_v48  ;;  %v644_v48 = vld [vmem:[%s19059_s4 + $0x10] sm:$0x3]  ;;  %v16605_v20 = vpack.c.bf16 %v658_v55, %v649_v19  ;;  %19241 = vst [vmem:[#allocation30_spill] sm:$0xff] %v16618_v18  ;;  %v669_v55 = vld [vmem:[%s19058_s3 + $0xc0] sm:$0xff] }
 0x2cd   :  { %15055 = vmatpush1.bf16.xpose.msra.mxu1 %v16528_v52  ;;  %15074 = vmatpush1.bf16.xpose.msra.mxu0 %v16530_v53  ;;  %19237 = vst [vmem:[#allocation26_spill] sm:$0xff] %v16602_v17  ;;  %v971_v4 = vrot.slane %v644_v48, %v16330_v23  ;;  %v1829_v53 = vrot.slane %v16523_v15, %v16338_v63  ;;  %v16614_v52 = vsub.s32 5, %v16327_v61  ;;  %v19087_v19 = vmax.f32 %v16602_v17, 0.0 }
 0x2ce   :  { %1602 = vmatprep.mubr.f32.mxu1 %v1438_v24  ;;  %1997 = vmatprep.mubr.f32.mxu0 %v1833_v54  ;;  %v652_v24 = vld [vmem:[%s19058_s3 + $0x38] sm:$0xff]  ;;  %v661_v54 = vld [vmem:[%s19058_s3 + $0x80] sm:$0x3]  ;;  %19238 = vst [vmem:[#allocation27_spill] sm:$0xff] %v16605_v20  ;;  %v19093_v17 = vmov 0.0|0.0  }
 0x2cf   :  { %15057 = vmatprep.subr.bf16.mxu1 %v16560_v28  ;;  %15076 = vmatprep.subr.bf16.mxu0 %v16562_v27  ;;  %v16607_v27 = vpack.c.bf16 %v676_v39, %v667_v49  ;;  %v1434_v28 = vrot.slane %v16516_v5, %v16338_v63  ;;  %v16616_v42 = vpack.c.bf16 %v661_v54, %v652_v24  ;;  %v678_v49 = vld [vmem:[%s19058_s3 + $0x108] sm:$0x3]  ;;  %v16645_v39 = vsub.s32 7, %v16327_v61 }
 0x2d0   :  { %v1446_v44 = vrot.slane %v16516_v5, %v16614_v52  ;;  %v1841_v47 = vrot.slane %v16523_v15, %v16614_v52  ;;  %v16626_v48 = vrot.slane %v971_v4, %v16330_v23  ;;  %v16654_v56 = vpack.c.bf16 %v678_v49, %v669_v55 }
 0x2d1   :  { %19239 = vst [vmem:[#allocation28_spill] sm:$0xff] %v16607_v27  ;;  %19240 = vst [vmem:[#allocation29_spill] sm:$0xff] %v16616_v42  ;;  %v7782_v4 = vrot.slane %v16335_v62, %v16558_v38  ;;  %v1837_v61 = vrot.slane %v16523_v15, %v16341_v2  ;;  %v7790_v55 = vrot.slane %v16335_v62, %v16645_v39 }
 0x2d2   :  { %19242 = vst [vmem:[#allocation31_spill] sm:$0xff] %v16626_v48  ;;  %v16650_v24 = vmul.f32 %v16626_v48, %v19087_v19  ;;  %19244 = vst [vmem:[#allocation33_spill] sm:$0xff] %v16654_v56  ;;  %v7794_v49 = vrot.slane %v16349_v6, %v16519_v21  ;;  %v7798_v19 = vrot.slane %v16349_v6, %v16558_v38  ;;  %v681_v48 = vld [vmem:[%s19058_s3 + $0x120] sm:$0xff] }
 0x2d3   :  { %v16734_v36 = vrot.slane %v7790_v55, %v16519_v21  ;;  %v16754_v55 = vcombine.high %v16479_v31, %v16494_v50  ;;  %v693_v31 = vld [vmem:[%s19058_s3 + $0x180] sm:$0x3]  ;;  %v702_v50 = vld [vmem:[%s19058_s3 + $0x1c8] sm:$0xff] }
 0x2d4   :  { %1603 = vmatmul.mubr.f32.vlgmr.msra.gmra.mrb[8].mxu1 %v1434_v28  ;;  %1998 = vmatmul.mubr.f32.vlgmr.msra.gmra.mrb[10].mxu0 %v1829_v53  ;;  %v651_v28 = vld [vmem:[%s19058_s3 + $0x30] sm:$0xff]  ;;  %v660_v53 = vld [vmem:[%s19058_s3 + $0x78] sm:$0x3] }
 0x2d5   :  { %15059 = vmatpush1.bf16.xpose.msra.mxu1 %v16605_v20  ;;  %15078 = vmatpush1.bf16.xpose.msra.mxu0 %v16607_v27  ;;  %v16652_v54 = vpack.c.bf16 %v660_v53, %v651_v28  ;;  %v7786_v28 = vrot.slane %v16335_v62, %v16614_v52  ;;  %v16672_v53 = vcombine.high %v16488_v11, %v16503_v1  ;;  %v653_v62 = vld [vmem:[%s19058_s3 + $0x40] sm:$0xff] }
 0x2d6   :  { %1672 = vmatprep.mubr.f32.mxu1 %v1446_v44  ;;  %2067 = vmatprep.mubr.f32.mxu0 %v1841_v47  ;;  %v1442_v44 = vrot.slane %v16516_v5, %v16341_v2  ;;  %v16666_v47 = vcombine.high %v16482_v59, %v16497_v10  ;;  %v1454_v59 = vrot.slane %v16516_v5, %v16645_v39  ;;  %v709_v27 = vld [vmem:[%s19058_s3 + $0x200] sm:$0x3] }
 0x2d7   :  { %15061 = vmatprep.subr.bf16.mxu1 %v16616_v42  ;;  %15080 = vmatprep.subr.bf16.mxu0 %v16618_v18  ;;  %19243 = vst [vmem:[#allocation32_spill] sm:$0xff] %v16652_v54  ;;  %v1849_v10 = vrot.slane %v16523_v15, %v16645_v39  ;;  %v1196_v11 = vrot.slane %v16650_v24, %v16394_v45  ;;  %v700_v18 = vld [vmem:[%s19058_s3 + $0x1b8] sm:$0xff]  ;;  %19245 = vst [vmem:[#allocation34_spill] sm:$0xff] %v16734_v36 }
 0x2d8   :  { %v7802_v1 = vrot.slane %v16349_v6, %v16614_v52  ;;  %v16716_v42 = vrot.slane %v7778_v57, %v16519_v21  ;;  %v690_v57 = vld [vmem:[%s19058_s3 + $0x168] sm:$0x3] }
 0x2d9   :  { %v1204_v20 = vcombine.high %v1196_v11, %v1196_v11  ;;  %v16792_v51 = vpack.c.bf16 %v690_v57, %v681_v48  ;;  %v19253_v48 = vmax.f32 %v16418_v33, 0.0 }
 0x2dc   :  { %1673 = vmatmul.mubr.f32.vlgmr.msra.gmra.mrb[8].mxu1 %v1442_v44  ;;  %2068 = vmatmul.mubr.f32.vlgmr.msra.gmra.mrb[10].mxu0 %v1837_v61  ;;  %v662_v44 = vld [vmem:[%s19058_s3 + $0x88] sm:$0x3]  ;;  %v671_v61 = vld [vmem:[%s19058_s3 + $0xd0] sm:$0xff] }
 0x2dd   :  { %15063 = vmatpush1.bf16.xpose.msra.mxu1 %v16652_v54  ;;  %15082 = vmatpush1.bf16.xpose.msra.mxu0 %v16654_v56  ;;  %v680_v56 = vld [vmem:[%s19058_s3 + $0x118] sm:$0x3]  ;;  %v7806_v54 = vrot.slane %v16349_v6, %v16645_v39  ;;  %v16719_v6 = vrot.slane %v7782_v4, %v16519_v21  ;;  %v16737_v4 = vrot.slane %v7794_v49, %v16519_v21 }
 0x2de   :  { %1742 = vmatprep.mubr.f32.mxu1 %v1454_v59  ;;  %2137 = vmatprep.mubr.f32.mxu0 %v1849_v10  ;;  %v682_v59 = vld [vmem:[%s19058_s3 + $0x128] sm:$0xff]  ;;  %v691_v10 = vld [vmem:[%s19058_s3 + $0x170] sm:$0x3]  ;;  %v16742_v30 = vpack.c.bf16 %v662_v44, %v653_v62  ;;  %v16744_v29 = vpack.c.bf16 %v680_v56, %v671_v61  ;;  %v16760_v49 = vrot.slane %v7802_v1, %v16519_v21 }
 0x2df   :  { %15064 = vmatprep.subr.bf16.mxu1 %v19093_v17  ;;  %15083 = vmatprep.subr.bf16.mxu0 %v19093_v17  ;;  %v16722_v17 = vrot.slane %v7786_v28, %v16519_v21  ;;  %19246 = vst [vmem:[#allocation35_spill] sm:$0xff] %v16737_v4  ;;  %v16740_v28 = vrot.slane %v7798_v19, %v16519_v21  ;;  %v684_v19 = vld [vmem:[%s19058_s3 + $0x138] sm:$0xff]  ;;  %v711_v1 = vld [vmem:[%s19058_s3 + $0x210] sm:$0x3] }
 0x2e0   :  { %19247 = vst [vmem:[#allocation36_spill] sm:$0xff] %v16742_v30  ;;  %19248 = vst [vmem:[#allocation37_spill] sm:$0xff] %v16744_v29  ;;  %v1450_v56 = vrot.slane %v16516_v5, %v16344_v3  ;;  %v1845_v62 = vrot.slane %v16523_v15, %v16344_v3  ;;  %v16768_v44 = vcombine.high %v16485_v13, %v16500_v0 }
 0x2e1   :  { %v16780_v5 = vrot.slane %v7806_v54, %v16519_v21  ;;  %v16782_v15 = vpack.c.bf16 %v691_v10, %v682_v59  ;;  %v16784_v61 = vpack.c.bf16 %v709_v27, %v700_v18  ;;  %v16787_v13 = vrot.slane %v1196_v11, %v16394_v45 }
 0x2e2   :  { %v16790_v0 = vrot.slane %v1204_v20, %v16394_v45  ;;  %v2220_v27 = vrot.slane %v16754_v55, %v16519_v21  ;;  %v16800_v18 = vpack.c.bf16 %v693_v31, %v684_v19  ;;  %v16802_v54 = vpack.c.bf16 %v711_v1, %v702_v50 }
 0x2e3   :  { %19249 = vst [vmem:[#allocation38_spill] sm:$0xff] %v16782_v15  ;;  %19250 = vst [vmem:[#allocation39_spill] sm:$0xff] %v16784_v61  ;;  %v19251_v11 = vmov 0.0   ;;  %v2615_v25 = vrot.slane %v16768_v44, %v16519_v21  ;;  %v7856_v20 = vmul.f32 %v16716_v42, %v19252_v26  ;;  %v7857_v59 = vmul.f32 %v16719_v6, %v19253_v48 }
 0x2e4   :  { %1743 = vmatmul.mubr.f32.vlgmr.msra.gmra.mrb[8].mxu1 %v1450_v56  ;;  %2138 = vmatmul.mubr.f32.vlgmr.msra.gmra.mrb[10].mxu0 %v1845_v62  ;;  %v1458_v57 = vrot.slane %v16787_v13, %v16330_v23  ;;  %v19254_v19 = vmax.f32 %v16421_v34, 0.0  ;;  %v7859_v62 = vmul.f32 %v16734_v36, %v19255_v32  ;;  %v1853_v33 = vrot.slane %v16790_v0, %v16330_v23 }
 0x2e5   :  { %15066 = vmatpush3.bf16.xpose.msra.mxu1 %v16742_v30  ;;  %15085 = vmatpush3.bf16.xpose.msra.mxu0 %v16744_v29  ;;  %v19256_v50 = vmax.f32 %v16427_v40, 0.0  ;;  %v19257_v26 = vmax.f32 %v16430_v43, 0.0  ;;  %v19258_v34 = vmax.f32 %v16433_v46, 0.0  ;;  %v7863_v32 = vmul.f32 %v16780_v5, %v19259_v37 }
 0x2e6   :  { %14778 = vmatprep.mubr.msk.f32.mxu1 %vm15960_vm4, %v19251_v11  ;;  %14785 = vmatprep.mubr.msk.f32.mxu0 %vm15960_vm4, %v19251_v11  ;;  %v7858_v56 = vmul.f32 %v16722_v17, %v19254_v19 }
 0x2e7   :  { %v557_v10 = vpop.xlane.xlu1 %556  ;;  %15087 = vmatprep.subr.bf16.mxu1 %v16782_v15  ;;  %15106 = vmatprep.subr.bf16.mxu0 %v16784_v61  ;;  %v7860_v1 = vmul.f32 %v16737_v4, %v19256_v50  ;;  %v7861_v48 = vmul.f32 %v16740_v28, %v19257_v26  ;;  %v7862_v19 = vmul.f32 %v16760_v49, %v19258_v34 }
 0x2e8   :  { %v559_v31 = vmul.f32 0.00086880976, %v557_v10  ;;  %v7892_v10 = vcombine.low %v7856_v20, %v7857_v59  ;;  %v7893_v61 = vcombine.high %v7856_v20, %v7857_v59  ;;  %v7894_v29 = vcombine.low %v7858_v56, %v7859_v62  ;;  %v683_v20 = vld [vmem:[%s19058_s3 + $0x130] sm:$0xff] }
 0x2e9   :  { %v7895_v30 = vcombine.high %v7858_v56, %v7859_v62  ;;  %v7896_v40 = vcombine.low %v7860_v1, %v7861_v48  ;;  %v7897_v36 = vcombine.high %v7860_v1, %v7861_v48  ;;  %v7898_v50 = vcombine.low %v7862_v19, %v7863_v32  ;;  %v704_v1 = vld [vmem:[%s19058_s3 + $0x1d8] sm:$0xff]  ;;  %v713_v48 = vld [vmem:[%s19058_s3 + $0x220] sm:$0x3] }
 0x2ea   :  { %v563_v15 = vadd.f32 1e-05, %v559_v31  ;;  %v7899_v4 = vcombine.high %v7862_v19, %v7863_v32  ;;  %v7906_v43 = vrot.slane %v7892_v10, %v16394_v45  ;;  %v16842_v46 = vrot.slane %v7893_v61, %v16394_v45 }
 0x2eb   :  { %v7920_v60 = vrot.slane %v7894_v29, %v16394_v45  ;;  %v16846_v26 = vrot.slane %v7895_v30, %v16394_v45  ;;  %v16855_v59 = vrot.slane %v7897_v36, %v16394_v45  ;;  %v7948_v61 = vrot.slane %v7898_v50, %v16394_v45  ;;  %v692_v29 = vld [vmem:[%s19058_s3 + $0x178] sm:$0x3]  ;;  %v701_v30 = vld [vmem:[%s19058_s3 + $0x1c0] sm:$0xff] }
 0x2ec   :  { %15927 = vrsqrt.f32 %v563_v15  ;;  %14779 = vmatmul.mubr.f32.vlgmr.msra.gmra.mrb[8].mxu1 %v1458_v57  ;;  %14786 = vmatmul.mubr.f32.vlgmr.msra.gmra.mrb[10].mxu0 %v1853_v33  ;;  %v7934_v15 = vrot.slane %v7896_v40, %v16394_v45  ;;  %v710_v57 = vld [vmem:[%s19058_s3 + $0x208] sm:$0x3]  ;;  %v7955_v56 = vrot.slane %v7899_v4, %v16394_v45  ;;  %v16889_v10 = vpack.c.bf16 %v692_v29, %v683_v20 }
 0x2ed   :  { %15089 = vmatpush1.bf16.xpose.msra.mxu1 %v16792_v51  ;;  %15108 = vmatpush1.bf16.xpose.msra.mxu0 %v16794_v41  ;;  %v7956_v36 = vcombine.low %v7906_v43, %v7920_v60  ;;  %v7957_v62 = vcombine.high %v7906_v43, %v7920_v60  ;;  %v7958_v31 = vcombine.low %v16842_v46, %v16846_v26 }
 0x2ee   :  { %2322 = vmatprep.mubr.f32.mxu1 %v2220_v27  ;;  %2717 = vmatprep.mubr.f32.mxu0 %v2615_v25  ;;  %v686_v27 = vld [vmem:[%s19058_s3 + $0x148] sm:$0xff]  ;;  %v695_v25 = vld [vmem:[%s19058_s3 + $0x190] sm:$0x3]  ;;  %v7959_v4 = vcombine.high %v16842_v46, %v16846_v26  ;;  %v7960_v33 = vcombine.low %v7934_v15, %v7948_v61  ;;  %v7961_v34 = vcombine.high %v7934_v15, %v7948_v61 }
 0x2ef   :  { %15091 = vmatprep.subr.bf16.mxu1 %v16800_v18  ;;  %15110 = vmatprep.subr.bf16.mxu0 %v16802_v54  ;;  %v7962_v19 = vcombine.low %v16855_v59, %v7955_v56  ;;  %v7963_v37 = vcombine.high %v16855_v59, %v7955_v56  ;;  %v7970_v32 = vrot.slane %v7956_v36, %v16394_v45 }
 0x2f0   :  { %v16891_v40 = vpack.c.bf16 %v710_v57, %v701_v30  ;;  %v7984_v50 = vrot.slane %v7957_v62, %v16394_v45  ;;  %v7998_v43 = vrot.slane %v7960_v33, %v16394_v45  ;;  %v2216_v46 = vrot.slane %v16754_v55, %v16330_v23  ;;  %v685_v62 = vld [vmem:[%s19058_s3 + $0x140] sm:$0xff]  ;;  %v703_v33 = vld [vmem:[%s19058_s3 + $0x1d0] sm:$0xff] }
 0x2f1   :  { %v2611_v60 = vrot.slane %v16768_v44, %v16330_v23  ;;  %v16899_v26 = vpack.c.bf16 %v695_v25, %v686_v27  ;;  %v8012_v15 = vrot.slane %v7961_v34, %v16394_v45  ;;  %v2228_v20 = vrot.slane %v16754_v55, %v16558_v38  ;;  %v694_v27 = vld [vmem:[%s19058_s3 + $0x188] sm:$0x3] }
 0x2f2   :  { %v16904_v59 = vpack.c.bf16 %v713_v48, %v704_v1  ;;  %v16906_v61 = vcombine.low %v7970_v32, %v7998_v43  ;;  %v16908_v29 = vcombine.high %v7970_v32, %v7998_v43  ;;  %v2623_v30 = vrot.slane %v16768_v44, %v16558_v38  ;;  %v712_v1 = vld [vmem:[%s19058_s3 + $0x218] sm:$0x3]  ;;  %v706_v34 = vld [vmem:[%s19058_s3 + $0x1e8] sm:$0xff]  ;;  %v715_v32 = vld [vmem:[%s19058_s3 + $0x230] sm:$0x3] }
 0x2f3   :  { %v16912_v57 = vcombine.low %v7984_v50, %v8012_v15  ;;  %v16914_v56 = vcombine.high %v7984_v50, %v8012_v15  ;;  %v688_v48 = vld [vmem:[%s19058_s3 + $0x158] sm:$0xff]  ;;  %v16945_v50 = vpack.c.bf16 %v694_v27, %v685_v62  ;;  %v2224_v43 = vrot.slane %v16754_v55, %v16338_v63 }
 0x2f4   :  { %19260 = vst [vmem:[#allocation40_spill] sm:$0xff] %v16904_v59  ;;  %2323 = vmatmul.mubr.f32.vlgmr.msra.gmra.mrb[10].mxu1 %v2216_v46  ;;  %2718 = vmatmul.mubr.f32.vlgmr.msra.gmra.mrb[12].mxu0 %v2611_v60  ;;  %v16949_v46 = vpack.c.bf16 %v712_v1, %v703_v33  ;;  %v2619_v60 = vrot.slane %v16768_v44, %v16338_v63  ;;  %v687_v1 = vld [vmem:[%s19058_s3 + $0x150] sm:$0xff] }
 0x2f5   :  { %15093 = vmatpush1.bf16.xpose.msra.mxu1 %v16889_v10  ;;  %2392 = vmatprep.mubr.f32.mxu1 %v2228_v20  ;;  %19261 = vst [vmem:[#allocation41_spill] sm:$0xff] %v16945_v50  ;;  %v2236_v15 = vrot.slane %v16754_v55, %v16614_v52  ;;  %v7991_v62 = vrot.slane %v7959_v4, %v16394_v45  ;;  %v705_v4 = vld [vmem:[%s19058_s3 + $0x1e0] sm:$0xff] }
 0x2f6   :  { %v15928_v36 = vpop.eup %15927  ;;  %15112 = vmatpush1.bf16.xpose.msra.mxu0 %v16891_v40  ;;  %2787 = vmatprep.mubr.f32.mxu0 %v2623_v30  ;;  %19262 = vst [vmem:[#allocation42_spill] sm:$0xff] %v16949_v46  ;;  %v16957_v30 = vpack.c.bf16 %v715_v32, %v706_v34  ;;  %v8005_v27 = vrot.slane %v7962_v19, %v16394_v45  ;;  %v714_v19 = vld [vmem:[%s19058_s3 + $0x228] sm:$0x3] }
 0x2f7   :  { %v567_v25 = vmul.f32 %v15928_v36, %v16324_v58  ;;  %15095 = vmatprep.subr.bf16.mxu1 %v16899_v26  ;;  %15114 = vmatprep.subr.bf16.mxu0 %v16904_v59  ;;  %v697_v58 = vld [vmem:[%s19058_s3 + $0x1a0] sm:$0x3]  ;;  %v7977_v36 = vrot.slane %v7958_v31, %v16394_v45  ;;  %v2631_v33 = vrot.slane %v16768_v44, %v16614_v52  ;;  %v696_v31 = vld [vmem:[%s19058_s3 + $0x198] sm:$0x3] }
 0x2f8   :  { %v16955_v20 = vpack.c.bf16 %v697_v58, %v688_v48  ;;  %19264 = vst [vmem:[#allocation44_spill] sm:$0xff] %v16957_v30  ;;  %v16985_v58 = vpack.c.bf16 %v696_v31, %v687_v1  ;;  %v707_v1 = vld [vmem:[%s19058_s3 + $0x1f0] sm:$0xff]  ;;  %v716_v31 = vld [vmem:[%s19058_s3 + $0x238] sm:$0x3] }
 0x2f9   :  { %575 = vperm.xlu0 %15922, %v567_v25   ;;  %v8019_v25 = vrot.slane %v7963_v37, %v16394_v45  ;;  %v16981_v37 = vcombine.low %v7977_v36, %v8005_v27  ;;  %v16987_v34 = vcombine.high %v7977_v36, %v8005_v27  ;;  %v2639_v36 = vrot.slane %v16768_v44, %v16645_v39  ;;  %v698_v27 = vld [vmem:[%s19058_s3 + $0x1a8] sm:$0x3] }
 0x2fa   :  { %19263 = vst [vmem:[#allocation43_spill] sm:$0xff] %v16955_v20  ;;  %19267 = vst [vmem:[#allocation47_spill] sm:$0xff] %v16985_v58 }
 0x2fb   :  { %19265 = vst [vmem:[#allocation45_spill] sm:$0xff] %v16981_v37  ;;  %v16983_v48 = vcombine.low %v7991_v62, %v8019_v25  ;;  %19268 = vst [vmem:[#allocation48_spill] sm:$0xff] %v16987_v34  ;;  %v16989_v32 = vcombine.high %v7991_v62, %v8019_v25  ;;  %v689_v62 = vld [vmem:[%s19058_s3 + $0x160] sm:$0xff]  ;;  %v19272_v25 = vmov 0.0|0.0  }
 0x2fc   :  { %2393 = vmatmul.mubr.f32.vlgmr.msra.gmra.mrb[10].mxu1 %v2224_v43  ;;  %v19270_v43 = vmov 1  }
 0x2fd   :  { %2788 = vmatmul.mubr.f32.vlgmr.msra.gmra.mrb[12].mxu0 %v2619_v60  ;;  %15097 = vmatpush1.bf16.xpose.msra.mxu1 %v16945_v50  ;;  %19266 = vst [vmem:[#allocation46_spill] sm:$0xff] %v16983_v48  ;;  %19269 = vst [vmem:[#allocation49_spill] sm:$0xff] %v16989_v32  ;;  %v2232_v60 = vrot.slane %v16754_v55, %v16341_v2  ;;  %v2244_v48 = vrot.slane %v16754_v55, %v16645_v39 }
 0x2fe   :  { %2462 = vmatprep.mubr.f32.mxu1 %v2236_v15  ;;  %15116 = vmatpush1.bf16.xpose.msra.mxu0 %v16949_v46  ;;  %v16994_v15 = vpack.c.bf16 %v714_v19, %v705_v4  ;;  %v718_v4 = vld [vmem:[%s19058_s3 + $0x248] sm:$0xff]  ;;  %v727_v19 = vld [vmem:[%s19058_s3 + $0x290] sm:$0x3]  ;;  %v2635_v32 = vrot.slane %v16768_v44, %v16344_v3 }
 0x2ff   :  { %2857 = vmatprep.mubr.f32.mxu0 %v2631_v33  ;;  %15099 = vmatprep.subr.bf16.mxu1 %v16955_v20  ;;  %v2627_v33 = vrot.slane %v16768_v44, %v16341_v2  ;;  %v17038_v34 = vpack.c.bf16 %v727_v19, %v718_v4  ;;  %v717_v44 = vld [vmem:[%s19058_s3 + $0x240] sm:$0xff]  ;;  %v738_v19 = vld [vmem:[%s19058_s3 + $0x2e8] sm:$0xff] }
 0x300   :  { %15118 = vmatprep.subr.bf16.mxu0 %v16957_v30  ;;  %15924 = vset.pattern.permute.xlu0 %v19270_v43  ;;  %19271 = vst [vmem:[#allocation50_spill] sm:$0xff] %v16994_v15  ;;  %v736_v43 = vld [vmem:[%s19058_s3 + $0x2d8] sm:$0xff] }
 0x301   :  { %19275 = vst [vmem:[#allocation53_spill] sm:$0xff] %v17038_v34 }
 0x304   :  { %2463 = vmatmul.mubr.f32.vlgmr.msra.gmra.mrb[10].mxu1 %v2232_v60  ;;  %v745_v60 = vld [vmem:[%s19058_s3 + $0x320] sm:$0x3] }
 0x305   :  { %2858 = vmatmul.mubr.f32.vlgmr.msra.gmra.mrb[12].mxu0 %v2627_v33  ;;  %15101 = vmatpush1.bf16.xpose.msra.mxu1 %v16985_v58  ;;  %v2240_v33 = vrot.slane %v16754_v55, %v16344_v3  ;;  %v1234_v55 = vcombine.high %v16787_v13, %v16787_v13  ;;  %v735_v13 = vld [vmem:[%s19058_s3 + $0x2d0] sm:$0xff] }
 0x306   :  { %2532 = vmatprep.mubr.f32.mxu1 %v2244_v48  ;;  %15120 = vmatpush1.bf16.xpose.msra.mxu0 %v16994_v15  ;;  %v17024_v48 = vpack.c.bf16 %v698_v27, %v689_v62  ;;  %v17040_v62 = vpack.c.bf16 %v745_v60, %v736_v43  ;;  %v726_v27 = vld [vmem:[%s19058_s3 + $0x288] sm:$0x3]  ;;  %v747_v43 = vld [vmem:[%s19058_s3 + $0x330] sm:$0x3] }
 0x307   :  { %2927 = vmatprep.mubr.f32.mxu0 %v2639_v36  ;;  %15102 = vmatprep.subr.bf16.mxu1 %v19272_v25  ;;  %v17034_v36 = vpack.c.bf16 %v716_v31, %v707_v1  ;;  %v744_v1 = vld [vmem:[%s19058_s3 + $0x318] sm:$0x3]  ;;  %v17072_v4 = vpack.c.bf16 %v726_v27, %v717_v44  ;;  %v2248_v60 = vrot.slane %v1234_v55, %v16330_v23  ;;  %v719_v55 = vld [vmem:[%s19058_s3 + $0x250] sm:$0xff] }
 0x308   :  { %15121 = vmatprep.subr.bf16.mxu0 %v19272_v25  ;;  %19273 = vst [vmem:[#allocation51_spill] sm:$0xff] %v17024_v48  ;;  %19276 = vst [vmem:[#allocation54_spill] sm:$0xff] %v17040_v62  ;;  %v720_v31 = vld [vmem:[%s19058_s3 + $0x258] sm:$0xff]  ;;  %v3010_v44 = vrot.slane %v16543_v22, %v16519_v21  ;;  %v17088_v27 = vpack.c.bf16 %v747_v43, %v738_v19  ;;  %v749_v19 = vld [vmem:[%s19058_s3 + $0x340] sm:$0x3]  ;;  %v3006_v43 = vrot.slane %v16543_v22, %v16330_v23 }
 0x309   :  { %19274 = vst [vmem:[#allocation52_spill] sm:$0xff] %v17034_v36  ;;  %19277 = vst [vmem:[#allocation55_spill] sm:$0xff] %v17072_v4 }
 0x30a   :  { %19280 = vst [vmem:[#allocation58_spill] sm:$0xff] %v17088_v27 }
 0x30c   :  { %2533 = vmatmul.mubr.f32.vlgmr.msra.gmra.mrb[10].mxu1 %v2240_v33  ;;  %v17081_v33 = vpack.c.bf16 %v744_v1, %v735_v13  ;;  %v746_v13 = vld [vmem:[%s19058_s3 + $0x328] sm:$0x3] }
 0x30d   :  { %2928 = vmatmul.mubr.f32.vlgmr.msra.gmra.mrb[12].mxu0 %v2635_v32  ;;  %15104 = vmatpush3.bf16.xpose.msra.mxu1 %v17024_v48  ;;  %v1236_v32 = vcombine.high %v16790_v0, %v16790_v0  ;;  %v729_v0 = vld [vmem:[%s19058_s3 + $0x2a0] sm:$0x3]  ;;  %v722_v1 = vld [vmem:[%s19058_s3 + $0x268] sm:$0xff] }
 0x30e   :  { %15123 = vmatpush3.bf16.xpose.msra.mxu0 %v17034_v36  ;;  %14792 = vmatprep.mubr.msk.f32.mxu1 %vm15960_vm4, %v19251_v11  ;;  %19278 = vst [vmem:[#allocation56_spill] sm:$0xff] %v17081_v33  ;;  %v19325_v36 = vld [vmem:[#allocation20_spill] sm:$0xff]  ;;  %v19326_v48 = vld [vmem:[#allocation21_spill] sm:$0xff] }
 0x30f   :  { %14799 = vmatprep.mubr.msk.f32.mxu0 %vm15960_vm4, %v19251_v11  ;;  %15125 = vmatprep.subr.bf16.mxu1 %v17038_v34  ;;  %v2643_v37 = vrot.slane %v1236_v32, %v16330_v23  ;;  %v3405_v34 = vrot.slane %v16547_v7, %v16519_v21  ;;  %v728_v32 = vld [vmem:[%s19058_s3 + $0x298] sm:$0x3] }
 0x310   :  { %15144 = vmatprep.subr.bf16.mxu0 %v17040_v62  ;;  %v17084_v62 = vpack.c.bf16 %v729_v0, %v720_v31  ;;  %v17114_v31 = vpack.c.bf16 %v728_v32, %v719_v55  ;;  %v740_v0 = vld [vmem:[%s19058_s3 + $0x2f8] sm:$0xff]  ;;  %v3018_v55 = vrot.slane %v16543_v22, %v16558_v38 }
 0x311   :  { %v17132_v32 = vpack.c.bf16 %v749_v19, %v740_v0  ;;  %v724_v0 = vld [vmem:[%s19058_s3 + $0x278] sm:$0xff] }
 0x312   :  { %19279 = vst [vmem:[#allocation57_spill] sm:$0xff] %v17084_v62  ;;  %19281 = vst [vmem:[#allocation59_spill] sm:$0xff] %v17114_v31 }
 0x313   :  { %19284 = vst [vmem:[#allocation62_spill] sm:$0xff] %v17132_v32 }
 0x314   :  { %14793 = vmatmul.mubr.f32.vlgmr.msra.gmra.mrb[10].mxu1 %v2248_v60 }
 0x315   :  { %14800 = vmatmul.mubr.f32.vlgmr.msra.gmra.mrb[12].mxu0 %v2643_v37  ;;  %15127 = vmatpush1.bf16.xpose.msra.mxu1 %v17072_v4  ;;  %v737_v37 = vld [vmem:[%s19058_s3 + $0x2e0] sm:$0xff] }
 0x316   :  { %3112 = vmatprep.mubr.f32.mxu1 %v3010_v44  ;;  %15146 = vmatpush1.bf16.xpose.msra.mxu0 %v17081_v33  ;;  %v17124_v60 = vpack.c.bf16 %v746_v13, %v737_v37  ;;  %v3401_v44 = vrot.slane %v16547_v7, %v16330_v23  ;;  %v721_v37 = vld [vmem:[%s19058_s3 + $0x260] sm:$0xff]  ;;  %v730_v13 = vld [vmem:[%s19058_s3 + $0x2a8] sm:$0x3] }
 0x317   :  { %3507 = vmatprep.mubr.f32.mxu0 %v3405_v34  ;;  %15129 = vmatprep.subr.bf16.mxu1 %v17084_v62  ;;  %v731_v34 = vld [vmem:[%s19058_s3 + $0x2b0] sm:$0x3]  ;;  %v3413_v62 = vrot.slane %v16547_v7, %v16558_v38  ;;  %v17158_v19 = vpack.c.bf16 %v730_v13, %v721_v37  ;;  %v3026_v37 = vrot.slane %v16543_v22, %v16614_v52 }
 0x318   :  { %15148 = vmatprep.subr.bf16.mxu0 %v17088_v27  ;;  %19282 = vst [vmem:[#allocation60_spill] sm:$0xff] %v17124_v60  ;;  %v17128_v27 = vpack.c.bf16 %v731_v34, %v722_v1  ;;  %v739_v1 = vld [vmem:[%s19058_s3 + $0x2f0] sm:$0xff]  ;;  %v748_v34 = vld [vmem:[%s19058_s3 + $0x338] sm:$0x3] }
 0x319   :  { %19285 = vst [vmem:[#allocation63_spill] sm:$0xff] %v17158_v19 }
 0x31a   :  { %19283 = vst [vmem:[#allocation61_spill] sm:$0xff] %v17128_v27 }
 0x31c   :  { %3113 = vmatmul.mubr.f32.vlgmr.msra.gmra.mrb[12].mxu1 %v3006_v43  ;;  %v742_v43 = vld [vmem:[%s19058_s3 + $0x308] sm:$0xff] }
 0x31d   :  { %3508 = vmatmul.mubr.f32.vlgmr.msra.gmra.mrb[14].mxu0 %v3401_v44  ;;  %15131 = vmatpush1.bf16.xpose.msra.mxu1 %v17114_v31  ;;  %v751_v44 = vld [vmem:[%s19058_s3 + $0x350] sm:$0x3]  ;;  %v3421_v31 = vrot.slane %v16547_v7, %v16614_v52 }
 0x31e   :  { %3182 = vmatprep.mubr.f32.mxu1 %v3018_v55  ;;  %15150 = vmatpush1.bf16.xpose.msra.mxu0 %v17124_v60  ;;  %v3014_v55 = vrot.slane %v16543_v22, %v16338_v63  ;;  %v17176_v13 = vpack.c.bf16 %v751_v44, %v742_v43  ;;  %v3022_v43 = vrot.slane %v16543_v22, %v16341_v2 }
 0x31f   :  { %3577 = vmatprep.mubr.f32.mxu0 %v3413_v62  ;;  %15133 = vmatprep.subr.bf16.mxu1 %v17128_v27  ;;  %v733_v62 = vld [vmem:[%s19058_s3 + $0x2c0] sm:$0x3]  ;;  %v3409_v27 = vrot.slane %v16547_v7, %v16338_v63 }
 0x320   :  { %15152 = vmatprep.subr.bf16.mxu0 %v17132_v32  ;;  %v17168_v32 = vpack.c.bf16 %v748_v34, %v739_v1  ;;  %v17172_v60 = vpack.c.bf16 %v733_v62, %v724_v0  ;;  %19288 = vst [vmem:[#allocation66_spill] sm:$0xff] %v17176_v13  ;;  %v723_v1 = vld [vmem:[%s19058_s3 + $0x270] sm:$0xff]  ;;  %v732_v34 = vld [vmem:[%s19058_s3 + $0x2b8] sm:$0x3]  ;;  %v750_v0 = vld [vmem:[%s19058_s3 + $0x348] sm:$0x3] }
 0x321   :  { %v17196_v62 = vpack.c.bf16 %v732_v34, %v723_v1  ;;  %v3429_v1 = vrot.slane %v16547_v7, %v16645_v39  ;;  %v725_v34 = vld [vmem:[%s19058_s3 + $0x280] sm:$0xff] }
 0x322   :  { %19286 = vst [vmem:[#allocation64_spill] sm:$0xff] %v17168_v32  ;;  %19287 = vst [vmem:[#allocation65_spill] sm:$0xff] %v17172_v60 }
 0x323   :  { %19289 = vst [vmem:[#allocation67_spill] sm:$0xff] %v17196_v62 }
 0x324   :  { %3183 = vmatmul.mubr.f32.vlgmr.msra.gmra.mrb[12].mxu1 %v3014_v55  ;;  %v1189_v55 = vcombine.high %v16650_v24, %v16650_v24  ;;  %v734_v24 = vld [vmem:[%s19058_s3 + $0x2c8] sm:$0x3] }
 0x325   :  { %3578 = vmatmul.mubr.f32.vlgmr.msra.gmra.mrb[14].mxu0 %v3409_v27  ;;  %15135 = vmatpush1.bf16.xpose.msra.mxu1 %v17158_v19  ;;  %v741_v27 = vld [vmem:[%s19058_s3 + $0x300] sm:$0xff] }
 0x326   :  { %3252 = vmatprep.mubr.f32.mxu1 %v3026_v37  ;;  %15154 = vmatpush1.bf16.xpose.msra.mxu0 %v17168_v32  ;;  %v17200_v44 = vpack.c.bf16 %v750_v0, %v741_v27  ;;  %v3034_v37 = vrot.slane %v16543_v22, %v16645_v39  ;;  %v743_v27 = vld [vmem:[%s19058_s3 + $0x310] sm:$0xff]  ;;  %v752_v0 = vld [vmem:[%s19058_s3 + $0x358] sm:$0x3] }
 0x327   :  { %3647 = vmatprep.mubr.f32.mxu0 %v3421_v31  ;;  %15137 = vmatprep.subr.bf16.mxu1 %v17172_v60  ;;  %v3417_v31 = vrot.slane %v16547_v7, %v16341_v2  ;;  %v3425_v60 = vrot.slane %v16547_v7, %v16344_v3  ;;  %v753_v7 = vld [vmem:[%s19058_s3 + $0x360] sm:$0xff] }
 0x328   :  { %15156 = vmatprep.subr.bf16.mxu0 %v17176_v13  ;;  %19290 = vst [vmem:[#allocation68_spill] sm:$0xff] %v17200_v44  ;;  %v17243_v13 = vpack.c.bf16 %v752_v0, %v743_v27  ;;  %v756_v27 = vld [vmem:[%s19058_s3 + $0x378] sm:$0xff] }
 0x32a   :  { %19292 = vst [vmem:[#allocation70_spill] sm:$0xff] %v17243_v13 }
 0x32c   :  { %3253 = vmatmul.mubr.f32.vlgmr.msra.gmra.mrb[12].mxu1 %v3022_v43  ;;  %v1203_v43 = vrot.slane %v1189_v55, %v16394_v45  ;;  %v781_v55 = vld [vmem:[%s19058_s3 + $0x440] sm:$0x3] }
 0x32d   :  { %3648 = vmatmul.mubr.f32.vlgmr.msra.gmra.mrb[14].mxu0 %v3417_v31  ;;  %15139 = vmatpush1.bf16.xpose.msra.mxu1 %v17196_v62  ;;  %v754_v31 = vld [vmem:[%s19058_s3 + $0x368] sm:$0xff]  ;;  %v3030_v62 = vrot.slane %v16543_v22, %v16344_v3 }
 0x32e   :  { %3322 = vmatprep.mubr.f32.mxu1 %v3034_v37  ;;  %15158 = vmatpush1.bf16.xpose.msra.mxu0 %v17200_v44  ;;  %v763_v37 = vld [vmem:[%s19058_s3 + $0x3b0] sm:$0x3]  ;;  %v772_v44 = vld [vmem:[%s19058_s3 + $0x3f8] sm:$0xff]  ;;  %v1205_v32 = vcombine.high %v1203_v43, %v1203_v43  ;;  %v17256_v22 = vrot.slane %v1203_v43, %v16394_v45  ;;  %v774_v43 = vld [vmem:[%s19058_s3 + $0x408] sm:$0xff] }
 0x32f   :  { %3717 = vmatprep.mubr.f32.mxu0 %v3429_v1  ;;  %15140 = vmatprep.subr.bf16.mxu1 %v19272_v25  ;;  %v17233_v1 = vpack.c.bf16 %v734_v24, %v725_v34  ;;  %v17247_v19 = vpack.c.bf16 %v763_v37, %v754_v31  ;;  %v17249_v34 = vpack.c.bf16 %v781_v55, %v772_v44  ;;  %v771_v44 = vld [vmem:[%s19058_s3 + $0x3f0] sm:$0xff]  ;;  %v780_v24 = vld [vmem:[%s19058_s3 + $0x438] sm:$0x3] }
 0x330   :  { %15159 = vmatprep.subr.bf16.mxu0 %v19272_v25  ;;  %v783_v31 = vld [vmem:[%s19058_s3 + $0x450] sm:$0x3]  ;;  %v3038_v37 = vrot.slane %v17256_v22, %v16330_v23  ;;  %v17293_v55 = vpack.c.bf16 %v780_v24, %v771_v44  ;;  %v764_v24 = vld [vmem:[%s19058_s3 + $0x3b8] sm:$0x3] }
 0x331   :  { %19291 = vst [vmem:[#allocation69_spill] sm:$0xff] %v17233_v1  ;;  %19293 = vst [vmem:[#allocation71_spill] sm:$0xff] %v17247_v19  ;;  %v755_v44 = vld [vmem:[%s19058_s3 + $0x370] sm:$0xff] }
 0x332   :  { %19294 = vst [vmem:[#allocation72_spill] sm:$0xff] %v17249_v34  ;;  %19296 = vst [vmem:[#allocation74_spill] sm:$0xff] %v17293_v55 }
 0x334   :  { %3323 = vmatmul.mubr.f32.vlgmr.msra.gmra.mrb[12].mxu1 %v3030_v62  ;;  %v762_v62 = vld [vmem:[%s19058_s3 + $0x3a8] sm:$0x3] }
 0x335   :  { %3718 = vmatmul.mubr.f32.vlgmr.msra.gmra.mrb[14].mxu0 %v3425_v60  ;;  %15142 = vmatpush3.bf16.xpose.msra.mxu1 %v17233_v1  ;;  %v17267_v60 = vrot.slane %v1205_v32, %v16394_v45  ;;  %v765_v32 = vld [vmem:[%s19058_s3 + $0x3c0] sm:$0x3]  ;;  %v17283_v0 = vpack.c.bf16 %v762_v62, %v753_v7  ;;  %v3800_v7 = vrot.slane %v16666_v47, %v16519_v21 }
 0x336   :  { %15161 = vmatpush3.bf16.xpose.msra.mxu0 %v17243_v13  ;;  %14806 = vmatprep.mubr.msk.f32.mxu1 %vm15960_vm4, %v19251_v11  ;;  %v17301_v62 = vpack.c.bf16 %v783_v31, %v774_v43  ;;  %v4195_v13 = vrot.slane %v16672_v53, %v16519_v21  ;;  %v17327_v43 = vpack.c.bf16 %v764_v24, %v755_v44  ;;  %v776_v31 = vld [vmem:[%s19058_s3 + $0x418] sm:$0xff] }
 0x337   :  { %14813 = vmatprep.mubr.msk.f32.mxu0 %vm15960_vm4, %v19251_v11  ;;  %15163 = vmatprep.subr.bf16.mxu1 %v17247_v19  ;;  %19295 = vst [vmem:[#allocation73_spill] sm:$0xff] %v17283_v0  ;;  %v17297_v19 = vpack.c.bf16 %v765_v32, %v756_v27  ;;  %v782_v27 = vld [vmem:[%s19058_s3 + $0x448] sm:$0x3]  ;;  %v3808_v44 = vrot.slane %v16666_v47, %v16558_v38  ;;  %v19321_v1 = vld [vmem:[#allocation16_spill] sm:$0xff] }
 0x338   :  { %15182 = vmatprep.subr.bf16.mxu0 %v17249_v34  ;;  %v3433_v34 = vrot.slane %v17267_v60, %v16330_v23  ;;  %19298 = vst [vmem:[#allocation76_spill] sm:$0xff] %v17301_v62  ;;  %v758_v32 = vld [vmem:[%s19058_s3 + $0x388] sm:$0xff]  ;;  %19299 = vst [vmem:[#allocation77_spill] sm:$0xff] %v17327_v43 }
 0x339   :  { %19297 = vst [vmem:[#allocation75_spill] sm:$0xff] %v17297_v19 }
 0x33c   :  { %14807 = vmatmul.mubr.f32.vlgmr.msra.gmra.mrb[12].mxu1 %v3038_v37  ;;  %v785_v37 = vld [vmem:[%s19058_s3 + $0x460] sm:$0x3] }
 0x33d   :  { %14814 = vmatmul.mubr.f32.vlgmr.msra.gmra.mrb[14].mxu0 %v3433_v34  ;;  %15165 = vmatpush1.bf16.xpose.msra.mxu1 %v17283_v0  ;;  %v773_v34 = vld [vmem:[%s19058_s3 + $0x400] sm:$0xff]  ;;  %v17345_v24 = vpack.c.bf16 %v785_v37, %v776_v31  ;;  %v4203_v0 = vrot.slane %v16672_v53, %v16558_v38  ;;  %v778_v37 = vld [vmem:[%s19058_s3 + $0x428] sm:$0xff] }
 0x33e   :  { %3902 = vmatprep.mubr.f32.mxu1 %v3800_v7  ;;  %15184 = vmatpush1.bf16.xpose.msra.mxu0 %v17293_v55  ;;  %v3796_v7 = vrot.slane %v16666_v47, %v16330_v23 }
 0x33f   :  { %4297 = vmatprep.mubr.f32.mxu0 %v4195_v13  ;;  %15167 = vmatprep.subr.bf16.mxu1 %v17297_v19  ;;  %v767_v13 = vld [vmem:[%s19058_s3 + $0x3d0] sm:$0x3]  ;;  %v4191_v19 = vrot.slane %v16672_v53, %v16330_v23  ;;  %19302 = vst [vmem:[#allocation80_spill] sm:$0xff] %v17345_v24 }
 0x340   :  { %15186 = vmatprep.subr.bf16.mxu0 %v17301_v62  ;;  %v17337_v62 = vpack.c.bf16 %v782_v27, %v773_v34  ;;  %v17341_v55 = vpack.c.bf16 %v767_v13, %v758_v32  ;;  %v757_v34 = vld [vmem:[%s19058_s3 + $0x380] sm:$0xff]  ;;  %v766_v27 = vld [vmem:[%s19058_s3 + $0x3c8] sm:$0x3]  ;;  %v784_v32 = vld [vmem:[%s19058_s3 + $0x458] sm:$0x3] }
 0x341   :  { %v760_v13 = vld [vmem:[%s19058_s3 + $0x398] sm:$0xff]  ;;  %v17371_v31 = vpack.c.bf16 %v766_v27, %v757_v34  ;;  %v3816_v34 = vrot.slane %v16666_v47, %v16614_v52 }
 0x342   :  { %19300 = vst [vmem:[#allocation78_spill] sm:$0xff] %v17337_v62  ;;  %19301 = vst [vmem:[#allocation79_spill] sm:$0xff] %v17341_v55 }
 0x343   :  { %19303 = vst [vmem:[#allocation81_spill] sm:$0xff] %v17371_v31 }
 0x344   :  { %3903 = vmatmul.mubr.f32.vlgmr.msra.gmra.mrb[14].mxu1 %v3796_v7  ;;  %v787_v7 = vld [vmem:[%s19058_s3 + $0x470] sm:$0x3] }
 0x345   :  { %4298 = vmatmul.mubr.f32.vlgmr.msra.gmra.mrb[16].mxu0 %v4191_v19  ;;  %15169 = vmatpush1.bf16.xpose.msra.mxu1 %v17327_v43  ;;  %v775_v19 = vld [vmem:[%s19058_s3 + $0x410] sm:$0xff]  ;;  %v17389_v27 = vpack.c.bf16 %v787_v7, %v778_v37  ;;  %v4211_v43 = vrot.slane %v16672_v53, %v16614_v52  ;;  %v3812_v37 = vrot.slane %v16666_v47, %v16341_v2 }
 0x346   :  { %3972 = vmatprep.mubr.f32.mxu1 %v3808_v44  ;;  %15188 = vmatpush1.bf16.xpose.msra.mxu0 %v17337_v62  ;;  %v3804_v44 = vrot.slane %v16666_v47, %v16338_v63 }
 0x347   :  { %4367 = vmatprep.mubr.f32.mxu0 %v4203_v0  ;;  %15171 = vmatprep.subr.bf16.mxu1 %v17341_v55  ;;  %v769_v0 = vld [vmem:[%s19058_s3 + $0x3e0] sm:$0x3]  ;;  %v4199_v55 = vrot.slane %v16672_v53, %v16338_v63  ;;  %19306 = vst [vmem:[#allocation84_spill] sm:$0xff] %v17389_v27 }
 0x348   :  { %15190 = vmatprep.subr.bf16.mxu0 %v17345_v24  ;;  %v17381_v24 = vpack.c.bf16 %v784_v32, %v775_v19  ;;  %v17385_v62 = vpack.c.bf16 %v769_v0, %v760_v13  ;;  %v759_v19 = vld [vmem:[%s19058_s3 + $0x390] sm:$0xff]  ;;  %v768_v32 = vld [vmem:[%s19058_s3 + $0x3d8] sm:$0x3]  ;;  %v786_v13 = vld [vmem:[%s19058_s3 + $0x468] sm:$0x3] }
 0x349   :  { %v17409_v0 = vpack.c.bf16 %v768_v32, %v759_v19  ;;  %v761_v19 = vld [vmem:[%s19058_s3 + $0x3a0] sm:$0xff]  ;;  %v770_v32 = vld [vmem:[%s19058_s3 + $0x3e8] sm:$0x3] }
 0x34a   :  { %19304 = vst [vmem:[#allocation82_spill] sm:$0xff] %v17381_v24  ;;  %19305 = vst [vmem:[#allocation83_spill] sm:$0xff] %v17385_v62 }
 0x34b   :  { %19307 = vst [vmem:[#allocation85_spill] sm:$0xff] %v17409_v0 }
 0x34c   :  { %3973 = vmatmul.mubr.f32.vlgmr.msra.gmra.mrb[14].mxu1 %v3804_v44  ;;  %v3824_v44 = vrot.slane %v16666_v47, %v16645_v39 }
 0x34d   :  { %4368 = vmatmul.mubr.f32.vlgmr.msra.gmra.mrb[16].mxu0 %v4199_v55  ;;  %15173 = vmatpush1.bf16.xpose.msra.mxu1 %v17371_v31  ;;  %v777_v55 = vld [vmem:[%s19058_s3 + $0x420] sm:$0xff]  ;;  %v19320_v31 = vld [vmem:[#allocation15_spill] sm:$0xff] }
 0x34e   :  { %4042 = vmatprep.mubr.f32.mxu1 %v3816_v34  ;;  %15192 = vmatpush1.bf16.xpose.msra.mxu0 %v17381_v24  ;;  %v17413_v7 = vpack.c.bf16 %v786_v13, %v777_v55  ;;  %v4219_v34 = vrot.slane %v16672_v53, %v16645_v39  ;;  %v779_v55 = vld [vmem:[%s19058_s3 + $0x430] sm:$0xff]  ;;  %v788_v13 = vld [vmem:[%s19058_s3 + $0x478] sm:$0x3] }
 0x34f   :  { %4437 = vmatprep.mubr.f32.mxu0 %v4211_v43  ;;  %15175 = vmatprep.subr.bf16.mxu1 %v17385_v62  ;;  %v4207_v43 = vrot.slane %v16672_v53, %v16341_v2  ;;  %v4215_v62 = vrot.slane %v16672_v53, %v16344_v3  ;;  %v789_v53 = vld [vmem:[%s19058_s3 + $0x480] sm:$0xff] }
 0x350   :  { %15194 = vmatprep.subr.bf16.mxu0 %v17389_v27  ;;  %19308 = vst [vmem:[#allocation86_spill] sm:$0xff] %v17413_v7  ;;  %v17453_v27 = vpack.c.bf16 %v788_v13, %v779_v55  ;;  %v801_v55 = vld [vmem:[%s19058_s3 + $0x4e0] sm:$0x3]  ;;  %v819_v13 = vld [vmem:[%s19058_s3 + $0x570] sm:$0x3] }
 0x352   :  { %19310 = vst [vmem:[#allocation88_spill] sm:$0xff] %v17453_v27 }
 0x354   :  { %4043 = vmatmul.mubr.f32.vlgmr.msra.gmra.mrb[14].mxu1 %v3812_v37  ;;  %v790_v37 = vld [vmem:[%s19058_s3 + $0x488] sm:$0xff] }
 0x355   :  { %4438 = vmatmul.mubr.f32.vlgmr.msra.gmra.mrb[16].mxu0 %v4207_v43  ;;  %15177 = vmatpush1.bf16.xpose.msra.mxu1 %v17409_v0  ;;  %v799_v43 = vld [vmem:[%s19058_s3 + $0x4d0] sm:$0x3]  ;;  %v3820_v0 = vrot.slane %v16666_v47, %v16344_v3  ;;  %v1235_v47 = vcombine.high %v17256_v22, %v17256_v22  ;;  %v816_v22 = vld [vmem:[%s19058_s3 + $0x558] sm:$0x3] }
 0x356   :  { %4112 = vmatprep.mubr.f32.mxu1 %v3824_v44  ;;  %15196 = vmatpush1.bf16.xpose.msra.mxu0 %v17413_v7  ;;  %v17443_v44 = vpack.c.bf16 %v770_v32, %v761_v19  ;;  %v817_v7 = vld [vmem:[%s19058_s3 + $0x560] sm:$0x3]  ;;  %v17457_v24 = vpack.c.bf16 %v799_v43, %v790_v37  ;;  %v792_v32 = vld [vmem:[%s19058_s3 + $0x498] sm:$0xff] }
 0x357   :  { %4507 = vmatprep.mubr.f32.mxu0 %v4219_v34  ;;  %15178 = vmatprep.subr.bf16.mxu1 %v19272_v25  ;;  %v808_v34 = vld [vmem:[%s19058_s3 + $0x518] sm:$0xff]  ;;  %v3828_v43 = vrot.slane %v1235_v47, %v16330_v23  ;;  %v791_v47 = vld [vmem:[%s19058_s3 + $0x490] sm:$0xff] }
 0x358   :  { %15197 = vmatprep.subr.bf16.mxu0 %v19272_v25  ;;  %19309 = vst [vmem:[#allocation87_spill] sm:$0xff] %v17443_v44  ;;  %19311 = vst [vmem:[#allocation89_spill] sm:$0xff] %v17457_v24  ;;  %v17459_v19 = vpack.c.bf16 %v817_v7, %v808_v34  ;;  %v1237_v7 = vcombine.high %v17267_v60, %v17267_v60  ;;  %v810_v60 = vld [vmem:[%s19058_s3 + $0x528] sm:$0xff] }
 0x35a   :  { %19312 = vst [vmem:[#allocation90_spill] sm:$0xff] %v17459_v19 }
 0x35c   :  { %4113 = vmatmul.mubr.f32.vlgmr.msra.gmra.mrb[14].mxu1 %v3820_v0  ;;  %v798_v0 = vld [vmem:[%s19058_s3 + $0x4c8] sm:$0x3] }
 0x35d   :  { %4508 = vmatmul.mubr.f32.vlgmr.msra.gmra.mrb[16].mxu0 %v4215_v62  ;;  %15180 = vmatpush3.bf16.xpose.msra.mxu1 %v17443_v44  ;;  %v807_v62 = vld [vmem:[%s19058_s3 + $0x510] sm:$0xff]  ;;  %v17497_v37 = vpack.c.bf16 %v798_v0, %v789_v53  ;;  %v17505_v44 = vpack.c.bf16 %v819_v13, %v810_v60  ;;  %v800_v53 = vld [vmem:[%s19058_s3 + $0x4d8] sm:$0x3] }
 0x35e   :  { %15199 = vmatpush3.bf16.xpose.msra.mxu0 %v17453_v27  ;;  %14820 = vmatprep.mubr.msk.f32.mxu1 %vm15960_vm4, %v19251_v11  ;;  %v17500_v34 = vpack.c.bf16 %v816_v22, %v807_v62  ;;  %v4223_v27 = vrot.slane %v1237_v7, %v16330_v23  ;;  %v17519_v62 = vpop.permute.xlu1 %603 }
 0x35f   :  { %14827 = vmatprep.mubr.msk.f32.mxu0 %vm15960_vm4, %v19251_v11  ;;  %15201 = vmatprep.subr.bf16.mxu1 %v17457_v24  ;;  %19313 = vst [vmem:[#allocation91_spill] sm:$0xff] %v17497_v37  ;;  %v17502_v24 = vpack.c.bf16 %v801_v55, %v792_v32  ;;  %19316 = vst [vmem:[#allocation94_spill] sm:$0xff] %v17505_v44 }
 0x360   :  { %15220 = vmatprep.subr.bf16.mxu0 %v17459_v19  ;;  %19314 = vst [vmem:[#allocation92_spill] sm:$0xff] %v17500_v34 }
 0x361   :  { %19315 = vst [vmem:[#allocation93_spill] sm:$0xff] %v17502_v24 }
 0x364   :  { %14821 = vmatmul.mubr.f32.vlgmr.msra.gmra.mrb[14].mxu1 %v3828_v43  ;;  %v19317_v43 = vld [vmem:[#allocation9_spill] sm:$0xff] }
 0x365   :  { %14828 = vmatmul.mubr.f32.vlgmr.msra.gmra.mrb[16].mxu0 %v4223_v27  ;;  %15203 = vmatpush1.bf16.xpose.msra.mxu1 %v17497_v37  ;;  %v17521_v27 = vpack.c.bf16 %v800_v53, %v791_v47  ;;  %v19318_v53 = vld [vmem:[#allocation12_spill] sm:$0xff] }
 0x366   :  { %15222 = vmatpush1.bf16.xpose.msra.mxu0 %v17500_v34  ;;  %15205 = vmatprep.subr.bf16.mxu1 %v17502_v24 }
 0x367   :  { %15224 = vmatprep.subr.bf16.mxu0 %v17505_v44 }
 0x378   :  { %v17517_v0 = vpop.permute.xlu0 %575 }
 0x379   :  { %v587_v7 = vmul.f32 %v17517_v0, %v16222_v8  ;;  %v588_v22 = vmul.f32 %v17517_v0, %v16225_v9  ;;  %v589_v32 = vmul.f32 %v17517_v0, %v16232_v12  ;;  %v590_v55 = vmul.f32 %v17517_v0, %v16236_v14 }
 0x37a   :  { %v591_v60 = vmul.f32 %v17517_v0, %v16241_v16  ;;  %v592_v13 = vmul.f32 %v17517_v0, %v16276_v35  ;;  %v593_v47 = vmul.f32 %v17517_v0, %v19317_v43  ;;  %v594_v8 = vmul.f32 %v17517_v0, %v19318_v53 }
 0x37b   :  { %v615_v9 = vadd.f32 %v17519_v62, %v587_v7  ;;  %v616_v44 = vadd.f32 %v17519_v62, %v588_v22  ;;  %v617_v12 = vadd.f32 %v17519_v62, %v589_v32  ;;  %v618_v14 = vadd.f32 %v17519_v62, %v590_v55 }
 0x37c   :  { %v17544_v24 = vadd.f32 %v17519_v62, %v591_v60  ;;  %v17547_v16 = vadd.f32 %v17519_v62, %v592_v13  ;;  %v17550_v35 = vadd.f32 %v17519_v62, %v593_v47  ;;  %v17553_v43 = vadd.f32 %v17519_v62, %v594_v8  ;;  %v19319_v13 = vld [vmem:[#allocation14_spill] sm:$0xff]  ;;  %v19322_v8 = vld [vmem:[#allocation17_spill] sm:$0xff] }
 0x37d   :  { %v633_v53 = vmax.f32 %v615_v9, 0.0  ;;  %v634_v7 = vmax.f32 %v616_v44, 0.0  ;;  %v635_v34 = vmax.f32 %v617_v12, 0.0  ;;  %v636_v22 = vmax.f32 %v618_v14, 0.0  ;;  %v19323_v9 = vld [vmem:[#allocation18_spill] sm:$0xff]  ;;  %v19324_v12 = vld [vmem:[#allocation19_spill] sm:$0xff] }
 0x37e   :  { %v637_v32 = vmax.f32 %v17544_v24, 0.0  ;;  %v638_v55 = vmax.f32 %v17547_v16, 0.0  ;;  %v639_v60 = vmax.f32 %v17550_v35, 0.0  ;;  %v640_v37 = vmax.f32 %v17553_v43, 0.0 }
 0x37f   :  { %v1026_v19 = vmul.f32 %v19319_v13, %v633_v53  ;;  %v1027_v47 = vmul.f32 %v19320_v31, %v634_v7  ;;  %v1028_v33 = vmul.f32 %v19321_v1, %v635_v34  ;;  %v1029_v4 = vmul.f32 %v19322_v8, %v636_v22 }
 0x380   :  { %v1030_v44 = vmul.f32 %v19323_v9, %v637_v32  ;;  %v1031_v14 = vmul.f32 %v19324_v12, %v638_v55  ;;  %v1032_v24 = vmul.f32 %v19325_v36, %v639_v60  ;;  %v1033_v16 = vmul.f32 %v19326_v48, %v640_v37 }
 0x381   :  { %v1238_v15 = vcombine.low %v1026_v19, %v1027_v47  ;;  %v1239_v35 = vcombine.high %v1026_v19, %v1027_v47  ;;  %v1240_v58 = vcombine.low %v1028_v33, %v1029_v4  ;;  %v1241_v43 = vcombine.high %v1028_v33, %v1029_v4 }
 0x382   :  { %v1242_v30 = vcombine.low %v1030_v44, %v1031_v14  ;;  %v1243_v13 = vcombine.high %v1030_v44, %v1031_v14  ;;  %v1244_v20 = vcombine.low %v1032_v24, %v1033_v16  ;;  %v1245_v31 = vcombine.high %v1032_v24, %v1033_v16 }
 0x383   :  { %v1252_v1 = vrot.slane %v1238_v15, %v16394_v45  ;;  %v1259_v8 = vrot.slane %v1239_v35, %v16394_v45  ;;  %v1266_v9 = vrot.slane %v1240_v58, %v16394_v45  ;;  %v1273_v12 = vrot.slane %v1241_v43, %v16394_v45  ;;  %v809_v58 = vld [vmem:[%s19058_s3 + $0x520] sm:$0xff] }
 0x384   :  { %v1280_v36 = vrot.slane %v1242_v30, %v16394_v45  ;;  %v1287_v48 = vrot.slane %v1243_v13, %v16394_v45  ;;  %v1294_v19 = vrot.slane %v1244_v20, %v16394_v45  ;;  %v1301_v4 = vrot.slane %v1245_v31, %v16394_v45  ;;  %v818_v31 = vld [vmem:[%s19058_s3 + $0x568] sm:$0x3] }
 0x385   :  { %v1302_v33 = vcombine.low %v1252_v1, %v1266_v9  ;;  %v1303_v47 = vcombine.high %v1252_v1, %v1266_v9  ;;  %v1304_v44 = vcombine.low %v1259_v8, %v1273_v12  ;;  %v1305_v14 = vcombine.high %v1259_v8, %v1273_v12  ;;  %v794_v1 = vld [vmem:[%s19058_s3 + $0x4a8] sm:$0xff]  ;;  %v803_v8 = vld [vmem:[%s19058_s3 + $0x4f0] sm:$0x3] }
 0x386   :  { %v1306_v24 = vcombine.low %v1280_v36, %v1294_v19  ;;  %v1307_v15 = vcombine.high %v1280_v36, %v1294_v19  ;;  %v1308_v16 = vcombine.low %v1287_v48, %v1301_v4  ;;  %v1309_v35 = vcombine.high %v1287_v48, %v1301_v4 }
 0x387   :  { %v17579_v30 = vrot.slane %v1302_v33, %v16394_v45  ;;  %v1323_v43 = vrot.slane %v1304_v44, %v16394_v45  ;;  %v17583_v20 = vrot.slane %v1303_v47, %v16394_v45  ;;  %v1337_v13 = vrot.slane %v1305_v14, %v16394_v45  ;;  %v19327_v47 = vld [vmem:[#allocation34_spill] sm:$0xff] }
 0x388   :  { %v17596_v9 = vrot.slane %v1306_v24, %v16394_v45  ;;  %v1351_v12 = vrot.slane %v1308_v16, %v16394_v45  ;;  %v17600_v36 = vrot.slane %v1307_v15, %v16394_v45  ;;  %v1365_v48 = vrot.slane %v1309_v35, %v16394_v45 }
 0x389   :  { %v7865_v19 = vmul.f32 %v16716_v42, %v633_v53  ;;  %v7866_v4 = vmul.f32 %v16719_v6, %v634_v7  ;;  %v7867_v33 = vmul.f32 %v16722_v17, %v635_v34  ;;  %v7868_v44 = vmul.f32 %v19327_v47, %v636_v22  ;;  %v19328_v34 = vld [vmem:[#allocation35_spill] sm:$0xff] }
 0x38a   :  { %v17607_v14 = vcombine.low %v1323_v43, %v1351_v12  ;;  %v17609_v46 = vcombine.high %v1323_v43, %v1351_v12  ;;  %v17611_v24 = vpack.c.bf16 %v818_v31, %v809_v58  ;;  %v17613_v16 = vpack.c.bf16 %v803_v8, %v794_v1 }
 0x38b   :  { %v17617_v15 = vcombine.low %v17579_v30, %v17596_v9  ;;  %v17621_v42 = vcombine.low %v17583_v20, %v17600_v36  ;;  %v17623_v6 = vcombine.low %v1337_v13, %v1365_v48  ;;  %v17625_v17 = vcombine.high %v1337_v13, %v1365_v48 }
 0x38c   :  { %v7869_v53 = vmul.f32 %v19328_v34, %v637_v32  ;;  %v7870_v7 = vmul.f32 %v16740_v28, %v638_v55  ;;  %v7871_v22 = vmul.f32 %v16760_v49, %v639_v60  ;;  %v7872_v35 = vmul.f32 %v16780_v5, %v640_v37 }
 0x38d   :  { %v8077_v58 = vcombine.low %v7865_v19, %v7866_v4  ;;  %v8078_v43 = vcombine.high %v7865_v19, %v7866_v4  ;;  %v8079_v31 = vcombine.low %v7867_v33, %v7868_v44  ;;  %v8080_v1 = vcombine.high %v7867_v33, %v7868_v44 }
 0x38e   :  { %v8081_v8 = vcombine.low %v7869_v53, %v7870_v7  ;;  %v8082_v12 = vcombine.high %v7869_v53, %v7870_v7  ;;  %v8083_v47 = vcombine.low %v7871_v22, %v7872_v35  ;;  %v8084_v50 = vcombine.high %v7871_v22, %v7872_v35 }
 0x38f   :  { %v8091_v59 = vrot.slane %v8077_v58, %v16394_v45  ;;  %v8098_v13 = vrot.slane %v8078_v43, %v16394_v45  ;;  %v8105_v32 = vrot.slane %v8079_v31, %v16394_v45  ;;  %v8112_v28 = vrot.slane %v8080_v1, %v16394_v45 }
 0x390   :  { %v8119_v49 = vrot.slane %v8081_v8, %v16394_v45  ;;  %v8126_v5 = vrot.slane %v8082_v12, %v16394_v45  ;;  %v8133_v37 = vrot.slane %v8083_v47, %v16394_v45  ;;  %v8140_v55 = vrot.slane %v8084_v50, %v16394_v45 }
 0x391   :  { %v8141_v60 = vcombine.low %v8091_v59, %v8105_v32  ;;  %v8142_v48 = vcombine.high %v8091_v59, %v8105_v32  ;;  %v8143_v19 = vcombine.low %v8098_v13, %v8112_v28  ;;  %v8144_v4 = vcombine.high %v8098_v13, %v8112_v28  ;;  %v812_v13 = vld [vmem:[%s19058_s3 + $0x538] sm:$0xff]  ;;  %v821_v32 = vld [vmem:[%s19058_s3 + $0x580] sm:$0x3] }
 0x392   :  { %v8145_v33 = vcombine.low %v8119_v49, %v8133_v37  ;;  %v8146_v44 = vcombine.high %v8119_v49, %v8133_v37  ;;  %v8147_v34 = vcombine.low %v8126_v5, %v8140_v55  ;;  %v8148_v53 = vcombine.high %v8126_v5, %v8140_v55 }
 0x393   :  { %v8155_v7 = vrot.slane %v8141_v60, %v16394_v45  ;;  %v8162_v22 = vrot.slane %v8143_v19, %v16394_v45  ;;  %v8169_v35 = vrot.slane %v8142_v48, %v16394_v45  ;;  %v8176_v58 = vrot.slane %v8144_v4, %v16394_v45 }
 0x394   :  { %v8183_v43 = vrot.slane %v8145_v33, %v16394_v45  ;;  %v8190_v50 = vrot.slane %v8147_v34, %v16394_v45  ;;  %v8197_v59 = vrot.slane %v8146_v44, %v16394_v45  ;;  %v8204_v31 = vrot.slane %v8148_v53, %v16394_v45  ;;  %v793_v34 = vld [vmem:[%s19058_s3 + $0x4a0] sm:$0xff]  ;;  %v802_v53 = vld [vmem:[%s19058_s3 + $0x4e8] sm:$0x3] }
 0x395   :  { %v4590_v1 = vrot.slane %v17617_v15, %v16519_v21  ;;  %v4985_v8 = vrot.slane %v17621_v42, %v16519_v21  ;;  %v4586_v12 = vrot.slane %v17617_v15, %v16330_v23  ;;  %v4981_v47 = vrot.slane %v17621_v42, %v16330_v23 }
 0x396   :  { %v17661_v28 = vcombine.low %v8155_v7, %v8183_v43  ;;  %v17663_v49 = vcombine.high %v8155_v7, %v8183_v43  ;;  %v17665_v5 = vcombine.low %v8162_v22, %v8190_v50  ;;  %v17667_v37 = vcombine.high %v8162_v22, %v8190_v50  ;;  %v811_v7 = vld [vmem:[%s19058_s3 + $0x530] sm:$0xff]  ;;  %v820_v22 = vld [vmem:[%s19058_s3 + $0x578] sm:$0x3]  ;;  %v19335_v43 = vld [vmem:[#allocation13_spill] sm:$0xff] }
 0x397   :  { %v17669_v55 = vcombine.low %v8169_v35, %v8197_v59  ;;  %v17671_v60 = vcombine.high %v8169_v35, %v8197_v59  ;;  %v17673_v48 = vcombine.low %v8176_v58, %v8204_v31  ;;  %v17675_v19 = vcombine.high %v8176_v58, %v8204_v31  ;;  %4692 = vmatprep.mubr.f32.mxu1 %v4590_v1  ;;  %v796_v35 = vld [vmem:[%s19058_s3 + $0x4b8] sm:$0xff]  ;;  %v805_v58 = vld [vmem:[%s19058_s3 + $0x500] sm:$0x3]  ;;  %v814_v31 = vld [vmem:[%s19058_s3 + $0x548] sm:$0xff] }
 0x398   :  { %19329 = vst [vmem:[#allocation9_spill] sm:$0xff] %v17663_v49  ;;  %19330 = vst [vmem:[#allocation12_spill] sm:$0xff] %v17665_v5  ;;  %5087 = vmatprep.mubr.f32.mxu0 %v4985_v8  ;;  %4693 = vmatmul.mubr.f32.vlgmr.msra.gmra.mrb[16].mxu1 %v4586_v12  ;;  %v4598_v4 = vrot.slane %v17617_v15, %v16558_v38  ;;  %v17679_v33 = vpack.c.bf16 %v821_v32, %v812_v13  ;;  %v823_v1 = vld [vmem:[%s19058_s3 + $0x590] sm:$0x3] }
 0x399   :  { %19331 = vst [vmem:[#allocation14_spill] sm:$0xff] %v17667_v37  ;;  %19332 = vst [vmem:[#allocation15_spill] sm:$0xff] %v17671_v60  ;;  %15207 = vmatpush1.bf16.xpose.msra.mxu1 %v17521_v27  ;;  %5088 = vmatmul.mubr.f32.vlgmr.msra.gmra.mrb[18].mxu0 %v4981_v47  ;;  %v4993_v44 = vrot.slane %v17621_v42, %v16558_v38  ;;  %v595_v50 = vmul.f32 %v17517_v0, %v19335_v43 }
 0x39a   :  { %19333 = vst [vmem:[#allocation16_spill] sm:$0xff] %v17673_v48  ;;  %19334 = vst [vmem:[#allocation17_spill] sm:$0xff] %v17675_v19  ;;  %15226 = vmatpush1.bf16.xpose.msra.mxu0 %v17611_v24  ;;  %4762 = vmatprep.mubr.f32.mxu1 %v4598_v4  ;;  %v17707_v59 = vpack.c.bf16 %v802_v53, %v793_v34  ;;  %v4594_v8 = vrot.slane %v17617_v15, %v16338_v63  ;;  %v804_v34 = vld [vmem:[%s19058_s3 + $0x4f8] sm:$0x3]  ;;  %v813_v53 = vld [vmem:[%s19058_s3 + $0x540] sm:$0xff] }
 0x39b   :  { %5157 = vmatprep.mubr.f32.mxu0 %v4993_v44  ;;  %15209 = vmatprep.subr.bf16.mxu1 %v17613_v16  ;;  %v17717_v12 = vpack.c.bf16 %v820_v22, %v811_v7  ;;  %v4989_v47 = vrot.slane %v17621_v42, %v16338_v63  ;;  %v17721_v13 = vpack.c.bf16 %v805_v58, %v796_v35  ;;  %v822_v7 = vld [vmem:[%s19058_s3 + $0x588] sm:$0x3] }
 0x39c   :  { %15228 = vmatprep.subr.bf16.mxu0 %v17679_v33  ;;  %v17724_v0 = vadd.f32 %v17519_v62, %v595_v50  ;;  %v4606_v32 = vrot.slane %v17617_v15, %v16614_v52  ;;  %v17728_v4 = vpack.c.bf16 %v823_v1, %v814_v31  ;;  %v5001_v44 = vrot.slane %v17621_v42, %v16614_v52  ;;  %v795_v62 = vld [vmem:[%s19058_s3 + $0x4b0] sm:$0xff] }
 0x39d   :  { %v17749_v35 = vpack.c.bf16 %v804_v34, %v795_v62  ;;  %v4602_v58 = vrot.slane %v17617_v15, %v16341_v2  ;;  %v17753_v43 = vpack.c.bf16 %v822_v7, %v813_v53  ;;  %v4997_v50 = vrot.slane %v17621_v42, %v16341_v2  ;;  %v19336_v31 = vld [vmem:[#allocation31_spill] sm:$0xff]  ;;  %v826_v7 = vld [vmem:[%s19058_s3 + $0x5a8] sm:$0xff] }
 0x39e   :  { %v19166_v22 = vmax.f32 %v17724_v0, 0.0  ;;  %v815_v62 = vld [vmem:[%s19058_s3 + $0x550] sm:$0xff]  ;;  %v824_v34 = vld [vmem:[%s19058_s3 + $0x598] sm:$0x3]  ;;  %v5005_v19 = vrot.slane %v17621_v42, %v16344_v3 }
 0x3a0   :  { %4763 = vmatmul.mubr.f32.vlgmr.msra.gmra.mrb[16].mxu1 %v4594_v8  ;;  %v17760_v1 = vmul.f32 %v19336_v31, %v19166_v22  ;;  %v4614_v8 = vrot.slane %v17617_v15, %v16645_v39  ;;  %v844_v31 = vld [vmem:[%s19058_s3 + $0x638] sm:$0xff]  ;;  %v17800_v22 = vpack.c.bf16 %v824_v34, %v815_v62  ;;  %v834_v62 = vld [vmem:[%s19058_s3 + $0x5e8] sm:$0x3]  ;;  %v843_v34 = vld [vmem:[%s19058_s3 + $0x630] sm:$0xff] }
 0x3a1   :  { %15211 = vmatpush1.bf16.xpose.msra.mxu1 %v17707_v59  ;;  %5158 = vmatmul.mubr.f32.vlgmr.msra.gmra.mrb[18].mxu0 %v4989_v47  ;;  %v5009_v47 = vrot.slane %v17621_v42, %v16645_v39  ;;  %v825_v42 = vld [vmem:[%s19058_s3 + $0x5a0] sm:$0xff] }
 0x3a2   :  { %15230 = vmatpush1.bf16.xpose.msra.mxu0 %v17717_v12  ;;  %4832 = vmatprep.mubr.f32.mxu1 %v4606_v32  ;;  %v797_v32 = vld [vmem:[%s19058_s3 + $0x4c0] sm:$0xff]  ;;  %v1381_v53 = vrot.slane %v17760_v1, %v16394_v45 }
 0x3a3   :  { %5227 = vmatprep.mubr.f32.mxu0 %v5001_v44  ;;  %15213 = vmatprep.subr.bf16.mxu1 %v17721_v13  ;;  %v806_v44 = vld [vmem:[%s19058_s3 + $0x508] sm:$0x3] }
 0x3a4   :  { %15232 = vmatprep.subr.bf16.mxu0 %v17728_v4 }
 0x3a8   :  { %4833 = vmatmul.mubr.f32.vlgmr.msra.gmra.mrb[16].mxu1 %v4602_v58  ;;  %v835_v58 = vld [vmem:[%s19058_s3 + $0x5f0] sm:$0x3] }
 0x3a9   :  { %15215 = vmatpush1.bf16.xpose.msra.mxu1 %v17749_v35  ;;  %5228 = vmatmul.mubr.f32.vlgmr.msra.gmra.mrb[18].mxu0 %v4997_v50  ;;  %v17790_v50 = vpack.c.bf16 %v806_v44, %v797_v32  ;;  %v17804_v37 = vpack.c.bf16 %v835_v58, %v826_v7  ;;  %v1389_v32 = vcombine.high %v1381_v53, %v1381_v53  ;;  %v828_v58 = vld [vmem:[%s19058_s3 + $0x5b8] sm:$0xff] }
 0x3aa   :  { %15234 = vmatpush1.bf16.xpose.msra.mxu0 %v17753_v43  ;;  %4902 = vmatprep.mubr.f32.mxu1 %v4614_v8  ;;  %v853_v8 = vld [vmem:[%s19058_s3 + $0x680] sm:$0x3]  ;;  %v17835_v7 = vcombine.high %v17579_v30, %v17596_v9  ;;  %v846_v30 = vld [vmem:[%s19058_s3 + $0x648] sm:$0xff]  ;;  %v855_v9 = vld [vmem:[%s19058_s3 + $0x690] sm:$0x3] }
 0x3ab   :  { %5297 = vmatprep.mubr.f32.mxu0 %v5009_v47  ;;  %15216 = vmatprep.subr.bf16.mxu1 %v19272_v25  ;;  %v4610_v47 = vrot.slane %v17617_v15, %v16344_v3  ;;  %19337 = vst [vmem:[#allocation18_spill] sm:$0xff] %v17804_v37  ;;  %v17806_v44 = vpack.c.bf16 %v853_v8, %v844_v31  ;;  %v837_v31 = vld [vmem:[%s19058_s3 + $0x600] sm:$0x3] }
 0x3ac   :  { %15235 = vmatprep.subr.bf16.mxu0 %v19272_v25  ;;  %v17813_v15 = vrot.slane %v1381_v53, %v16394_v45  ;;  %v852_v53 = vld [vmem:[%s19058_s3 + $0x678] sm:$0x3]  ;;  %v17846_v8 = vcombine.high %v17583_v20, %v17600_v36  ;;  %v17862_v20 = vpack.c.bf16 %v837_v31, %v828_v58  ;;  %v5380_v36 = vrot.slane %v17835_v7, %v16519_v21  ;;  %v854_v58 = vld [vmem:[%s19058_s3 + $0x688] sm:$0x3] }
 0x3ad   :  { %19338 = vst [vmem:[#allocation19_spill] sm:$0xff] %v17806_v44  ;;  %v17858_v48 = vpack.c.bf16 %v852_v53, %v843_v34  ;;  %v827_v34 = vld [vmem:[%s19058_s3 + $0x5b0] sm:$0xff]  ;;  %v836_v53 = vld [vmem:[%s19058_s3 + $0x5f8] sm:$0x3]  ;;  %v830_v31 = vld [vmem:[%s19058_s3 + $0x5c8] sm:$0xff]  ;;  %v5388_v60 = vrot.slane %v17835_v7, %v16558_v38 }
 0x3ae   :  { %19341 = vst [vmem:[#allocation34_spill] sm:$0xff] %v17862_v20 }
 0x3af   :  { %19340 = vst [vmem:[#allocation21_spill] sm:$0xff] %v17858_v48 }
 0x3b0   :  { %4903 = vmatmul.mubr.f32.vlgmr.msra.gmra.mrb[16].mxu1 %v4610_v47  ;;  %v17848_v47 = vpack.c.bf16 %v834_v62, %v825_v42  ;;  %v17866_v42 = vpack.c.bf16 %v855_v9, %v846_v30  ;;  %v5775_v62 = vrot.slane %v17846_v8, %v16519_v21  ;;  %v839_v30 = vld [vmem:[%s19058_s3 + $0x610] sm:$0x3]  ;;  %v17892_v9 = vpack.c.bf16 %v836_v53, %v827_v34 }
 0x3b1   :  { %15218 = vmatpush3.bf16.xpose.msra.mxu1 %v17790_v50  ;;  %5298 = vmatmul.mubr.f32.vlgmr.msra.gmra.mrb[18].mxu0 %v5005_v19  ;;  %v17825_v19 = vrot.slane %v1389_v32, %v16394_v45  ;;  %v4618_v32 = vrot.slane %v17813_v15, %v16330_v23 }
 0x3b2   :  { %15237 = vmatpush3.bf16.xpose.msra.mxu0 %v17800_v22  ;;  %14834 = vmatprep.mubr.msk.f32.mxu1 %vm15960_vm4, %v19251_v11  ;;  %19339 = vst [vmem:[#allocation20_spill] sm:$0xff] %v17848_v47  ;;  %19342 = vst [vmem:[#allocation35_spill] sm:$0xff] %v17866_v42 }
 0x3b3   :  { %14841 = vmatprep.mubr.msk.f32.mxu0 %vm15960_vm4, %v19251_v11  ;;  %15239 = vmatprep.subr.bf16.mxu1 %v17804_v37  ;;  %v5013_v5 = vrot.slane %v17825_v19, %v16330_v23 }
 0x3b4   :  { %15258 = vmatprep.subr.bf16.mxu0 %v17806_v44 }
 0x3b8   :  { %14835 = vmatmul.mubr.f32.vlgmr.msra.gmra.mrb[16].mxu1 %v4618_v32  ;;  %v848_v32 = vld [vmem:[%s19058_s3 + $0x658] sm:$0xff] }
 0x3b9   :  { %14842 = vmatmul.mubr.f32.vlgmr.msra.gmra.mrb[18].mxu0 %v5013_v5  ;;  %15241 = vmatpush1.bf16.xpose.msra.mxu1 %v17848_v47  ;;  %v845_v5 = vld [vmem:[%s19058_s3 + $0x640] sm:$0xff] }
 0x3ba   :  { %15260 = vmatpush1.bf16.xpose.msra.mxu0 %v17858_v48  ;;  %5482 = vmatprep.mubr.f32.mxu1 %v5380_v36  ;;  %v857_v36 = vld [vmem:[%s19058_s3 + $0x6a0] sm:$0x3]  ;;  %v17906_v48 = vpack.c.bf16 %v839_v30, %v830_v31 }
 0x3bb   :  { %5877 = vmatprep.mubr.f32.mxu0 %v5775_v62  ;;  %15243 = vmatprep.subr.bf16.mxu1 %v17862_v20  ;;  %v5376_v62 = vrot.slane %v17835_v7, %v16330_v23  ;;  %v5771_v20 = vrot.slane %v17846_v8, %v16330_v23  ;;  %v17910_v47 = vpack.c.bf16 %v857_v36, %v848_v32  ;;  %v829_v30 = vld [vmem:[%s19058_s3 + $0x5c0] sm:$0xff]  ;;  %v850_v36 = vld [vmem:[%s19058_s3 + $0x668] sm:$0xff] }
 0x3bc   :  { %15262 = vmatprep.subr.bf16.mxu0 %v17866_v42  ;;  %v17902_v42 = vpack.c.bf16 %v854_v58, %v845_v5  ;;  %v5783_v58 = vrot.slane %v17846_v8, %v16558_v38 }
 0x3bd   :  { %19343 = vst [vmem:[#allocation13_spill] sm:$0xff] %v17910_v47 }
 0x3bf   :  { %v1814_v34 = vpop.f32.mrb[8].mxu1  ;;  %v2209_v53 = vpop.f32.mrb[10].mxu0 }
 0x3c0   :  { %5483 = vmatmul.mubr.f32.vlgmr.msra.gmra.mrb[18].mxu1 %v5376_v62  ;;  %v7744_v49 = vsel %vm7743_vm5, %v1814_v34, 0.0  ;;  %v7745_v44 = vsel %vm7743_vm5, %v2209_v53, 0.0  ;;  %v14780_v37 = vpop.f32.mrb[9].mxu1  ;;  %v14787_v5 = vpop.f32.mrb[11].mxu0  ;;  %v859_v62 = vld [vmem:[%s19058_s3 + $0x6b0] sm:$0x3]  ;;  %v5384_v34 = vrot.slane %v17835_v7, %v16338_v63 }
 0x3c1   :  { %5878 = vmatmul.mubr.f32.vlgmr.msra.gmra.mrb[20].mxu0 %v5771_v20  ;;  %15245 = vmatpush1.bf16.xpose.msra.mxu1 %v17892_v9  ;;  %v17917_v31 = vadd.f32 %v7745_v44, %v7744_v49  ;;  %v838_v37 = vld [vmem:[%s19058_s3 + $0x608] sm:$0x3]  ;;  %v847_v20 = vld [vmem:[%s19058_s3 + $0x650] sm:$0xff]  ;;  %v856_v49 = vld [vmem:[%s19058_s3 + $0x698] sm:$0x3]  ;;  %v5779_v5 = vrot.slane %v17846_v8, %v16338_v63 }
 0x3c2   :  { %5552 = vmatprep.mubr.f32.mxu1 %v5388_v60  ;;  %15264 = vmatpush1.bf16.xpose.msra.mxu0 %v17902_v42  ;;  %v832_v60 = vld [vmem:[%s19058_s3 + $0x5d8] sm:$0xff]  ;;  %v841_v44 = vld [vmem:[%s19058_s3 + $0x620] sm:$0x3]  ;;  %v17940_v32 = vpack.c.bf16 %v838_v37, %v829_v30  ;;  %v17950_v53 = vpack.c.bf16 %v856_v49, %v847_v20  ;;  %v5396_v30 = vrot.slane %v17835_v7, %v16614_v52  ;;  %v831_v20 = vld [vmem:[%s19058_s3 + $0x5d0] sm:$0xff] }
 0x3c3   :  { %5947 = vmatprep.mubr.f32.mxu0 %v5783_v58  ;;  %15247 = vmatprep.subr.bf16.mxu1 %v17906_v48  ;;  %v17954_v58 = vpack.c.bf16 %v841_v44, %v832_v60  ;;  %v17958_v37 = vpack.c.bf16 %v859_v62, %v850_v36  ;;  %v840_v49 = vld [vmem:[%s19058_s3 + $0x618] sm:$0x3]  ;;  %v849_v60 = vld [vmem:[%s19058_s3 + $0x660] sm:$0xff]  ;;  %v858_v44 = vld [vmem:[%s19058_s3 + $0x6a8] sm:$0x3]  ;;  %v5392_v62 = vrot.slane %v17835_v7, %v16341_v2 }
 0x3c4   :  { %15266 = vmatprep.subr.bf16.mxu0 %v17910_v47  ;;  %19344 = vst [vmem:[#allocation31_spill] sm:$0xff] %v17950_v53  ;;  %v5791_v47 = vrot.slane %v17846_v8, %v16614_v52  ;;  %v17978_v36 = vpack.c.bf16 %v840_v49, %v831_v20  ;;  %v833_v20 = vld [vmem:[%s19058_s3 + $0x5e0] sm:$0xff]  ;;  %v842_v49 = vld [vmem:[%s19058_s3 + $0x628] sm:$0x3] }
 0x3c5   :  { %19345 = vst [vmem:[#allocation95_spill] sm:$0xff] %v17954_v58  ;;  %19346 = vst [vmem:[#allocation96_spill] sm:$0xff] %v17958_v37 }
 0x3c6   :  { %19347 = vst [vmem:[#allocation97_spill] sm:$0xff] %v17978_v36 }
 0x3c8   :  { %5553 = vmatmul.mubr.f32.vlgmr.msra.gmra.mrb[18].mxu1 %v5384_v34  ;;  %v17982_v34 = vpack.c.bf16 %v858_v44, %v849_v60  ;;  %v851_v60 = vld [vmem:[%s19058_s3 + $0x670] sm:$0xff]  ;;  %v860_v44 = vld [vmem:[%s19058_s3 + $0x6b8] sm:$0x3] }
 0x3c9   :  { %5948 = vmatmul.mubr.f32.vlgmr.msra.gmra.mrb[20].mxu0 %v5779_v5  ;;  %15249 = vmatpush1.bf16.xpose.msra.mxu1 %v17940_v32  ;;  %v5404_v5 = vrot.slane %v17835_v7, %v16645_v39 }
 0x3ca   :  { %5622 = vmatprep.mubr.f32.mxu1 %v5396_v30  ;;  %15268 = vmatpush1.bf16.xpose.msra.mxu0 %v17950_v53  ;;  %19348 = vst [vmem:[#allocation98_spill] sm:$0xff] %v17982_v34  ;;  %v5799_v30 = vrot.slane %v17846_v8, %v16645_v39 }
 0x3cb   :  { %6017 = vmatprep.mubr.f32.mxu0 %v5791_v47  ;;  %15251 = vmatprep.subr.bf16.mxu1 %v17954_v58  ;;  %v5787_v47 = vrot.slane %v17846_v8, %v16341_v2  ;;  %v5795_v58 = vrot.slane %v17846_v8, %v16344_v3  ;;  %v861_v8 = vld [vmem:[%s19058_s3 + $0x6c0] sm:$0xff] }
 0x3cc   :  { %15270 = vmatprep.subr.bf16.mxu0 %v17958_v37  ;;  %v18022_v37 = vpack.c.bf16 %v860_v44, %v851_v60  ;;  %v882_v44 = vld [vmem:[%s19058_s3 + $0x768] sm:$0xff] }
 0x3ce   :  { %19350 = vst [vmem:[#allocation100_spill] sm:$0xff] %v18022_v37 }
 0x3d0   :  { %5623 = vmatmul.mubr.f32.vlgmr.msra.gmra.mrb[18].mxu1 %v5392_v62  ;;  %v862_v62 = vld [vmem:[%s19058_s3 + $0x6c8] sm:$0xff] }
 0x3d1   :  { %6018 = vmatmul.mubr.f32.vlgmr.msra.gmra.mrb[20].mxu0 %v5787_v47  ;;  %15253 = vmatpush1.bf16.xpose.msra.mxu1 %v17978_v36  ;;  %v871_v47 = vld [vmem:[%s19058_s3 + $0x710] sm:$0x3]  ;;  %v5400_v36 = vrot.slane %v17835_v7, %v16344_v3  ;;  %v1419_v7 = vcombine.high %v17813_v15, %v17813_v15 }
 0x3d2   :  { %5692 = vmatprep.mubr.f32.mxu1 %v5404_v5  ;;  %15272 = vmatpush1.bf16.xpose.msra.mxu0 %v17982_v34  ;;  %v18012_v5 = vpack.c.bf16 %v842_v49, %v833_v20  ;;  %v889_v34 = vld [vmem:[%s19058_s3 + $0x7a0] sm:$0x3]  ;;  %v18026_v53 = vpack.c.bf16 %v871_v47, %v862_v62  ;;  %v879_v15 = vld [vmem:[%s19058_s3 + $0x750] sm:$0xff]  ;;  %v864_v49 = vld [vmem:[%s19058_s3 + $0x6d8] sm:$0xff] }
 0x3d3   :  { %6087 = vmatprep.mubr.f32.mxu0 %v5799_v30  ;;  %15254 = vmatprep.subr.bf16.mxu1 %v19272_v25  ;;  %v880_v30 = vld [vmem:[%s19058_s3 + $0x758] sm:$0xff]  ;;  %v891_v62 = vld [vmem:[%s19058_s3 + $0x7b0] sm:$0x3]  ;;  %v5408_v47 = vrot.slane %v1419_v7, %v16330_v23 }
 0x3d4   :  { %15273 = vmatprep.subr.bf16.mxu0 %v19272_v25  ;;  %19349 = vst [vmem:[#allocation99_spill] sm:$0xff] %v18012_v5  ;;  %19351 = vst [vmem:[#allocation101_spill] sm:$0xff] %v18026_v53  ;;  %v18028_v20 = vpack.c.bf16 %v889_v34, %v880_v30  ;;  %v888_v34 = vld [vmem:[%s19058_s3 + $0x798] sm:$0x3]  ;;  %v863_v7 = vld [vmem:[%s19058_s3 + $0x6d0] sm:$0xff] }
 0x3d5   :  { %v18069_v30 = vpack.c.bf16 %v888_v34, %v879_v15  ;;  %v890_v15 = vld [vmem:[%s19058_s3 + $0x7a8] sm:$0x3] }
 0x3d6   :  { %19352 = vst [vmem:[#allocation102_spill] sm:$0xff] %v18028_v20  ;;  %v866_v34 = vld [vmem:[%s19058_s3 + $0x6e8] sm:$0xff] }
 0x3d7   :  { %19354 = vst [vmem:[#allocation104_spill] sm:$0xff] %v18069_v30 }
 0x3d8   :  { %5693 = vmatmul.mubr.f32.vlgmr.msra.gmra.mrb[18].mxu1 %v5400_v36  ;;  %v870_v36 = vld [vmem:[%s19058_s3 + $0x708] sm:$0x3] }
 0x3d9   :  { %6088 = vmatmul.mubr.f32.vlgmr.msra.gmra.mrb[20].mxu0 %v5795_v58  ;;  %15256 = vmatpush3.bf16.xpose.msra.mxu1 %v18012_v5  ;;  %v1421_v58 = vcombine.high %v17825_v19, %v17825_v19  ;;  %v873_v19 = vld [vmem:[%s19058_s3 + $0x720] sm:$0x3]  ;;  %v18060_v60 = vpack.c.bf16 %v870_v36, %v861_v8  ;;  %v6170_v8 = vrot.slane %v17607_v14, %v16519_v21 }
 0x3da   :  { %15275 = vmatpush3.bf16.xpose.msra.mxu0 %v18022_v37  ;;  %14848 = vmatprep.mubr.msk.f32.mxu1 %vm15960_vm4, %v19251_v11  ;;  %v18076_v36 = vpack.c.bf16 %v891_v62, %v882_v44  ;;  %v6565_v37 = vrot.slane %v17623_v6, %v16519_v21  ;;  %v893_v44 = vld [vmem:[%s19058_s3 + $0x7c0] sm:$0x3]  ;;  %v6166_v62 = vrot.slane %v17607_v14, %v16330_v23 }
 0x3db   :  { %14855 = vmatprep.mubr.msk.f32.mxu0 %vm15960_vm4, %v19251_v11  ;;  %15277 = vmatprep.subr.bf16.mxu1 %v18026_v53  ;;  %19353 = vst [vmem:[#allocation103_spill] sm:$0xff] %v18060_v60  ;;  %v18072_v53 = vpack.c.bf16 %v873_v19, %v864_v49  ;;  %v884_v19 = vld [vmem:[%s19058_s3 + $0x778] sm:$0xff] }
 0x3dc   :  { %15296 = vmatprep.subr.bf16.mxu0 %v18028_v20  ;;  %v5803_v20 = vrot.slane %v1421_v58, %v16330_v23  ;;  %19356 = vst [vmem:[#allocation106_spill] sm:$0xff] %v18076_v36  ;;  %v872_v58 = vld [vmem:[%s19058_s3 + $0x718] sm:$0x3] }
 0x3dd   :  { %19355 = vst [vmem:[#allocation105_spill] sm:$0xff] %v18072_v53  ;;  %v18102_v49 = vpack.c.bf16 %v872_v58, %v863_v7  ;;  %v6178_v7 = vrot.slane %v17607_v14, %v16558_v38 }
 0x3e0   :  { %14849 = vmatmul.mubr.f32.vlgmr.msra.gmra.mrb[18].mxu1 %v5408_v47 }
 0x3e1   :  { %14856 = vmatmul.mubr.f32.vlgmr.msra.gmra.mrb[20].mxu0 %v5803_v20  ;;  %15279 = vmatpush1.bf16.xpose.msra.mxu1 %v18060_v60  ;;  %v881_v20 = vld [vmem:[%s19058_s3 + $0x760] sm:$0xff]  ;;  %v18121_v60 = vpack.c.bf16 %v893_v44, %v884_v19  ;;  %v868_v44 = vld [vmem:[%s19058_s3 + $0x6f8] sm:$0xff] }
 0x3e2   :  { %6272 = vmatprep.mubr.f32.mxu1 %v6170_v8  ;;  %15298 = vmatpush1.bf16.xpose.msra.mxu0 %v18069_v30  ;;  %v18112_v47 = vpack.c.bf16 %v890_v15, %v881_v20  ;;  %v6561_v8 = vrot.slane %v17623_v6, %v16330_v23  ;;  %v6573_v20 = vrot.slane %v17623_v6, %v16558_v38 }
 0x3e3   :  { %6667 = vmatprep.mubr.f32.mxu0 %v6565_v37  ;;  %15281 = vmatprep.subr.bf16.mxu1 %v18072_v53  ;;  %v875_v37 = vld [vmem:[%s19058_s3 + $0x730] sm:$0x3]  ;;  %19359 = vst [vmem:[#allocation109_spill] sm:$0xff] %v18121_v60 }
 0x3e4   :  { %15300 = vmatprep.subr.bf16.mxu0 %v18076_v36  ;;  %19357 = vst [vmem:[#allocation107_spill] sm:$0xff] %v18112_v47  ;;  %v18116_v53 = vpack.c.bf16 %v875_v37, %v866_v34 }
 0x3e6   :  { %19358 = vst [vmem:[#allocation108_spill] sm:$0xff] %v18116_v53 }
 0x3e7   :  { %v2604_v36 = vpop.f32.mrb[10].mxu1 }
 0x3e8   :  { %6273 = vmatmul.mubr.f32.vlgmr.msra.gmra.mrb[20].mxu1 %v6166_v62  ;;  %v7747_v58 = vsel %vm7743_vm5, %v2604_v36, 0.0  ;;  %v2999_v30 = vpop.f32.mrb[12].mxu0  ;;  %v14794_v5 = vpop.f32.mrb[11].mxu1  ;;  %v865_v36 = vld [vmem:[%s19058_s3 + $0x6e0] sm:$0xff] }
 0x3e9   :  { %6668 = vmatmul.mubr.f32.vlgmr.msra.gmra.mrb[22].mxu0 %v6561_v8  ;;  %15283 = vmatpush1.bf16.xpose.msra.mxu1 %v18102_v49  ;;  %v7748_v15 = vadd.f32 %v7747_v58, %v17917_v31  ;;  %v14801_v34 = vpop.f32.mrb[13].mxu0  ;;  %v7749_v37 = vsel %vm7743_vm5, %v2999_v30, 0.0  ;;  %v874_v5 = vld [vmem:[%s19058_s3 + $0x728] sm:$0x3]  ;;  %v883_v31 = vld [vmem:[%s19058_s3 + $0x770] sm:$0xff] }
 0x3ea   :  { %6342 = vmatprep.mubr.f32.mxu1 %v6178_v7  ;;  %15302 = vmatpush1.bf16.xpose.msra.mxu0 %v18112_v47  ;;  %v892_v30 = vld [vmem:[%s19058_s3 + $0x7b8] sm:$0x3]  ;;  %v877_v62 = vld [vmem:[%s19058_s3 + $0x740] sm:$0x3]  ;;  %v18151_v8 = vpack.c.bf16 %v874_v5, %v865_v36  ;;  %v886_v7 = vld [vmem:[%s19058_s3 + $0x788] sm:$0xff]  ;;  %v6569_v34 = vrot.slane %v17623_v6, %v16338_v63  ;;  %v6186_v36 = vrot.slane %v17607_v14, %v16614_v52 }
 0x3eb   :  { %6737 = vmatprep.mubr.f32.mxu0 %v6573_v20  ;;  %v18135_v19 = vadd.f32 %v7749_v37, %v7748_v15  ;;  %15285 = vmatprep.subr.bf16.mxu1 %v18116_v53  ;;  %v895_v58 = vld [vmem:[%s19058_s3 + $0x7d0] sm:$0x3]  ;;  %v6174_v20 = vrot.slane %v17607_v14, %v16338_v63  ;;  %v18161_v15 = vpack.c.bf16 %v892_v30, %v883_v31  ;;  %v876_v30 = vld [vmem:[%s19058_s3 + $0x738] sm:$0x3] }
 0x3ec   :  { %15304 = vmatprep.subr.bf16.mxu0 %v18121_v60  ;;  %19360 = vst [vmem:[#allocation110_spill] sm:$0xff] %v18151_v8  ;;  %v18165_v37 = vpack.c.bf16 %v877_v62, %v868_v44  ;;  %v18169_v5 = vpack.c.bf16 %v895_v58, %v886_v7  ;;  %v6581_v60 = vrot.slane %v17623_v6, %v16614_v52  ;;  %v867_v31 = vld [vmem:[%s19058_s3 + $0x6f0] sm:$0xff]  ;;  %v885_v44 = vld [vmem:[%s19058_s3 + $0x780] sm:$0xff]  ;;  %v894_v62 = vld [vmem:[%s19058_s3 + $0x7c8] sm:$0x3] }
 0x3ed   :  { %19361 = vst [vmem:[#allocation111_spill] sm:$0xff] %v18161_v15  ;;  %v18189_v7 = vpack.c.bf16 %v876_v30, %v867_v31  ;;  %v6182_v58 = vrot.slane %v17607_v14, %v16341_v2  ;;  %v6589_v31 = vrot.slane %v17623_v6, %v16645_v39  ;;  %v869_v30 = vld [vmem:[%s19058_s3 + $0x700] sm:$0xff] }
 0x3ee   :  { %19362 = vst [vmem:[#allocation112_spill] sm:$0xff] %v18165_v37  ;;  %19363 = vst [vmem:[#allocation113_spill] sm:$0xff] %v18169_v5 }
 0x3ef   :  { %19364 = vst [vmem:[#allocation114_spill] sm:$0xff] %v18189_v7 }
 0x3f0   :  { %6343 = vmatmul.mubr.f32.vlgmr.msra.gmra.mrb[20].mxu1 %v6174_v20  ;;  %v18193_v20 = vpack.c.bf16 %v894_v62, %v885_v44  ;;  %v887_v44 = vld [vmem:[%s19058_s3 + $0x790] sm:$0xff]  ;;  %v896_v62 = vld [vmem:[%s19058_s3 + $0x7d8] sm:$0x3] }
 0x3f1   :  { %6738 = vmatmul.mubr.f32.vlgmr.msra.gmra.mrb[22].mxu0 %v6569_v34  ;;  %15287 = vmatpush1.bf16.xpose.msra.mxu1 %v18151_v8  ;;  %v1374_v34 = vcombine.high %v17760_v1, %v17760_v1  ;;  %v878_v1 = vld [vmem:[%s19058_s3 + $0x748] sm:$0x3] }
 0x3f2   :  { %6412 = vmatprep.mubr.f32.mxu1 %v6186_v36  ;;  %15306 = vmatpush1.bf16.xpose.msra.mxu0 %v18161_v15  ;;  %19365 = vst [vmem:[#allocation115_spill] sm:$0xff] %v18193_v20  ;;  %v6194_v36 = vrot.slane %v17607_v14, %v16645_v39 }
 0x3f3   :  { %6807 = vmatprep.mubr.f32.mxu0 %v6581_v60  ;;  %15289 = vmatprep.subr.bf16.mxu1 %v18165_v37  ;;  %v6577_v60 = vrot.slane %v17623_v6, %v16341_v2  ;;  %v6585_v37 = vrot.slane %v17623_v6, %v16344_v3  ;;  %v897_v6 = vld [vmem:[%s19058_s3 + $0x7e0] sm:$0xff] }
 0x3f4   :  { %15308 = vmatprep.subr.bf16.mxu0 %v18169_v5  ;;  %v18236_v5 = vpack.c.bf16 %v896_v62, %v887_v44  ;;  %v900_v44 = vld [vmem:[%s19058_s3 + $0x7f8] sm:$0xff] }
 0x3f6   :  { %19367 = vst [vmem:[#allocation117_spill] sm:$0xff] %v18236_v5 }
 0x3f8   :  { %6413 = vmatmul.mubr.f32.vlgmr.msra.gmra.mrb[20].mxu1 %v6182_v58  ;;  %v1388_v58 = vrot.slane %v1374_v34, %v16394_v45  ;;  %v925_v34 = vld [vmem:[%s19058_s3 + $0x8c0] sm:$0x3] }
 0x3f9   :  { %6808 = vmatmul.mubr.f32.vlgmr.msra.gmra.mrb[22].mxu0 %v6577_v60  ;;  %15291 = vmatpush1.bf16.xpose.msra.mxu1 %v18189_v7  ;;  %v898_v60 = vld [vmem:[%s19058_s3 + $0x7e8] sm:$0xff]  ;;  %v6190_v7 = vrot.slane %v17607_v14, %v16344_v3 }
 0x3fa   :  { %6482 = vmatprep.mubr.f32.mxu1 %v6194_v36  ;;  %15310 = vmatpush1.bf16.xpose.msra.mxu0 %v18193_v20  ;;  %v907_v36 = vld [vmem:[%s19058_s3 + $0x830] sm:$0x3]  ;;  %v916_v20 = vld [vmem:[%s19058_s3 + $0x878] sm:$0xff]  ;;  %v1390_v15 = vcombine.high %v1388_v58, %v1388_v58  ;;  %v18249_v14 = vrot.slane %v1388_v58, %v16394_v45  ;;  %v918_v58 = vld [vmem:[%s19058_s3 + $0x888] sm:$0xff] }
 0x3fb   :  { %6877 = vmatprep.mubr.f32.mxu0 %v6589_v31  ;;  %15292 = vmatprep.subr.bf16.mxu1 %v19272_v25  ;;  %v18226_v31 = vpack.c.bf16 %v878_v1, %v869_v30  ;;  %v18240_v8 = vpack.c.bf16 %v907_v36, %v898_v60  ;;  %v18242_v30 = vpack.c.bf16 %v925_v34, %v916_v20  ;;  %v915_v20 = vld [vmem:[%s19058_s3 + $0x870] sm:$0xff]  ;;  %v924_v1 = vld [vmem:[%s19058_s3 + $0x8b8] sm:$0x3] }
 0x3fc   :  { %15311 = vmatprep.subr.bf16.mxu0 %v19272_v25  ;;  %v927_v60 = vld [vmem:[%s19058_s3 + $0x8d0] sm:$0x3]  ;;  %v6198_v36 = vrot.slane %v18249_v14, %v16330_v23  ;;  %v18286_v34 = vpack.c.bf16 %v924_v1, %v915_v20  ;;  %v908_v1 = vld [vmem:[%s19058_s3 + $0x838] sm:$0x3] }
 0x3fd   :  { %19366 = vst [vmem:[#allocation116_spill] sm:$0xff] %v18226_v31  ;;  %19368 = vst [vmem:[#allocation118_spill] sm:$0xff] %v18240_v8  ;;  %v899_v20 = vld [vmem:[%s19058_s3 + $0x7f0] sm:$0xff] }
 0x3fe   :  { %19369 = vst [vmem:[#allocation119_spill] sm:$0xff] %v18242_v30  ;;  %19371 = vst [vmem:[#allocation121_spill] sm:$0xff] %v18286_v34 }
 0x400   :  { %6483 = vmatmul.mubr.f32.vlgmr.msra.gmra.mrb[20].mxu1 %v6190_v7  ;;  %v906_v7 = vld [vmem:[%s19058_s3 + $0x828] sm:$0x3] }
 0x401   :  { %6878 = vmatmul.mubr.f32.vlgmr.msra.gmra.mrb[22].mxu0 %v6585_v37  ;;  %15294 = vmatpush3.bf16.xpose.msra.mxu1 %v18226_v31  ;;  %v18260_v37 = vrot.slane %v1390_v15, %v16394_v45  ;;  %v909_v15 = vld [vmem:[%s19058_s3 + $0x840] sm:$0x3]  ;;  %v18276_v62 = vpack.c.bf16 %v906_v7, %v897_v6  ;;  %v6960_v6 = vrot.slane %v17609_v46, %v16519_v21 }
 0x402   :  { %15313 = vmatpush3.bf16.xpose.msra.mxu0 %v18236_v5  ;;  %14862 = vmatprep.mubr.msk.f32.mxu1 %vm15960_vm4, %v19251_v11  ;;  %v18294_v7 = vpack.c.bf16 %v927_v60, %v918_v58  ;;  %v7355_v5 = vrot.slane %v17625_v17, %v16519_v21  ;;  %v18320_v58 = vpack.c.bf16 %v908_v1, %v899_v20  ;;  %v920_v60 = vld [vmem:[%s19058_s3 + $0x898] sm:$0xff] }
 0x403   :  { %14869 = vmatprep.mubr.msk.f32.mxu0 %vm15960_vm4, %v19251_v11  ;;  %15315 = vmatprep.subr.bf16.mxu1 %v18240_v8  ;;  %19370 = vst [vmem:[#allocation120_spill] sm:$0xff] %v18276_v62  ;;  %v18290_v8 = vpack.c.bf16 %v909_v15, %v900_v44  ;;  %v926_v44 = vld [vmem:[%s19058_s3 + $0x8c8] sm:$0x3]  ;;  %v6968_v20 = vrot.slane %v17609_v46, %v16558_v38 }
 0x404   :  { %15334 = vmatprep.subr.bf16.mxu0 %v18242_v30  ;;  %v6593_v30 = vrot.slane %v18260_v37, %v16330_v23  ;;  %19373 = vst [vmem:[#allocation123_spill] sm:$0xff] %v18294_v7  ;;  %v902_v15 = vld [vmem:[%s19058_s3 + $0x808] sm:$0xff] }
 0x405   :  { %19372 = vst [vmem:[#allocation122_spill] sm:$0xff] %v18290_v8 }
 0x408   :  { %14863 = vmatmul.mubr.f32.vlgmr.msra.gmra.mrb[20].mxu1 %v6198_v36  ;;  %v929_v36 = vld [vmem:[%s19058_s3 + $0x8e0] sm:$0x3] }
 0x409   :  { %14870 = vmatmul.mubr.f32.vlgmr.msra.gmra.mrb[22].mxu0 %v6593_v30  ;;  %15317 = vmatpush1.bf16.xpose.msra.mxu1 %v18276_v62  ;;  %v917_v30 = vld [vmem:[%s19058_s3 + $0x880] sm:$0xff]  ;;  %v18339_v53 = vpack.c.bf16 %v929_v36, %v920_v60  ;;  %v904_v60 = vld [vmem:[%s19058_s3 + $0x818] sm:$0xff] }
 0x40a   :  { %7062 = vmatprep.mubr.f32.mxu1 %v6960_v6  ;;  %15336 = vmatpush1.bf16.xpose.msra.mxu0 %v18286_v34  ;;  %v6956_v6 = vrot.slane %v17609_v46, %v16330_v23  ;;  %v913_v36 = vld [vmem:[%s19058_s3 + $0x860] sm:$0x3] }
 0x40b   :  { %7457 = vmatprep.mubr.f32.mxu0 %v7355_v5  ;;  %15319 = vmatprep.subr.bf16.mxu1 %v18290_v8  ;;  %v911_v5 = vld [vmem:[%s19058_s3 + $0x850] sm:$0x3]  ;;  %v7351_v8 = vrot.slane %v17625_v17, %v16330_v23  ;;  %19374 = vst [vmem:[#allocation124_spill] sm:$0xff] %v18339_v53 }
 0x40c   :  { %15338 = vmatprep.subr.bf16.mxu0 %v18294_v7  ;;  %v18330_v7 = vpack.c.bf16 %v926_v44, %v917_v30  ;;  %v18334_v62 = vpack.c.bf16 %v911_v5, %v902_v15  ;;  %v7363_v30 = vrot.slane %v17625_v17, %v16558_v38 }
 0x40f   :  { %v3394_v34 = vpop.f32.mrb[12].mxu1 }
 0x410   :  { %7063 = vmatmul.mubr.f32.vlgmr.msra.gmra.mrb[22].mxu1 %v6956_v6  ;;  %v7751_v1 = vsel %vm7743_vm5, %v3394_v34, 0.0  ;;  %v3789_v31 = vpop.f32.mrb[14].mxu0  ;;  %v14808_v47 = vpop.f32.mrb[13].mxu1  ;;  %v901_v34 = vld [vmem:[%s19058_s3 + $0x800] sm:$0xff] }
 0x411   :  { %7458 = vmatmul.mubr.f32.vlgmr.msra.gmra.mrb[24].mxu0 %v7351_v8  ;;  %15321 = vmatpush1.bf16.xpose.msra.mxu1 %v18320_v58  ;;  %v7752_v44 = vadd.f32 %v7751_v1, %v18135_v19  ;;  %v14815_v15 = vpop.f32.mrb[15].mxu0  ;;  %v7753_v5 = vsel %vm7743_vm5, %v3789_v31, 0.0  ;;  %v910_v47 = vld [vmem:[%s19058_s3 + $0x848] sm:$0x3]  ;;  %v919_v19 = vld [vmem:[%s19058_s3 + $0x890] sm:$0xff] }
 0x412   :  { %7132 = vmatprep.mubr.f32.mxu1 %v6968_v20  ;;  %15340 = vmatpush1.bf16.xpose.msra.mxu0 %v18330_v7  ;;  %v928_v31 = vld [vmem:[%s19058_s3 + $0x8d8] sm:$0x3]  ;;  %v18369_v6 = vpack.c.bf16 %v910_v47, %v901_v34  ;;  %v922_v20 = vld [vmem:[%s19058_s3 + $0x8a8] sm:$0xff]  ;;  %v931_v1 = vld [vmem:[%s19058_s3 + $0x8f0] sm:$0x3]  ;;  %v7359_v15 = vrot.slane %v17625_v17, %v16338_v63  ;;  %v6976_v34 = vrot.slane %v17609_v46, %v16614_v52 }
 0x413   :  { %7527 = vmatprep.mubr.f32.mxu0 %v7363_v30  ;;  %v18353_v8 = vadd.f32 %v7753_v5, %v7752_v44  ;;  %15323 = vmatprep.subr.bf16.mxu1 %v18334_v62  ;;  %v6964_v30 = vrot.slane %v17609_v46, %v16338_v63  ;;  %v18379_v44 = vpack.c.bf16 %v928_v31, %v919_v19  ;;  %v903_v19 = vld [vmem:[%s19058_s3 + $0x810] sm:$0xff]  ;;  %v912_v31 = vld [vmem:[%s19058_s3 + $0x858] sm:$0x3] }
 0x414   :  { %15342 = vmatprep.subr.bf16.mxu0 %v18339_v53  ;;  %v18383_v5 = vpack.c.bf16 %v913_v36, %v904_v60  ;;  %v18387_v47 = vpack.c.bf16 %v931_v1, %v922_v20  ;;  %v7371_v53 = vrot.slane %v17625_v17, %v16614_v52  ;;  %v921_v60 = vld [vmem:[%s19058_s3 + $0x8a0] sm:$0xff]  ;;  %v930_v36 = vld [vmem:[%s19058_s3 + $0x8e8] sm:$0x3]  ;;  %v18407_v20 = vpack.c.bf16 %v912_v31, %v903_v19 }
 0x415   :  { %v6972_v1 = vrot.slane %v17609_v46, %v16341_v2  ;;  %v905_v19 = vld [vmem:[%s19058_s3 + $0x820] sm:$0xff]  ;;  %v914_v31 = vld [vmem:[%s19058_s3 + $0x868] sm:$0x3] }
 0x418   :  { %7133 = vmatmul.mubr.f32.vlgmr.msra.gmra.mrb[22].mxu1 %v6964_v30  ;;  %v18411_v30 = vpack.c.bf16 %v930_v36, %v921_v60  ;;  %v923_v60 = vld [vmem:[%s19058_s3 + $0x8b0] sm:$0xff]  ;;  %v932_v36 = vld [vmem:[%s19058_s3 + $0x8f8] sm:$0x3] }
 0x419   :  { %7528 = vmatmul.mubr.f32.vlgmr.msra.gmra.mrb[24].mxu0 %v7359_v15  ;;  %15325 = vmatpush1.bf16.xpose.msra.mxu1 %v18369_v6  ;;  %v6984_v15 = vrot.slane %v17609_v46, %v16645_v39 }
 0x41a   :  { %7202 = vmatprep.mubr.f32.mxu1 %v6976_v34  ;;  %15344 = vmatpush1.bf16.xpose.msra.mxu0 %v18379_v44  ;;  %19375 = vst [vmem:[#allocation125_spill] sm:$0xff] %v18411_v30  ;;  %v7379_v34 = vrot.slane %v17625_v17, %v16645_v39 }
 0x41b   :  { %7597 = vmatprep.mubr.f32.mxu0 %v7371_v53  ;;  %15327 = vmatprep.subr.bf16.mxu1 %v18383_v5  ;;  %v7367_v53 = vrot.slane %v17625_v17, %v16341_v2 }
 0x41c   :  { %15346 = vmatprep.subr.bf16.mxu0 %v18387_v47 }
 0x420   :  { %7203 = vmatmul.mubr.f32.vlgmr.msra.gmra.mrb[22].mxu1 %v6972_v1  ;;  %v18435_v1 = vpack.c.bf16 %v914_v31, %v905_v19  ;;  %v1420_v19 = vcombine.high %v18249_v14, %v18249_v14  ;;  %v19378_v31 = vld [vmem:[#allocation5_spill] sm:$0xff]  ;;  %v19380_v14 = vld [vmem:[#allocation7_spill] sm:$0xff] }
 0x421   :  { %7598 = vmatmul.mubr.f32.vlgmr.msra.gmra.mrb[24].mxu0 %v7367_v53  ;;  %15329 = vmatpush1.bf16.xpose.msra.mxu1 %v18407_v20  ;;  %v6980_v53 = vrot.slane %v17609_v46, %v16344_v3  ;;  %v1422_v46 = vcombine.high %v18260_v37, %v18260_v37  ;;  %v19381_v37 = vld [vmem:[#allocation8_spill] sm:$0xff] }
 0x422   :  { %7272 = vmatprep.mubr.f32.mxu1 %v6984_v15  ;;  %15348 = vmatpush1.bf16.xpose.msra.mxu0 %v18411_v30  ;;  %19376 = vst [vmem:[#allocation126_spill] sm:$0xff] %v18435_v1  ;;  %v18439_v15 = vpack.c.bf16 %v932_v36, %v923_v60  ;;  %v6988_v60 = vrot.slane %v1420_v19, %v16330_v23 }
 0x423   :  { %7667 = vmatprep.mubr.f32.mxu0 %v7379_v34  ;;  %15330 = vmatprep.subr.bf16.mxu1 %v19272_v25  ;;  %v7375_v34 = vrot.slane %v17625_v17, %v16344_v3  ;;  %v19379_v17 = vld [vmem:[#allocation6_spill] sm:$0xff]  ;;  %v7383_v36 = vrot.slane %v1422_v46, %v16330_v23  ;;  %v8265_v19 = vrot.slane %v16906_v61, %v16330_v23 }
 0x424   :  { %15349 = vmatprep.subr.bf16.mxu0 %v19272_v25  ;;  %19377 = vst [vmem:[#allocation127_spill] sm:$0xff] %v18439_v15  ;;  %v8660_v46 = vrot.slane %v16912_v57, %v16330_v23 }
 0x428   :  { %7273 = vmatmul.mubr.f32.vlgmr.msra.gmra.mrb[22].mxu1 %v6980_v53  ;;  %v8269_v53 = vrot.slane %v16906_v61, %v16519_v21 }
 0x429   :  { %7668 = vmatmul.mubr.f32.vlgmr.msra.gmra.mrb[24].mxu0 %v7375_v34  ;;  %15332 = vmatpush3.bf16.xpose.msra.mxu1 %v18435_v1  ;;  %v8664_v34 = vrot.slane %v16912_v57, %v16519_v21  ;;  %v19385_v1 = vld [vmem:[#allocation23_spill] sm:$0xff] }
 0x42a   :  { %15351 = vmatpush3.bf16.xpose.msra.mxu0 %v18439_v15  ;;  %14876 = vmatprep.mubr.msk.f32.mxu1 %vm15960_vm4, %v19251_v11 }
 0x42b   :  { %14883 = vmatprep.mubr.msk.f32.mxu0 %vm15960_vm4, %v19251_v11  ;;  %15353 = vmatprep.subr.bf16.mxu1 %v19378_v31  ;;  %v19382_v31 = vld [vmem:[#allocation10_spill] sm:$0xff] }
 0x42c   :  { %15372 = vmatprep.subr.bf16.mxu0 %v19379_v17  ;;  %v19383_v17 = vld [vmem:[#allocation11_spill] sm:$0xff] }
 0x430   :  { %14877 = vmatmul.mubr.f32.vlgmr.msra.gmra.mrb[22].mxu1 %v6988_v60 }
 0x431   :  { %14884 = vmatmul.mubr.f32.vlgmr.msra.gmra.mrb[24].mxu0 %v7383_v36  ;;  %15355 = vmatpush1.bf16.xpose.msra.mxu1 %v19380_v14  ;;  %v8277_v36 = vrot.slane %v16906_v61, %v16558_v38 }
 0x432   :  { %8371 = vmatprep.mubr.f32.mxu1 %v8269_v53  ;;  %15374 = vmatpush1.bf16.xpose.msra.mxu0 %v19381_v37 }
 0x433   :  { %8766 = vmatprep.mubr.f32.mxu0 %v8664_v34  ;;  %15357 = vmatprep.subr.bf16.mxu1 %v19382_v31  ;;  %v19384_v34 = vld [vmem:[#allocation22_spill] sm:$0xff]  ;;  %v8672_v31 = vrot.slane %v16912_v57, %v16558_v38 }
 0x434   :  { %15376 = vmatprep.subr.bf16.mxu0 %v19383_v17 }
 0x437   :  { %v4184_v60 = vpop.f32.mrb[14].mxu1 }
 0x438   :  { %8372 = vmatmul.mubr.f32.vlgmr.msra.gmra.mrb[24].mxu1 %v8265_v19  ;;  %v7755_v53 = vsel %vm7743_vm5, %v4184_v60, 0.0  ;;  %v4579_v14 = vpop.f32.mrb[16].mxu0  ;;  %v14822_v37 = vpop.f32.mrb[15].mxu1  ;;  %v19386_v60 = vld [vmem:[#allocation24_spill] sm:$0xff] }
 0x439   :  { %8767 = vmatmul.mubr.f32.vlgmr.msra.gmra.mrb[26].mxu0 %v8660_v46  ;;  %15359 = vmatpush1.bf16.xpose.msra.mxu1 %v19384_v34  ;;  %v7756_v17 = vadd.f32 %v7755_v53, %v18353_v8  ;;  %v14829_v15 = vpop.f32.mrb[17].mxu0  ;;  %v7757_v19 = vsel %vm7743_vm5, %v4579_v14, 0.0  ;;  %v19387_v37 = vld [vmem:[#allocation25_spill] sm:$0xff]  ;;  %v8273_v46 = vrot.slane %v16906_v61, %v16338_v63  ;;  %v8668_v34 = vrot.slane %v16912_v57, %v16338_v63  ;;  %v15929_v8 = vld [vmem:[%s19059_s4 + $0x10] sm:$0x3]  ;;  %v19389_v14 = vld [vmem:[#allocation28_spill] sm:$0xff] }
 0x43a   :  { %8441 = vmatprep.mubr.f32.mxu1 %v8277_v36  ;;  %15378 = vmatpush1.bf16.xpose.msra.mxu0 %v19385_v1  ;;  %v7810_v1 = vrot.slane %v15929_v8, %v16519_v21  ;;  %v8285_v15 = vrot.slane %v16906_v61, %v16614_v52  ;;  %v19388_v36 = vld [vmem:[#allocation27_spill] sm:$0xff]  ;;  %v8680_v53 = vrot.slane %v16912_v57, %v16614_v52 }
 0x43b   :  { %8836 = vmatprep.mubr.f32.mxu0 %v8672_v31  ;;  %v18478_v30 = vadd.f32 %v7757_v19, %v7756_v17  ;;  %15361 = vmatprep.subr.bf16.mxu1 %v19386_v60  ;;  %v19390_v31 = vld [vmem:[#allocation29_spill] sm:$0xff]  ;;  %v19391_v19 = vld [vmem:[#allocation30_spill] sm:$0xff]  ;;  %v8281_v60 = vrot.slane %v16906_v61, %v16341_v2 }
 0x43c   :  { %15380 = vmatprep.subr.bf16.mxu0 %v19387_v37  ;;  %v18498_v17 = vrot.slane %v7810_v1, %v16519_v21  ;;  %v8676_v37 = vrot.slane %v16912_v57, %v16341_v2  ;;  %v19394_v1 = vld [vmem:[#allocation32_spill] sm:$0xff] }
 0x440   :  { %8442 = vmatmul.mubr.f32.vlgmr.msra.gmra.mrb[24].mxu1 %v8273_v46  ;;  %v19392_v46 = vld [vmem:[#allocation26_spill] sm:$0xff] }
 0x441   :  { %8837 = vmatmul.mubr.f32.vlgmr.msra.gmra.mrb[26].mxu0 %v8668_v34  ;;  %15363 = vmatpush1.bf16.xpose.msra.mxu1 %v19388_v36  ;;  %v19393_v34 = vmax.f32 %v19392_v46, 0.0  ;;  %v8688_v36 = vrot.slane %v16912_v57, %v16645_v39  ;;  %v19397_v46 = vld [vmem:[#allocation37_spill] sm:$0xff] }
 0x442   :  { %8511 = vmatprep.mubr.f32.mxu1 %v8285_v15  ;;  %15382 = vmatpush1.bf16.xpose.msra.mxu0 %v19389_v14  ;;  %v8293_v15 = vrot.slane %v16906_v61, %v16645_v39 }
 0x443   :  { %8906 = vmatprep.mubr.f32.mxu0 %v8680_v53  ;;  %15365 = vmatprep.subr.bf16.mxu1 %v19390_v31  ;;  %v18508_v8 = vmul.f32 %v18498_v17, %v19393_v34  ;;  %v19395_v53 = vld [vmem:[#allocation33_spill] sm:$0xff]  ;;  %v8289_v31 = vrot.slane %v16906_v61, %v16344_v3 }
 0x444   :  { %15384 = vmatprep.subr.bf16.mxu0 %v19391_v19  ;;  %v8684_v19 = vrot.slane %v16912_v57, %v16344_v3  ;;  %v19398_v57 = vld [vmem:[#allocation38_spill] sm:$0xff] }
 0x445   :  { %v8035_v14 = vrot.slane %v18508_v8, %v16394_v45 }
 0x447   :  { %v18529_v34 = vrot.slane %v8035_v14, %v16394_v45 }
 0x448   :  { %8512 = vmatmul.mubr.f32.vlgmr.msra.gmra.mrb[24].mxu1 %v8281_v60  ;;  %v8043_v60 = vcombine.high %v8035_v14, %v8035_v14  ;;  %v9454_v14 = vrot.slane %v16914_v56, %v16519_v21 }
 0x449   :  { %8907 = vmatmul.mubr.f32.vlgmr.msra.gmra.mrb[26].mxu0 %v8676_v37  ;;  %15367 = vmatpush1.bf16.xpose.msra.mxu1 %v19394_v1  ;;  %v19396_v37 = vld [vmem:[#allocation36_spill] sm:$0xff]  ;;  %v8297_v1 = vrot.slane %v18529_v34, %v16330_v23 }
 0x44a   :  { %8581 = vmatprep.mubr.f32.mxu1 %v8293_v15  ;;  %15386 = vmatpush1.bf16.xpose.msra.mxu0 %v19395_v53  ;;  %v18534_v61 = vrot.slane %v8043_v60, %v16394_v45  ;;  %v19399_v15 = vld [vmem:[#allocation39_spill] sm:$0xff]  ;;  %v9059_v53 = vrot.slane %v16908_v29, %v16519_v21  ;;  %v9458_v60 = vrot.slane %v16914_v56, %v16338_v63 }
 0x44b   :  { %8976 = vmatprep.mubr.f32.mxu0 %v8688_v36  ;;  %15368 = vmatprep.subr.bf16.mxu1 %v19272_v25 }
 0x44c   :  { %15387 = vmatprep.subr.bf16.mxu0 %v19272_v25  ;;  %v8692_v36 = vrot.slane %v18534_v61, %v16330_v23 }
 0x450   :  { %8582 = vmatmul.mubr.f32.vlgmr.msra.gmra.mrb[24].mxu1 %v8289_v31  ;;  %v9055_v31 = vrot.slane %v16908_v29, %v16330_v23 }
 0x451   :  { %8977 = vmatmul.mubr.f32.vlgmr.msra.gmra.mrb[26].mxu0 %v8684_v19  ;;  %15370 = vmatpush3.bf16.xpose.msra.mxu1 %v19396_v37  ;;  %v9450_v19 = vrot.slane %v16914_v56, %v16330_v23  ;;  %v19401_v37 = vld [vmem:[#allocation41_spill] sm:$0xff] }
 0x452   :  { %15389 = vmatpush3.bf16.xpose.msra.mxu0 %v19397_v46  ;;  %14890 = vmatprep.mubr.msk.f32.mxu1 %vm15960_vm4, %v19251_v11  ;;  %v19403_v46 = vld [vmem:[#allocation43_spill] sm:$0xff] }
 0x453   :  { %14897 = vmatprep.mubr.msk.f32.mxu0 %vm15960_vm4, %v19251_v11  ;;  %15391 = vmatprep.subr.bf16.mxu1 %v19398_v57  ;;  %v19404_v57 = vld [vmem:[#allocation44_spill] sm:$0xff] }
 0x454   :  { %15410 = vmatprep.subr.bf16.mxu0 %v19399_v15  ;;  %v9071_v15 = vrot.slane %v16908_v29, %v16341_v2 }
 0x458   :  { %14891 = vmatmul.mubr.f32.vlgmr.msra.gmra.mrb[24].mxu1 %v8297_v1  ;;  %v9466_v1 = vrot.slane %v16914_v56, %v16341_v2 }
 0x459   :  { %14898 = vmatmul.mubr.f32.vlgmr.msra.gmra.mrb[26].mxu0 %v8692_v36  ;;  %15393 = vmatpush1.bf16.xpose.msra.mxu1 %v16792_v51  ;;  %v9067_v51 = vrot.slane %v16908_v29, %v16558_v38  ;;  %v9083_v36 = vrot.slane %v16908_v29, %v16645_v39 }
 0x45a   :  { %9161 = vmatprep.mubr.f32.mxu1 %v9059_v53  ;;  %15412 = vmatpush1.bf16.xpose.msra.mxu0 %v16794_v41  ;;  %v9462_v41 = vrot.slane %v16914_v56, %v16558_v38  ;;  %v19405_v53 = vld [vmem:[#allocation47_spill] sm:$0xff] }
 0x45b   :  { %9556 = vmatprep.mubr.f32.mxu0 %v9454_v14  ;;  %15395 = vmatprep.subr.bf16.mxu1 %v16800_v18  ;;  %v19400_v18 = vld [vmem:[#allocation40_spill] sm:$0xff]  ;;  %v9478_v14 = vrot.slane %v16914_v56, %v16645_v39 }
 0x45c   :  { %15414 = vmatprep.subr.bf16.mxu0 %v16802_v54  ;;  %v9063_v54 = vrot.slane %v16908_v29, %v16338_v63 }
 0x460   :  { %9162 = vmatmul.mubr.f32.vlgmr.msra.gmra.mrb[26].mxu1 %v9055_v31  ;;  %v19406_v31 = vld [vmem:[#allocation50_spill] sm:$0xff] }
 0x461   :  { %9557 = vmatmul.mubr.f32.vlgmr.msra.gmra.mrb[28].mxu0 %v9450_v19  ;;  %15397 = vmatpush1.bf16.xpose.msra.mxu1 %v16889_v10  ;;  %v9075_v10 = vrot.slane %v16908_v29, %v16614_v52  ;;  %v9079_v19 = vrot.slane %v16908_v29, %v16344_v3  ;;  %v8075_v29 = vcombine.high %v18534_v61, %v18534_v61  ;;  %v19414_v61 = vld [vmem:[#allocation56_spill] sm:$0xff] }
 0x462   :  { %9231 = vmatprep.mubr.f32.mxu1 %v9067_v51  ;;  %15416 = vmatpush1.bf16.xpose.msra.mxu0 %v16891_v40  ;;  %v9470_v40 = vrot.slane %v16914_v56, %v16614_v52  ;;  %v9474_v51 = vrot.slane %v16914_v56, %v16344_v3  ;;  %v19410_v56 = vld [vmem:[#allocation54_spill] sm:$0xff] }
 0x463   :  { %9626 = vmatprep.mubr.f32.mxu0 %v9462_v41  ;;  %15399 = vmatprep.subr.bf16.mxu1 %v16899_v26  ;;  %v19402_v26 = vld [vmem:[#allocation42_spill] sm:$0xff]  ;;  %v19407_v41 = vld [vmem:[#allocation51_spill] sm:$0xff] }
 0x464   :  { %15418 = vmatprep.subr.bf16.mxu0 %v19400_v18  ;;  %v19408_v18 = vld [vmem:[#allocation52_spill] sm:$0xff] }
 0x468   :  { %9232 = vmatmul.mubr.f32.vlgmr.msra.gmra.mrb[26].mxu1 %v9063_v54  ;;  %v8073_v54 = vcombine.high %v18529_v34, %v18529_v34  ;;  %v19412_v34 = vld [vmem:[#allocation55_spill] sm:$0xff] }
 0x469   :  { %9627 = vmatmul.mubr.f32.vlgmr.msra.gmra.mrb[28].mxu0 %v9458_v60  ;;  %15401 = vmatpush1.bf16.xpose.msra.mxu1 %v19401_v37  ;;  %v19409_v60 = vld [vmem:[#allocation53_spill] sm:$0xff]  ;;  %v9482_v37 = vrot.slane %v8075_v29, %v16330_v23 }
 0x46a   :  { %9301 = vmatprep.mubr.f32.mxu1 %v9075_v10  ;;  %15420 = vmatpush1.bf16.xpose.msra.mxu0 %v19402_v26  ;;  %v9087_v10 = vrot.slane %v8073_v54, %v16330_v23 }
 0x46b   :  { %9696 = vmatprep.mubr.f32.mxu0 %v9470_v40  ;;  %15403 = vmatprep.subr.bf16.mxu1 %v19403_v46  ;;  %v19411_v40 = vld [vmem:[#allocation45_spill] sm:$0xff]  ;;  %v19413_v46 = vld [vmem:[#allocation46_spill] sm:$0xff] }
 0x46c   :  { %15422 = vmatprep.subr.bf16.mxu0 %v19404_v57  ;;  %v9849_v26 = vrot.slane %v19411_v40, %v16519_v21  ;;  %v10244_v57 = vrot.slane %v19413_v46, %v16519_v21 }
 0x470   :  { %9302 = vmatmul.mubr.f32.vlgmr.msra.gmra.mrb[26].mxu1 %v9071_v15  ;;  %v19415_v15 = vld [vmem:[#allocation57_spill] sm:$0xff] }
 0x471   :  { %9697 = vmatmul.mubr.f32.vlgmr.msra.gmra.mrb[28].mxu0 %v9466_v1  ;;  %15405 = vmatpush1.bf16.xpose.msra.mxu1 %v19405_v53  ;;  %v19416_v1 = vld [vmem:[#allocation58_spill] sm:$0xff]  ;;  %v10240_v53 = vrot.slane %v19413_v46, %v16330_v23 }
 0x472   :  { %9371 = vmatprep.mubr.f32.mxu1 %v9083_v36  ;;  %15424 = vmatpush1.bf16.xpose.msra.mxu0 %v19406_v31  ;;  %v9845_v36 = vrot.slane %v19411_v40, %v16330_v23  ;;  %v19417_v31 = vld [vmem:[#allocation59_spill] sm:$0xff] }
 0x473   :  { %9766 = vmatprep.mubr.f32.mxu0 %v9478_v14  ;;  %15406 = vmatprep.subr.bf16.mxu1 %v19272_v25  ;;  %v9857_v14 = vrot.slane %v19411_v40, %v16558_v38 }
 0x474   :  { %15425 = vmatprep.subr.bf16.mxu0 %v19272_v25 }
 0x478   :  { %9372 = vmatmul.mubr.f32.vlgmr.msra.gmra.mrb[26].mxu1 %v9079_v19  ;;  %v10252_v19 = vrot.slane %v19413_v46, %v16558_v38 }
 0x479   :  { %9767 = vmatmul.mubr.f32.vlgmr.msra.gmra.mrb[28].mxu0 %v9474_v51  ;;  %15408 = vmatpush3.bf16.xpose.msra.mxu1 %v19407_v41  ;;  %v19418_v51 = vld [vmem:[#allocation60_spill] sm:$0xff] }
 0x47a   :  { %15427 = vmatpush3.bf16.xpose.msra.mxu0 %v19408_v18  ;;  %14904 = vmatprep.mubr.msk.f32.mxu1 %vm15960_vm4, %v19251_v11  ;;  %v19419_v18 = vld [vmem:[#allocation61_spill] sm:$0xff] }
 0x47b   :  { %14911 = vmatprep.mubr.msk.f32.mxu0 %vm15960_vm4, %v19251_v11  ;;  %15429 = vmatprep.subr.bf16.mxu1 %v19409_v60 }
 0x47c   :  { %15448 = vmatprep.subr.bf16.mxu0 %v19410_v56  ;;  %v19420_v56 = vld [vmem:[#allocation62_spill] sm:$0xff] }
 0x480   :  { %14905 = vmatmul.mubr.f32.vlgmr.msra.gmra.mrb[26].mxu1 %v9087_v10 }
 0x481   :  { %14912 = vmatmul.mubr.f32.vlgmr.msra.gmra.mrb[28].mxu0 %v9482_v37  ;;  %15431 = vmatpush1.bf16.xpose.msra.mxu1 %v19412_v34  ;;  %v9853_v34 = vrot.slane %v19411_v40, %v16338_v63 }
 0x482   :  { %9951 = vmatprep.mubr.f32.mxu1 %v9849_v26  ;;  %15450 = vmatpush1.bf16.xpose.msra.mxu0 %v19414_v61  ;;  %v10248_v61 = vrot.slane %v19413_v46, %v16338_v63 }
 0x483   :  { %10346 = vmatprep.mubr.f32.mxu0 %v10244_v57  ;;  %15433 = vmatprep.subr.bf16.mxu1 %v19415_v15  ;;  %v9865_v15 = vrot.slane %v19411_v40, %v16614_v52 }
 0x484   :  { %15452 = vmatprep.subr.bf16.mxu0 %v19416_v1  ;;  %v19421_v1 = vld [vmem:[#allocation63_spill] sm:$0xff] }
 0x488   :  { %9952 = vmatmul.mubr.f32.vlgmr.msra.gmra.mrb[28].mxu1 %v9845_v36  ;;  %v19422_v36 = vld [vmem:[#allocation64_spill] sm:$0xff] }
 0x489   :  { %10347 = vmatmul.mubr.f32.vlgmr.msra.gmra.mrb[30].mxu0 %v10240_v53  ;;  %15435 = vmatpush1.bf16.xpose.msra.mxu1 %v19417_v31  ;;  %v19423_v53 = vld [vmem:[#allocation65_spill] sm:$0xff]  ;;  %v9861_v31 = vrot.slane %v19411_v40, %v16341_v2 }
 0x48a   :  { %10021 = vmatprep.mubr.f32.mxu1 %v9857_v14  ;;  %15454 = vmatpush1.bf16.xpose.msra.mxu0 %v19418_v51  ;;  %v19424_v14 = vld [vmem:[#allocation66_spill] sm:$0xff]  ;;  %v8028_v51 = vcombine.high %v18508_v8, %v18508_v8  ;;  %v9869_v8 = vrot.slane %v19411_v40, %v16344_v3 }
 0x48b   :  { %10416 = vmatprep.mubr.f32.mxu0 %v10252_v19  ;;  %v4974_v41 = vpop.f32.mrb[16].mxu1  ;;  %15437 = vmatprep.subr.bf16.mxu1 %v19419_v18  ;;  %v10256_v19 = vrot.slane %v19413_v46, %v16341_v2  ;;  %v19425_v18 = vld [vmem:[#allocation67_spill] sm:$0xff] }
 0x48c   :  { %v7759_v54 = vsel %vm7743_vm5, %v4974_v41, 0.0  ;;  %v5369_v29 = vpop.f32.mrb[18].mxu0  ;;  %v14836_v60 = vpop.f32.mrb[17].mxu1  ;;  %15456 = vmatprep.subr.bf16.mxu0 %v19420_v56  ;;  %v9873_v41 = vrot.slane %v19411_v40, %v16645_v39  ;;  %v10264_v56 = vrot.slane %v19413_v46, %v16344_v3 }
 0x48d   :  { %v7760_v10 = vadd.f32 %v7759_v54, %v18478_v30  ;;  %v14843_v37 = vpop.f32.mrb[19].mxu0  ;;  %v7761_v26 = vsel %vm7743_vm5, %v5369_v29, 0.0  ;;  %v10260_v30 = vrot.slane %v19413_v46, %v16614_v52  ;;  %v10268_v54 = vrot.slane %v19413_v46, %v16645_v39  ;;  %v19426_v29 = vld [vmem:[#allocation68_spill] sm:$0xff]  ;;  %v19429_v46 = vld [vmem:[#allocation71_spill] sm:$0xff] }
 0x48e   :  { %v8042_v60 = vrot.slane %v8028_v51, %v16394_v45  ;;  %v19427_v37 = vld [vmem:[#allocation69_spill] sm:$0xff]  ;;  %v19435_v51 = vld [vmem:[#allocation75_spill] sm:$0xff] }
 0x48f   :  { %v18629_v57 = vadd.f32 %v7761_v26, %v7760_v10  ;;  %v19428_v26 = vld [vmem:[#allocation70_spill] sm:$0xff] }
 0x490   :  { %10022 = vmatmul.mubr.f32.vlgmr.msra.gmra.mrb[28].mxu1 %v9853_v34  ;;  %v8044_v10 = vcombine.high %v8042_v60, %v8042_v60  ;;  %v18665_v34 = vrot.slane %v8042_v60, %v16394_v45  ;;  %v19437_v60 = vld [vmem:[#allocation77_spill] sm:$0xff] }
 0x491   :  { %10417 = vmatmul.mubr.f32.vlgmr.msra.gmra.mrb[30].mxu0 %v10248_v61  ;;  %15439 = vmatpush1.bf16.xpose.msra.mxu1 %v19421_v1  ;;  %v19430_v61 = vld [vmem:[#allocation72_spill] sm:$0xff] }
 0x492   :  { %10091 = vmatprep.mubr.f32.mxu1 %v9865_v15  ;;  %15458 = vmatpush1.bf16.xpose.msra.mxu0 %v19422_v36  ;;  %v18670_v40 = vrot.slane %v8044_v10, %v16394_v45  ;;  %v9877_v15 = vrot.slane %v18665_v34, %v16330_v23 }
 0x493   :  { %10486 = vmatprep.mubr.f32.mxu0 %v10260_v30  ;;  %15441 = vmatprep.subr.bf16.mxu1 %v19423_v53  ;;  %v19431_v30 = vld [vmem:[#allocation48_spill] sm:$0xff]  ;;  %v19432_v53 = vld [vmem:[#allocation73_spill] sm:$0xff] }
 0x494   :  { %15460 = vmatprep.subr.bf16.mxu0 %v19424_v14  ;;  %v10272_v1 = vrot.slane %v18670_v40, %v16330_v23  ;;  %v10639_v36 = vrot.slane %v19431_v30, %v16519_v21  ;;  %v19433_v14 = vld [vmem:[#allocation49_spill] sm:$0xff] }
 0x498   :  { %10092 = vmatmul.mubr.f32.vlgmr.msra.gmra.mrb[28].mxu1 %v9861_v31  ;;  %v11034_v31 = vrot.slane %v19433_v14, %v16519_v21 }
 0x499   :  { %10487 = vmatmul.mubr.f32.vlgmr.msra.gmra.mrb[30].mxu0 %v10256_v19  ;;  %15443 = vmatpush1.bf16.xpose.msra.mxu1 %v19425_v18  ;;  %v19434_v19 = vld [vmem:[#allocation74_spill] sm:$0xff]  ;;  %v10635_v18 = vrot.slane %v19431_v30, %v16330_v23 }
 0x49a   :  { %10161 = vmatprep.mubr.f32.mxu1 %v9873_v41  ;;  %15462 = vmatpush1.bf16.xpose.msra.mxu0 %v19426_v29  ;;  %v19436_v41 = vld [vmem:[#allocation76_spill] sm:$0xff]  ;;  %v10647_v29 = vrot.slane %v19431_v30, %v16558_v38 }
 0x49b   :  { %10556 = vmatprep.mubr.f32.mxu0 %v10268_v54  ;;  %15444 = vmatprep.subr.bf16.mxu1 %v19272_v25  ;;  %v11030_v54 = vrot.slane %v19433_v14, %v16330_v23 }
 0x49c   :  { %15463 = vmatprep.subr.bf16.mxu0 %v19272_v25 }
 0x4a0   :  { %10162 = vmatmul.mubr.f32.vlgmr.msra.gmra.mrb[28].mxu1 %v9869_v8  ;;  %v11042_v8 = vrot.slane %v19433_v14, %v16558_v38 }
 0x4a1   :  { %10557 = vmatmul.mubr.f32.vlgmr.msra.gmra.mrb[30].mxu0 %v10264_v56  ;;  %15446 = vmatpush3.bf16.xpose.msra.mxu1 %v19427_v37  ;;  %v19438_v56 = vld [vmem:[#allocation78_spill] sm:$0xff]  ;;  %v19439_v37 = vld [vmem:[#allocation79_spill] sm:$0xff] }
 0x4a2   :  { %15465 = vmatpush3.bf16.xpose.msra.mxu0 %v19428_v26  ;;  %14918 = vmatprep.mubr.msk.f32.mxu1 %vm15960_vm4, %v19251_v11 }
 0x4a3   :  { %14925 = vmatprep.mubr.msk.f32.mxu0 %vm15960_vm4, %v19251_v11  ;;  %15467 = vmatprep.subr.bf16.mxu1 %v19429_v46 }
 0x4a4   :  { %15486 = vmatprep.subr.bf16.mxu0 %v19430_v61 }
 0x4a8   :  { %14919 = vmatmul.mubr.f32.vlgmr.msra.gmra.mrb[28].mxu1 %v9877_v15  ;;  %v19440_v15 = vld [vmem:[#allocation80_spill] sm:$0xff] }
 0x4a9   :  { %14926 = vmatmul.mubr.f32.vlgmr.msra.gmra.mrb[30].mxu0 %v10272_v1  ;;  %15469 = vmatpush1.bf16.xpose.msra.mxu1 %v19432_v53 }
 0x4aa   :  { %10741 = vmatprep.mubr.f32.mxu1 %v10639_v36  ;;  %15488 = vmatpush1.bf16.xpose.msra.mxu0 %v19434_v19 }
 0x4ab   :  { %11136 = vmatprep.mubr.f32.mxu0 %v11034_v31  ;;  %15471 = vmatprep.subr.bf16.mxu1 %v19435_v51  ;;  %v10643_v31 = vrot.slane %v19431_v30, %v16338_v63  ;;  %v11038_v51 = vrot.slane %v19433_v14, %v16338_v63 }
 0x4ac   :  { %15490 = vmatprep.subr.bf16.mxu0 %v19436_v41  ;;  %v10655_v41 = vrot.slane %v19431_v30, %v16614_v52 }
 0x4b0   :  { %10742 = vmatmul.mubr.f32.vlgmr.msra.gmra.mrb[30].mxu1 %v10635_v18  ;;  %v19441_v18 = vld [vmem:[#allocation81_spill] sm:$0xff] }
 0x4b1   :  { %11137 = vmatmul.mubr.f32.vlgmr.msra.gmra.mrb[32].mxu0 %v11030_v54  ;;  %15473 = vmatpush1.bf16.xpose.msra.mxu1 %v19437_v60  ;;  %v19442_v54 = vld [vmem:[#allocation82_spill] sm:$0xff]  ;;  %v19444_v60 = vld [vmem:[#allocation84_spill] sm:$0xff] }
 0x4b2   :  { %10811 = vmatprep.mubr.f32.mxu1 %v10647_v29  ;;  %15492 = vmatpush1.bf16.xpose.msra.mxu0 %v19438_v56  ;;  %v19443_v29 = vld [vmem:[#allocation83_spill] sm:$0xff]  ;;  %v11046_v56 = vrot.slane %v19433_v14, %v16341_v2 }
 0x4b3   :  { %11206 = vmatprep.mubr.f32.mxu0 %v11042_v8  ;;  %v5764_v10 = vpop.f32.mrb[18].mxu1  ;;  %15475 = vmatprep.subr.bf16.mxu1 %v19439_v37  ;;  %v10651_v8 = vrot.slane %v19431_v30, %v16341_v2  ;;  %v19445_v37 = vld [vmem:[#allocation85_spill] sm:$0xff] }
 0x4b4   :  { %v7763_v26 = vsel %vm7743_vm5, %v5764_v10, 0.0  ;;  %v6159_v46 = vpop.f32.mrb[20].mxu0  ;;  %v14850_v61 = vpop.f32.mrb[19].mxu1  ;;  %15494 = vmatprep.subr.bf16.mxu0 %v19440_v15  ;;  %v10663_v10 = vrot.slane %v19431_v30, %v16645_v39  ;;  %v11054_v15 = vrot.slane %v19433_v14, %v16344_v3 }
 0x4b5   :  { %v7764_v1 = vadd.f32 %v7763_v26, %v18629_v57  ;;  %v14857_v36 = vpop.f32.mrb[21].mxu0  ;;  %v7765_v53 = vsel %vm7743_vm5, %v6159_v46, 0.0  ;;  %v11050_v57 = vrot.slane %v19433_v14, %v16614_v52  ;;  %v11058_v26 = vrot.slane %v19433_v14, %v16645_v39  ;;  %v19446_v46 = vld [vmem:[#allocation86_spill] sm:$0xff] }
 0x4b6   :  { %v10659_v61 = vrot.slane %v19431_v30, %v16344_v3  ;;  %v19448_v36 = vld [vmem:[#allocation88_spill] sm:$0xff]  ;;  %v8076_v30 = vcombine.high %v18670_v40, %v18670_v40  ;;  %v19450_v14 = vld [vmem:[#allocation90_spill] sm:$0xff] }
 0x4b7   :  { %v18703_v19 = vadd.f32 %v7765_v53, %v7764_v1  ;;  %v19447_v1 = vld [vmem:[#allocation87_spill] sm:$0xff]  ;;  %v8074_v53 = vcombine.high %v18665_v34, %v18665_v34  ;;  %v19452_v40 = vld [vmem:[#allocation92_spill] sm:$0xff] }
 0x4b8   :  { %10812 = vmatmul.mubr.f32.vlgmr.msra.gmra.mrb[30].mxu1 %v10643_v31  ;;  %v19449_v31 = vld [vmem:[#allocation89_spill] sm:$0xff]  ;;  %v19451_v34 = vld [vmem:[#allocation91_spill] sm:$0xff] }
 0x4b9   :  { %11207 = vmatmul.mubr.f32.vlgmr.msra.gmra.mrb[32].mxu0 %v11038_v51  ;;  %15477 = vmatpush1.bf16.xpose.msra.mxu1 %v19441_v18  ;;  %v10667_v51 = vrot.slane %v8074_v53, %v16330_v23  ;;  %v11429_v18 = vrot.slane %v17661_v28, %v16519_v21 }
 0x4ba   :  { %10881 = vmatprep.mubr.f32.mxu1 %v10655_v41  ;;  %15496 = vmatpush1.bf16.xpose.msra.mxu0 %v19442_v54  ;;  %v11062_v41 = vrot.slane %v8076_v30, %v16330_v23  ;;  %v19453_v54 = vld [vmem:[#allocation93_spill] sm:$0xff]  ;;  %v11836_v30 = vrot.slane %v17669_v55, %v16341_v2 }
 0x4bb   :  { %11276 = vmatprep.mubr.f32.mxu0 %v11050_v57  ;;  %15479 = vmatprep.subr.bf16.mxu1 %v19443_v29  ;;  %v11824_v57 = vrot.slane %v17669_v55, %v16519_v21  ;;  %v19454_v29 = vld [vmem:[#allocation94_spill] sm:$0xff] }
 0x4bc   :  { %15498 = vmatprep.subr.bf16.mxu0 %v19444_v60  ;;  %v11425_v60 = vrot.slane %v17661_v28, %v16330_v23 }
 0x4c0   :  { %10882 = vmatmul.mubr.f32.vlgmr.msra.gmra.mrb[30].mxu1 %v10651_v8  ;;  %v11820_v8 = vrot.slane %v17669_v55, %v16330_v23 }
 0x4c1   :  { %11277 = vmatmul.mubr.f32.vlgmr.msra.gmra.mrb[32].mxu0 %v11046_v56  ;;  %15481 = vmatpush1.bf16.xpose.msra.mxu1 %v19445_v37  ;;  %v11437_v56 = vrot.slane %v17661_v28, %v16558_v38 }
 0x4c2   :  { %10951 = vmatprep.mubr.f32.mxu1 %v10663_v10  ;;  %15500 = vmatpush1.bf16.xpose.msra.mxu0 %v19446_v46  ;;  %v11832_v10 = vrot.slane %v17669_v55, %v16558_v38 }
 0x4c3   :  { %11346 = vmatprep.mubr.f32.mxu0 %v11058_v26  ;;  %15482 = vmatprep.subr.bf16.mxu1 %v19272_v25 }
 0x4c4   :  { %15501 = vmatprep.subr.bf16.mxu0 %v19272_v25 }
 0x4c8   :  { %10952 = vmatmul.mubr.f32.vlgmr.msra.gmra.mrb[30].mxu1 %v10659_v61 }
 0x4c9   :  { %11347 = vmatmul.mubr.f32.vlgmr.msra.gmra.mrb[32].mxu0 %v11054_v15  ;;  %15484 = vmatpush3.bf16.xpose.msra.mxu1 %v19447_v1 }
 0x4ca   :  { %15503 = vmatpush3.bf16.xpose.msra.mxu0 %v19448_v36  ;;  %14932 = vmatprep.mubr.msk.f32.mxu1 %vm15960_vm4, %v19251_v11  ;;  %v11433_v36 = vrot.slane %v17661_v28, %v16338_v63 }
 0x4cb   :  { %14939 = vmatprep.mubr.msk.f32.mxu0 %vm15960_vm4, %v19251_v11  ;;  %15505 = vmatprep.subr.bf16.mxu1 %v19449_v31  ;;  %v19455_v31 = vmax.f32 %v17724_v0, 0.0 }
 0x4cc   :  { %15524 = vmatprep.subr.bf16.mxu0 %v19450_v14  ;;  %v19457_v14 = vld [vmem:[#allocation19_spill] sm:$0xff] }
 0x4d0   :  { %14933 = vmatmul.mubr.f32.vlgmr.msra.gmra.mrb[30].mxu1 %v10667_v51  ;;  %v19458_v51 = vld [vmem:[#allocation9_spill] sm:$0xff] }
 0x4d1   :  { %14940 = vmatmul.mubr.f32.vlgmr.msra.gmra.mrb[32].mxu0 %v11062_v41  ;;  %15507 = vmatpush1.bf16.xpose.msra.mxu1 %v19451_v34  ;;  %v12219_v41 = vrot.slane %v19458_v51, %v16519_v21  ;;  %v19460_v34 = vld [vmem:[#allocation15_spill] sm:$0xff] }
 0x4d2   :  { %11531 = vmatprep.mubr.f32.mxu1 %v11429_v18  ;;  %15526 = vmatpush1.bf16.xpose.msra.mxu0 %v19452_v40  ;;  %v19459_v18 = vld [vmem:[#allocation20_spill] sm:$0xff]  ;;  %v19461_v40 = vld [vmem:[#allocation21_spill] sm:$0xff] }
 0x4d3   :  { %11926 = vmatprep.mubr.f32.mxu0 %v11824_v57  ;;  %15509 = vmatprep.subr.bf16.mxu1 %v19453_v54  ;;  %v12614_v57 = vrot.slane %v19460_v34, %v16519_v21  ;;  %v19462_v54 = vld [vmem:[#allocation34_spill] sm:$0xff] }
 0x4d4   :  { %15528 = vmatprep.subr.bf16.mxu0 %v19454_v29  ;;  %v19463_v29 = vld [vmem:[#allocation35_spill] sm:$0xff] }
 0x4d8   :  { %11532 = vmatmul.mubr.f32.vlgmr.msra.gmra.mrb[32].mxu1 %v11425_v60  ;;  %v12215_v60 = vrot.slane %v19458_v51, %v16330_v23 }
 0x4d9   :  { %11927 = vmatmul.mubr.f32.vlgmr.msra.gmra.mrb[34].mxu0 %v11820_v8  ;;  %15511 = vmatpush1.bf16.xpose.msra.mxu1 %v17521_v27  ;;  %v12610_v8 = vrot.slane %v19460_v34, %v16330_v23 }
 0x4da   :  { %11601 = vmatprep.mubr.f32.mxu1 %v11437_v56  ;;  %15530 = vmatpush1.bf16.xpose.msra.mxu0 %v17611_v24  ;;  %v11828_v24 = vrot.slane %v17669_v55, %v16338_v63  ;;  %v12227_v56 = vrot.slane %v19458_v51, %v16558_v38 }
 0x4db   :  { %11996 = vmatprep.mubr.f32.mxu0 %v11832_v10  ;;  %v6554_v37 = vpop.f32.mrb[20].mxu1  ;;  %15513 = vmatprep.subr.bf16.mxu1 %v17613_v16  ;;  %v11445_v16 = vrot.slane %v17661_v28, %v16614_v52  ;;  %v12622_v10 = vrot.slane %v19460_v34, %v16558_v38 }
 0x4dc   :  { %v7767_v26 = vsel %vm7743_vm5, %v6554_v37, 0.0  ;;  %v6949_v46 = vpop.f32.mrb[22].mxu0  ;;  %v14864_v61 = vpop.f32.mrb[21].mxu1  ;;  %15532 = vmatprep.subr.bf16.mxu0 %v17679_v33  ;;  %v11840_v33 = vrot.slane %v17669_v55, %v16614_v52 }
 0x4dd   :  { %v7768_v15 = vadd.f32 %v7767_v26, %v18703_v19  ;;  %v14871_v1 = vpop.f32.mrb[23].mxu0  ;;  %v7769_v27 = vsel %vm7743_vm5, %v6949_v46, 0.0  ;;  %v11441_v19 = vrot.slane %v17661_v28, %v16341_v2 }
 0x4df   :  { %v18770_v53 = vadd.f32 %v7769_v27, %v7768_v15  ;;  %v19464_v15 = vld [vmem:[#allocation13_spill] sm:$0xff] }
 0x4e0   :  { %11602 = vmatmul.mubr.f32.vlgmr.msra.gmra.mrb[32].mxu1 %v11433_v36  ;;  %v12223_v36 = vrot.slane %v19458_v51, %v16338_v63 }
 0x4e1   :  { %11997 = vmatmul.mubr.f32.vlgmr.msra.gmra.mrb[34].mxu0 %v11828_v24  ;;  %15515 = vmatpush1.bf16.xpose.msra.mxu1 %v17707_v59  ;;  %v18789_v59 = vmul.f32 %v18498_v17, %v19455_v31  ;;  %v12626_v31 = vrot.slane %v19460_v34, %v16341_v2 }
 0x4e2   :  { %11671 = vmatprep.mubr.f32.mxu1 %v11445_v16  ;;  %15534 = vmatpush1.bf16.xpose.msra.mxu0 %v17717_v12  ;;  %v11453_v12 = vrot.slane %v17661_v28, %v16645_v39  ;;  %v19465_v16 = vld [vmem:[#allocation31_spill] sm:$0xff] }
 0x4e3   :  { %12066 = vmatprep.mubr.f32.mxu0 %v11840_v33  ;;  %15517 = vmatprep.subr.bf16.mxu1 %v17721_v13  ;;  %v11848_v13 = vrot.slane %v17669_v55, %v16645_v39  ;;  %v8220_v0 = vrot.slane %v18789_v59, %v16394_v45  ;;  %v19466_v33 = vld [vmem:[#allocation95_spill] sm:$0xff] }
 0x4e4   :  { %15536 = vmatprep.subr.bf16.mxu0 %v17728_v4  ;;  %v11449_v4 = vrot.slane %v17661_v28, %v16344_v3 }
 0x4e5   :  { %v8228_v17 = vcombine.high %v8220_v0, %v8220_v0 }
 0x4e7   :  { %v18815_v28 = vrot.slane %v8228_v17, %v16394_v45  ;;  %v19470_v17 = vld [vmem:[#allocation99_spill] sm:$0xff] }
 0x4e8   :  { %11672 = vmatmul.mubr.f32.vlgmr.msra.gmra.mrb[32].mxu1 %v11441_v19  ;;  %v19467_v19 = vld [vmem:[#allocation96_spill] sm:$0xff] }
 0x4e9   :  { %12067 = vmatmul.mubr.f32.vlgmr.msra.gmra.mrb[34].mxu0 %v11836_v30  ;;  %15519 = vmatpush1.bf16.xpose.msra.mxu1 %v17749_v35  ;;  %v11844_v35 = vrot.slane %v17669_v55, %v16344_v3  ;;  %v19456_v55 = vld [vmem:[#allocation18_spill] sm:$0xff]  ;;  %v12231_v30 = vrot.slane %v19458_v51, %v16341_v2 }
 0x4ea   :  { %11741 = vmatprep.mubr.f32.mxu1 %v11453_v12  ;;  %15538 = vmatpush1.bf16.xpose.msra.mxu0 %v17753_v43  ;;  %v18810_v43 = vrot.slane %v8220_v0, %v16394_v45  ;;  %v19468_v12 = vld [vmem:[#allocation97_spill] sm:$0xff]  ;;  %v19469_v0 = vld [vmem:[#allocation98_spill] sm:$0xff] }
 0x4eb   :  { %12136 = vmatprep.mubr.f32.mxu0 %v11848_v13  ;;  %15520 = vmatprep.subr.bf16.mxu1 %v19272_v25  ;;  %v12638_v13 = vrot.slane %v19460_v34, %v16645_v39 }
 0x4ec   :  { %15539 = vmatprep.subr.bf16.mxu0 %v19272_v25 }
 0x4f0   :  { %11742 = vmatmul.mubr.f32.vlgmr.msra.gmra.mrb[32].mxu1 %v11449_v4  ;;  %v12239_v4 = vrot.slane %v19458_v51, %v16344_v3 }
 0x4f1   :  { %12137 = vmatmul.mubr.f32.vlgmr.msra.gmra.mrb[34].mxu0 %v11844_v35  ;;  %15522 = vmatpush3.bf16.xpose.msra.mxu1 %v17790_v50  ;;  %v11457_v50 = vrot.slane %v18810_v43, %v16330_v23  ;;  %v12634_v35 = vrot.slane %v19460_v34, %v16344_v3 }
 0x4f2   :  { %15541 = vmatpush3.bf16.xpose.msra.mxu0 %v17800_v22  ;;  %14946 = vmatprep.mubr.msk.f32.mxu1 %vm15960_vm4, %v19251_v11  ;;  %v11852_v22 = vrot.slane %v18815_v28, %v16330_v23 }
 0x4f3   :  { %14953 = vmatprep.mubr.msk.f32.mxu0 %vm15960_vm4, %v19251_v11  ;;  %15543 = vmatprep.subr.bf16.mxu1 %v19456_v55  ;;  %v19471_v55 = vld [vmem:[#allocation100_spill] sm:$0xff] }
 0x4f4   :  { %15562 = vmatprep.subr.bf16.mxu0 %v19457_v14  ;;  %v8258_v14 = vcombine.high %v18810_v43, %v18810_v43  ;;  %v19475_v43 = vld [vmem:[#allocation103_spill] sm:$0xff] }
 0x4f8   :  { %14947 = vmatmul.mubr.f32.vlgmr.msra.gmra.mrb[32].mxu1 %v11457_v50  ;;  %v8260_v50 = vcombine.high %v18815_v28, %v18815_v28  ;;  %v19477_v28 = vld [vmem:[#allocation104_spill] sm:$0xff] }
 0x4f9   :  { %14954 = vmatmul.mubr.f32.vlgmr.msra.gmra.mrb[34].mxu0 %v11852_v22  ;;  %15545 = vmatpush1.bf16.xpose.msra.mxu1 %v19459_v18  ;;  %v19472_v22 = vld [vmem:[#allocation101_spill] sm:$0xff] }
 0x4fa   :  { %12321 = vmatprep.mubr.f32.mxu1 %v12219_v41  ;;  %15564 = vmatpush1.bf16.xpose.msra.mxu0 %v19461_v40  ;;  %v12247_v41 = vrot.slane %v8258_v14, %v16330_v23  ;;  %v12642_v18 = vrot.slane %v8260_v50, %v16330_v23  ;;  %v19476_v40 = vld [vmem:[#allocation16_spill] sm:$0xff] }
 0x4fb   :  { %12716 = vmatprep.mubr.f32.mxu0 %v12614_v57  ;;  %15547 = vmatprep.subr.bf16.mxu1 %v19462_v54  ;;  %v13404_v54 = vrot.slane %v19476_v40, %v16519_v21  ;;  %v13424_v50 = vrot.slane %v19476_v40, %v16344_v3 }
 0x4fc   :  { %15566 = vmatprep.subr.bf16.mxu0 %v19463_v29  ;;  %v19478_v29 = vld [vmem:[#allocation105_spill] sm:$0xff] }
 0x500   :  { %12322 = vmatmul.mubr.f32.vlgmr.msra.gmra.mrb[34].mxu1 %v12215_v60  ;;  %v19479_v60 = vld [vmem:[#allocation106_spill] sm:$0xff] }
 0x501   :  { %12717 = vmatmul.mubr.f32.vlgmr.msra.gmra.mrb[36].mxu0 %v12610_v8  ;;  %15549 = vmatpush1.bf16.xpose.msra.mxu1 %v17892_v9 }
 0x502   :  { %12391 = vmatprep.mubr.f32.mxu1 %v12227_v56  ;;  %15568 = vmatpush1.bf16.xpose.msra.mxu0 %v17902_v42  ;;  %v12618_v42 = vrot.slane %v19460_v34, %v16338_v63  ;;  %v13400_v56 = vrot.slane %v19476_v40, %v16330_v23 }
 0x503   :  { %12786 = vmatprep.mubr.f32.mxu0 %v12622_v10  ;;  %v7344_v37 = vpop.f32.mrb[22].mxu1  ;;  %15551 = vmatprep.subr.bf16.mxu1 %v17906_v48  ;;  %v12235_v48 = vrot.slane %v19458_v51, %v16614_v52 }
 0x504   :  { %v7771_v26 = vsel %vm7743_vm5, %v7344_v37, 0.0  ;;  %v7739_v46 = vpop.f32.mrb[24].mxu0  ;;  %v14878_v61 = vpop.f32.mrb[23].mxu1  ;;  %15570 = vmatprep.subr.bf16.mxu0 %v19464_v15  ;;  %v13412_v37 = vrot.slane %v19476_v40, %v16558_v38 }
 0x505   :  { %v7772_v1 = vadd.f32 %v7771_v26, %v18770_v53  ;;  %v14885_v27 = vpop.f32.mrb[25].mxu0  ;;  %v7773_v9 = vsel %vm7743_vm5, %v7739_v46, 0.0  ;;  %v12630_v53 = vrot.slane %v19460_v34, %v16614_v52  ;;  %v19474_v34 = vld [vmem:[#allocation12_spill] sm:$0xff]  ;;  %v19480_v26 = vld [vmem:[#allocation107_spill] sm:$0xff] }
 0x506   :  { %v13009_v57 = vrot.slane %v19474_v34, %v16519_v21  ;;  %v13005_v8 = vrot.slane %v19474_v34, %v16330_v23  ;;  %v13017_v10 = vrot.slane %v19474_v34, %v16558_v38  ;;  %v19481_v61 = vld [vmem:[#allocation108_spill] sm:$0xff] }
 0x507   :  { %v18848_v24 = vadd.f32 %v7773_v9, %v7772_v1  ;;  %v19482_v9 = vld [vmem:[#allocation109_spill] sm:$0xff] }
 0x508   :  { %12392 = vmatmul.mubr.f32.vlgmr.msra.gmra.mrb[34].mxu1 %v12223_v36 }
 0x509   :  { %12787 = vmatmul.mubr.f32.vlgmr.msra.gmra.mrb[36].mxu0 %v12618_v42  ;;  %15553 = vmatpush1.bf16.xpose.msra.mxu1 %v17940_v32  ;;  %v12243_v32 = vrot.slane %v19458_v51, %v16645_v39  ;;  %v19473_v51 = vld [vmem:[#allocation102_spill] sm:$0xff] }
 0x50a   :  { %12461 = vmatprep.mubr.f32.mxu1 %v12235_v48  ;;  %15572 = vmatpush1.bf16.xpose.msra.mxu0 %v19465_v16  ;;  %v13013_v48 = vrot.slane %v19474_v34, %v16338_v63  ;;  %v13025_v16 = vrot.slane %v19474_v34, %v16614_v52 }
 0x50b   :  { %12856 = vmatprep.mubr.f32.mxu0 %v12630_v53  ;;  %15555 = vmatprep.subr.bf16.mxu1 %v19466_v33  ;;  %v13408_v53 = vrot.slane %v19476_v40, %v16338_v63  ;;  %v19483_v33 = vld [vmem:[#allocation110_spill] sm:$0xff] }
 0x50c   :  { %15574 = vmatprep.subr.bf16.mxu0 %v19467_v19  ;;  %v13420_v19 = vrot.slane %v19476_v40, %v16614_v52 }
 0x510   :  { %12462 = vmatmul.mubr.f32.vlgmr.msra.gmra.mrb[34].mxu1 %v12231_v30  ;;  %v19484_v30 = vld [vmem:[#allocation111_spill] sm:$0xff] }
 0x511   :  { %12857 = vmatmul.mubr.f32.vlgmr.msra.gmra.mrb[36].mxu0 %v12626_v31  ;;  %15557 = vmatpush1.bf16.xpose.msra.mxu1 %v19468_v12  ;;  %v19485_v31 = vld [vmem:[#allocation112_spill] sm:$0xff]  ;;  %v13021_v12 = vrot.slane %v19474_v34, %v16341_v2 }
 0x512   :  { %12531 = vmatprep.mubr.f32.mxu1 %v12243_v32  ;;  %15576 = vmatpush1.bf16.xpose.msra.mxu0 %v19469_v0  ;;  %v19486_v32 = vld [vmem:[#allocation113_spill] sm:$0xff]  ;;  %v8213_v0 = vcombine.high %v18789_v59, %v18789_v59  ;;  %v13029_v59 = vrot.slane %v19474_v34, %v16344_v3 }
 0x513   :  { %12926 = vmatprep.mubr.f32.mxu0 %v12638_v13  ;;  %15558 = vmatprep.subr.bf16.mxu1 %v19272_v25  ;;  %v13416_v13 = vrot.slane %v19476_v40, %v16341_v2 }
 0x514   :  { %15577 = vmatprep.subr.bf16.mxu0 %v19272_v25  ;;  %v8227_v14 = vrot.slane %v8213_v0, %v16394_v45 }
 0x518   :  { %12532 = vmatmul.mubr.f32.vlgmr.msra.gmra.mrb[34].mxu1 %v12239_v4  ;;  %v13033_v4 = vrot.slane %v19474_v34, %v16645_v39 }
 0x519   :  { %12927 = vmatmul.mubr.f32.vlgmr.msra.gmra.mrb[36].mxu0 %v12634_v35  ;;  %15560 = vmatpush3.bf16.xpose.msra.mxu1 %v19470_v17  ;;  %v19487_v35 = vld [vmem:[#allocation114_spill] sm:$0xff]  ;;  %v13428_v17 = vrot.slane %v19476_v40, %v16645_v39 }
 0x51a   :  { %15579 = vmatpush3.bf16.xpose.msra.mxu0 %v19471_v55  ;;  %14960 = vmatprep.mubr.msk.f32.mxu1 %vm15960_vm4, %v19251_v11  ;;  %v19488_v55 = vld [vmem:[#allocation115_spill] sm:$0xff] }
 0x51b   :  { %14967 = vmatprep.mubr.msk.f32.mxu0 %vm15960_vm4, %v19251_v11  ;;  %15581 = vmatprep.subr.bf16.mxu1 %v19472_v22  ;;  %v8229_v22 = vcombine.high %v8227_v14, %v8227_v14 }
 0x51c   :  { %15600 = vmatprep.subr.bf16.mxu0 %v19473_v51  ;;  %v19489_v51 = vld [vmem:[#allocation116_spill] sm:$0xff] }
 0x51d   :  { %v18955_v34 = vrot.slane %v8229_v22, %v16394_v45 }
 0x520   :  { %14961 = vmatmul.mubr.f32.vlgmr.msra.gmra.mrb[34].mxu1 %v12247_v41  ;;  %v19490_v41 = vld [vmem:[#allocation117_spill] sm:$0xff] }
 0x521   :  { %14968 = vmatmul.mubr.f32.vlgmr.msra.gmra.mrb[36].mxu0 %v12642_v18  ;;  %15583 = vmatpush1.bf16.xpose.msra.mxu1 %v19475_v43  ;;  %v18950_v18 = vrot.slane %v8227_v14, %v16394_v45  ;;  %v19492_v43 = vld [vmem:[#allocation119_spill] sm:$0xff]  ;;  %v19495_v45 = vld [vmem:[#allocation17_spill] sm:$0xff] }
 0x522   :  { %13111 = vmatprep.mubr.f32.mxu1 %v13009_v57  ;;  %15602 = vmatpush1.bf16.xpose.msra.mxu0 %v19477_v28  ;;  %v19491_v57 = vld [vmem:[#allocation118_spill] sm:$0xff] }
 0x523   :  { %13506 = vmatprep.mubr.f32.mxu0 %v13404_v54  ;;  %15585 = vmatprep.subr.bf16.mxu1 %v19478_v29  ;;  %v13037_v40 = vrot.slane %v18950_v18, %v16330_v23  ;;  %v13432_v54 = vrot.slane %v18955_v34, %v16330_v23  ;;  %v19493_v28 = vld [vmem:[#allocation14_spill] sm:$0xff] }
 0x524   :  { %15604 = vmatprep.subr.bf16.mxu0 %v19479_v60  ;;  %v13799_v29 = vrot.slane %v19493_v28, %v16519_v21  ;;  %v19494_v60 = vld [vmem:[#allocation120_spill] sm:$0xff] }
 0x528   :  { %13112 = vmatmul.mubr.f32.vlgmr.msra.gmra.mrb[36].mxu1 %v13005_v8  ;;  %v14194_v8 = vrot.slane %v19495_v45, %v16519_v21  ;;  %v14202_v21 = vrot.slane %v19495_v45, %v16558_v38 }
 0x529   :  { %13507 = vmatmul.mubr.f32.vlgmr.msra.gmra.mrb[38].mxu0 %v13400_v56  ;;  %15587 = vmatpush1.bf16.xpose.msra.mxu1 %v18102_v49  ;;  %v19496_v56 = vld [vmem:[#allocation121_spill] sm:$0xff] }
 0x52a   :  { %13181 = vmatprep.mubr.f32.mxu1 %v13017_v10  ;;  %15606 = vmatpush1.bf16.xpose.msra.mxu0 %v19480_v26  ;;  %v19497_v10 = vld [vmem:[#allocation122_spill] sm:$0xff]  ;;  %v13795_v26 = vrot.slane %v19493_v28, %v16330_v23 }
 0x52b   :  { %13576 = vmatprep.mubr.f32.mxu0 %v13412_v37  ;;  %v8653_v46 = vpop.f32.mrb[24].mxu1  ;;  %15589 = vmatprep.subr.bf16.mxu1 %v19481_v61  ;;  %v19498_v37 = vld [vmem:[#allocation123_spill] sm:$0xff]  ;;  %v13807_v61 = vrot.slane %v19493_v28, %v16558_v38  ;;  %v13803_v38 = vrot.slane %v19493_v28, %v16338_v63 }
 0x52c   :  { %v14582_v15 = vsel %vm7743_vm5, %v8653_v46, 0.0  ;;  %v9048_v1 = vpop.f32.mrb[26].mxu0  ;;  %v14892_v27 = vpop.f32.mrb[25].mxu1  ;;  %15608 = vmatprep.subr.bf16.mxu0 %v19482_v9  ;;  %v14190_v46 = vrot.slane %v19495_v45, %v16330_v23 }
 0x52d   :  { %v14583_v36 = vsel %vm7743_vm5, %v9048_v1, 0.0  ;;  %v14899_v42 = vpop.f32.mrb[27].mxu0 }
 0x52e   :  { %v18912_v49 = vadd.f32 %v14583_v36, %v14582_v15  ;;  %v19499_v36 = vld [vmem:[#allocation124_spill] sm:$0xff] }
 0x530   :  { %13182 = vmatmul.mubr.f32.vlgmr.msra.gmra.mrb[36].mxu1 %v13013_v48 }
 0x531   :  { %13577 = vmatmul.mubr.f32.vlgmr.msra.gmra.mrb[38].mxu0 %v13408_v53  ;;  %15591 = vmatpush1.bf16.xpose.msra.mxu1 %v19483_v33 }
 0x532   :  { %13251 = vmatprep.mubr.f32.mxu1 %v13025_v16  ;;  %15610 = vmatpush1.bf16.xpose.msra.mxu0 %v19484_v30  ;;  %v14206_v16 = vrot.slane %v19495_v45, %v16341_v2 }
 0x533   :  { %13646 = vmatprep.mubr.f32.mxu0 %v13420_v19  ;;  %15593 = vmatprep.subr.bf16.mxu1 %v19485_v31 }
 0x534   :  { %15612 = vmatprep.subr.bf16.mxu0 %v19486_v32 }
 0x538   :  { %13252 = vmatmul.mubr.f32.vlgmr.msra.gmra.mrb[36].mxu1 %v13021_v12 }
 0x539   :  { %13647 = vmatmul.mubr.f32.vlgmr.msra.gmra.mrb[38].mxu0 %v13416_v13  ;;  %15595 = vmatpush1.bf16.xpose.msra.mxu1 %v19487_v35 }
 0x53a   :  { %13321 = vmatprep.mubr.f32.mxu1 %v13033_v4  ;;  %15614 = vmatpush1.bf16.xpose.msra.mxu0 %v19488_v55 }
 0x53b   :  { %13716 = vmatprep.mubr.f32.mxu0 %v13428_v17  ;;  %15596 = vmatprep.subr.bf16.mxu1 %v19272_v25 }
 0x53c   :  { %15615 = vmatprep.subr.bf16.mxu0 %v19272_v25 }
 0x540   :  { %13322 = vmatmul.mubr.f32.vlgmr.msra.gmra.mrb[36].mxu1 %v13029_v59 }
 0x541   :  { %13717 = vmatmul.mubr.f32.vlgmr.msra.gmra.mrb[38].mxu0 %v13424_v50  ;;  %15598 = vmatpush3.bf16.xpose.msra.mxu1 %v19489_v51 }
 0x542   :  { %15617 = vmatpush3.bf16.xpose.msra.mxu0 %v19490_v41  ;;  %14974 = vmatprep.mubr.msk.f32.mxu1 %vm15960_vm4, %v19251_v11 }
 0x543   :  { %14981 = vmatprep.mubr.msk.f32.mxu0 %vm15960_vm4, %v19251_v11  ;;  %15619 = vmatprep.subr.bf16.mxu1 %v19491_v57 }
 0x544   :  { %15638 = vmatprep.subr.bf16.mxu0 %v19492_v43 }
 0x548   :  { %14975 = vmatmul.mubr.f32.vlgmr.msra.gmra.mrb[36].mxu1 %v13037_v40 }
 0x549   :  { %14982 = vmatmul.mubr.f32.vlgmr.msra.gmra.mrb[38].mxu0 %v13432_v54  ;;  %15621 = vmatpush1.bf16.xpose.msra.mxu1 %v19494_v60 }
 0x54a   :  { %13901 = vmatprep.mubr.f32.mxu1 %v13799_v29  ;;  %15640 = vmatpush1.bf16.xpose.msra.mxu0 %v19496_v56 }
 0x54b   :  { %14296 = vmatprep.mubr.f32.mxu0 %v14194_v8  ;;  %15623 = vmatprep.subr.bf16.mxu1 %v19497_v10 }
 0x54c   :  { %15642 = vmatprep.subr.bf16.mxu0 %v19498_v37 }
 0x550   :  { %13902 = vmatmul.mubr.f32.vlgmr.msra.gmra.mrb[38].mxu1 %v13795_v26 }
 0x551   :  { %14297 = vmatmul.mubr.f32.vlgmr.msra.gmra.mrb[40].mxu0 %v14190_v46  ;;  %15625 = vmatpush1.bf16.xpose.msra.mxu1 %v18320_v58 }
 0x552   :  { %13971 = vmatprep.mubr.f32.mxu1 %v13807_v61  ;;  %15644 = vmatpush1.bf16.xpose.msra.mxu0 %v18330_v7  ;;  %v14198_v7 = vrot.slane %v19495_v45, %v16338_v63  ;;  %v13811_v63 = vrot.slane %v19493_v28, %v16341_v2  ;;  %v13819_v2 = vrot.slane %v19493_v28, %v16344_v3 }
 0x553   :  { %14366 = vmatprep.mubr.f32.mxu0 %v14202_v21  ;;  %v9443_v15 = vpop.f32.mrb[26].mxu1  ;;  %15627 = vmatprep.subr.bf16.mxu1 %v18334_v62  ;;  %v13815_v62 = vrot.slane %v19493_v28, %v16614_v52 }
 0x554   :  { %v14585_v1 = vsel %vm7743_vm5, %v9443_v15, 0.0  ;;  %v9838_v27 = vpop.f32.mrb[28].mxu0  ;;  %v14906_v9 = vpop.f32.mrb[27].mxu1  ;;  %15646 = vmatprep.subr.bf16.mxu0 %v19499_v36 }
 0x555   :  { %v14586_v42 = vadd.f32 %v14585_v1, %v18912_v49  ;;  %v14913_v48 = vpop.f32.mrb[29].mxu0  ;;  %v14587_v58 = vsel %vm7743_vm5, %v9838_v27, 0.0  ;;  %v14210_v49 = vrot.slane %v19495_v45, %v16614_v52  ;;  %v14218_v52 = vrot.slane %v19495_v45, %v16645_v39 }
 0x557   :  { %v14588_v53 = vadd.f32 %v14587_v58, %v14586_v42 }
 0x558   :  { %13972 = vmatmul.mubr.f32.vlgmr.msra.gmra.mrb[38].mxu1 %v13803_v38 }
 0x559   :  { %14367 = vmatmul.mubr.f32.vlgmr.msra.gmra.mrb[40].mxu0 %v14198_v7  ;;  %15629 = vmatpush1.bf16.xpose.msra.mxu1 %v18369_v6  ;;  %v13823_v6 = vrot.slane %v19493_v28, %v16645_v39  ;;  %v8259_v39 = vcombine.high %v18950_v18, %v18950_v18 }
 0x55a   :  { %14041 = vmatprep.mubr.f32.mxu1 %v13815_v62  ;;  %15648 = vmatpush1.bf16.xpose.msra.mxu0 %v18379_v44  ;;  %v19500_v44 = vld [vmem:[#allocation125_spill] sm:$0xff] }
 0x55b   :  { %14436 = vmatprep.mubr.f32.mxu0 %v14210_v49  ;;  %15631 = vmatprep.subr.bf16.mxu1 %v18383_v5  ;;  %v14214_v5 = vrot.slane %v19495_v45, %v16344_v3  ;;  %v13827_v3 = vrot.slane %v8259_v39, %v16330_v23  ;;  %v14660_v49 = vld [vmem:[%s19060_s5] ss:$0 sm:$0xff] }
 0x55c   :  { %15650 = vmatprep.subr.bf16.mxu0 %v18387_v47  ;;  %v19501_v47 = vld [vmem:[#allocation126_spill] sm:$0xff] }
 0x560   :  { %14042 = vmatmul.mubr.f32.vlgmr.msra.gmra.mrb[38].mxu1 %v13811_v63 }
 0x561   :  { %14437 = vmatmul.mubr.f32.vlgmr.msra.gmra.mrb[40].mxu0 %v14206_v16  ;;  %15633 = vmatpush1.bf16.xpose.msra.mxu1 %v18407_v20  ;;  %v19502_v20 = vld [vmem:[#allocation127_spill] sm:$0xff] }
 0x562   :  { %14111 = vmatprep.mubr.f32.mxu1 %v13823_v6  ;;  %15652 = vmatpush1.bf16.xpose.msra.mxu0 %v19500_v44 }
 0x563   :  { %14506 = vmatprep.mubr.f32.mxu0 %v14218_v52  ;;  %15634 = vmatprep.subr.bf16.mxu1 %v19272_v25 }
 0x564   :  { %15653 = vmatprep.subr.bf16.mxu0 %v19272_v25  ;;  %v8261_v25 = vcombine.high %v18955_v34, %v18955_v34 }
 0x566   :  { %v14222_v33 = vrot.slane %v8261_v25, %v16330_v23 }
 0x568   :  { %14112 = vmatmul.mubr.f32.vlgmr.msra.gmra.mrb[38].mxu1 %v13819_v2 }
 0x569   :  { %14507 = vmatmul.mubr.f32.vlgmr.msra.gmra.mrb[40].mxu0 %v14214_v5  ;;  %15636 = vmatpush3.bf16.xpose.msra.mxu1 %v19501_v47 }
 0x56a   :  { %15655 = vmatpush3.bf16.xpose.msra.mxu0 %v19502_v20  ;;  %14988 = vmatprep.mubr.msk.f32.mxu1 %vm15960_vm4, %v19251_v11 }
 0x56b   :  { %14995 = vmatprep.mubr.msk.f32.mxu0 %vm15960_vm4, %v19251_v11 }
 0x570   :  { %14989 = vmatmul.mubr.f32.vlgmr.msra.gmra.mrb[38].mxu1 %v13827_v3 }
 0x571   :  { %14996 = vmatmul.mubr.f32.vlgmr.msra.gmra.mrb[40].mxu0 %v14222_v33 }
 0x57b   :  { %v10233_v19 = vpop.f32.mrb[28].mxu1 }
 0x57c   :  { %v14589_v30 = vsel %vm7743_vm5, %v10233_v19, 0.0  ;;  %v10628_v31 = vpop.f32.mrb[30].mxu0  ;;  %v14920_v32 = vpop.f32.mrb[29].mxu1 }
 0x57d   :  { %v14590_v12 = vadd.f32 %v14589_v30, %v14588_v53  ;;  %v14927_v13 = vpop.f32.mrb[31].mxu0  ;;  %v14591_v0 = vsel %vm7743_vm5, %v10628_v31, 0.0 }
 0x57f   :  { %v14592_v4 = vadd.f32 %v14591_v0, %v14590_v12 }
 0x5a3   :  { %v11023_v11 = vpop.f32.mrb[30].mxu1 }
 0x5a4   :  { %v14593_v35 = vsel %vm7743_vm5, %v11023_v11, 0.0  ;;  %v11418_v17 = vpop.f32.mrb[32].mxu0  ;;  %v14934_v55 = vpop.f32.mrb[31].mxu1 }
 0x5a5   :  { %v14594_v14 = vadd.f32 %v14593_v35, %v14592_v4  ;;  %v14941_v59 = vpop.f32.mrb[33].mxu0  ;;  %v14595_v23 = vsel %vm7743_vm5, %v11418_v17, 0.0 }
 0x5a7   :  { %v14596_v50 = vadd.f32 %v14595_v23, %v14594_v14 }
 0x5cb   :  { %v11813_v22 = vpop.f32.mrb[32].mxu1 }
 0x5cc   :  { %v14597_v51 = vsel %vm7743_vm5, %v11813_v22, 0.0  ;;  %v12208_v41 = vpop.f32.mrb[34].mxu0  ;;  %v14948_v18 = vpop.f32.mrb[33].mxu1 }
 0x5cd   :  { %v14598_v34 = vadd.f32 %v14597_v51, %v14596_v50  ;;  %v14955_v57 = vpop.f32.mrb[35].mxu0  ;;  %v14599_v43 = vsel %vm7743_vm5, %v12208_v41, 0.0 }
 0x5cf   :  { %v14600_v40 = vadd.f32 %v14599_v43, %v14598_v34 }
 0x5f3   :  { %v12603_v54 = vpop.f32.mrb[34].mxu1 }
 0x5f4   :  { %v14601_v28 = vsel %vm7743_vm5, %v12603_v54, 0.0  ;;  %v12998_v29 = vpop.f32.mrb[36].mxu0  ;;  %v14962_v60 = vpop.f32.mrb[35].mxu1 }
 0x5f5   :  { %v14602_v45 = vadd.f32 %v14601_v28, %v14600_v40  ;;  %v14969_v8 = vpop.f32.mrb[37].mxu0  ;;  %v14603_v56 = vsel %vm7743_vm5, %v12998_v29, 0.0 }
 0x5f7   :  { %v14604_v10 = vadd.f32 %v14603_v56, %v14602_v45 }
 0x61b   :  { %v13393_v37 = vpop.f32.mrb[36].mxu1 }
 0x61c   :  { %v14605_v26 = vsel %vm7743_vm5, %v13393_v37, 0.0  ;;  %v13788_v46 = vpop.f32.mrb[38].mxu0  ;;  %v14976_v61 = vpop.f32.mrb[37].mxu1 }
 0x61d   :  { %v14606_v21 = vadd.f32 %v14605_v26, %v14604_v10  ;;  %v14983_v15 = vpop.f32.mrb[39].mxu0  ;;  %v14607_v1 = vsel %vm7743_vm5, %v13788_v46, 0.0 }
 0x61f   :  { %v14608_v27 = vadd.f32 %v14607_v1, %v14606_v21 }
 0x643   :  { %v14183_v9 = vpop.f32.mrb[38].mxu1 }
 0x644   :  { %v14609_v36 = vsel %vm7743_vm5, %v14183_v9, 0.0  ;;  %v14578_v42 = vpop.f32.mrb[40].mxu0  ;;  %v14990_v48 = vpop.f32.mrb[39].mxu1 }
 0x645   :  { %v14610_v58 = vadd.f32 %v14609_v36, %v14608_v27  ;;  %v14997_v38 = vpop.f32.mrb[41].mxu0  ;;  %v14611_v53 = vsel %vm7743_vm5, %v14578_v42, 0.0 }
 0x647   :  { %v14612_v7 = vadd.f32 %v14611_v53, %v14610_v58 }
 0x649   :  { %v14614_v62 = vrot.slane %v14612_v7, 7 }
 0x64b   :  { %v14616_v63 = vsel %vm69_vm0, %v18848_v24, %v14614_v62 }
 0x64c   :  { %v14624_v16 = vadd.f32 %v14660_v49, %v14616_v63 }
 0x64e   :  { %14626 = vst.msk [vmem:[#allocation2] sm:$0x3] %vm14625_vm6, %v14624_v16 }
 0x64f   :  { %15941 = shalt.err (!%p15938_p4)
}
 0x650   :  { %s15942_s5 = scalar_lea.hbm %s19061_s6, 32 }
 0x651   :  { %p15943_p5 = scmp.ne.s32.totalorder %s19061_s6, %s15942_s5  ;;  %p15946_p6 = scmp.lt.u32.totalorder %s15942_s5, %s19061_s6 }
 0x653   :  { %p15948_p7 = pnand %p15946_p6, %p15943_p5 }
 0x655   :  { %15951 = shalt.err (!%p15948_p7)
}
 0x656   :  { %14636 = dma.vmem_to_hbm [thread:$0]  %s14634_s21, 32, %s19061_s6, [#allocation3]  }
 0x657   :  { %15952 = dma.done.wait [#allocation3], 32  }
 0x658   :  { %15953 = vsyncadd [#allocation3], 4294967264 }
 0x659   :  { %14640 = vsyncpa [#allocation3], 1 }

</bundles_post_ra>
